<compile_context>
chip_gen: v6e
topology: v6e:2x2x1
jax: 0.10.0
libtpu: 0.0.40
codegen_flags: <defaults>
</compile_context>

<pallas_src>
from functools import partial
from math import sqrt

import jax
import jax.numpy as jnp
from jax.experimental import pallas as pl
from jax.experimental.pallas import tpu as pltpu

# ---------------- SAConfig ----------------
NUM_SLOTS = 8                                  # S
TOKENS_PER_SLOT = 1
TOKEN_DIM = 128
SLOT_DIM = TOKENS_PER_SLOT * TOKEN_DIM         # D = 128
CHANNELS_ENC = 64                              # C
ITERS = 2
NUM_HEADS = 4                                  # predictor TransformerEncoder(num_heads=4)
HEAD_DIM = SLOT_DIM // NUM_HEADS               # 32
ATTN_EPS = 1e-8
LN_EPS = 1e-5
SCALE = SLOT_DIM ** -0.5

B, T, N = 2, 3, 16                             # small example shapes

# Host-side fused / pre-packed weights fed to the kernel (order matters).
W_NAMES = (
    "wkv",          # (C, 2D)     [SCALE*to_k | to_v]
    "wq",           # (D, D)
    "gru_w_a",      # (2D, 3D)    [u|h] @ gru_w_a -> [r_pre | z_pre | gi_n]
    "gru_w_hn",     # (D, D)      h @ gru_w_hn -> gh_n
    "mlp_w1",       # (D, 4D)
    "mlp_w2",       # (4D, D)
    "prior_w1",     # (D, D)
    "prior_w2",     # (D, D)
    "pred_wqkv",    # (D, 3D)     [q (pre-scaled) | k | v], heads contiguous on lanes
    "pred_wo",      # (D, D)      full output projection (heads concat on lanes)
    "pred_f1",      # (D, 4D)
    "pred_f2",      # (4D, D)
)


def _jnp_recip(v):
    return 1.0 / v


# ---------------- shared math (used by the Pallas kernel AND the pure-JAX reference;
# the only difference is the `recip` callable) ----------------
def _layer_norm(x):
    m = jnp.mean(x, axis=-1, keepdims=True)
    v = jnp.mean(jnp.square(x - m), axis=-1, keepdims=True)
    return (x - m) * jax.lax.rsqrt(v + LN_EPS)


def _softmax(x, axis, recip=_jnp_recip):
    m = jnp.max(x, axis=axis, keepdims=True)
    e = jnp.exp(x - m)
    return e * recip(jnp.sum(e, axis=axis, keepdims=True))


def _gru_cell_fused(u, h, w_a, w_hn, dt):
    """PyTorch nn.GRUCell (gate order r, z, n; zero biases).  u, h: (M, D) f32.

    Fused [u|h] @ (2D, 3D) exactly fills the 256-deep v6e/v7x MXU.
    # TODO(synk): on v5e (128-deep MXU) split back into two K=128 matmuls and sum.
    """
    d = SLOT_DIM
    g = jnp.dot(jnp.concatenate([u, h], axis=-1).astype(dt), w_a,
                preferred_element_type=jnp.float32)            # (M, 3D) = [r|z|gi_n]
    gh_n = jnp.dot(h.astype(dt), w_hn, preferred_element_type=jnp.float32)
    r = jax.nn.sigmoid(g[:, 0:d])
    z = jax.nn.sigmoid(g[:, d:2 * d])
    n = jnp.tanh(g[:, 2 * d:] + r * gh_n)
    return (1.0 - z) * n + z * h


# TODO(synk): exact TransformerEncoder source not provided; implemented as a standard
# 1-block pre-LN encoder (4-head self-attention + ReLU MLP), dropout(0.1) = identity (eval).
def _predictor(x, p, recip=_jnp_recip):
    """x: (BB, S, D) f32.  Single lane-dense QKV matmul + single output projection."""
    bb, s, d = x.shape
    dt = p["pred_wqkv"].dtype
    nh, hd = NUM_HEADS, HEAD_DIM

    hn = _layer_norm(x).reshape(bb * s, d).astype(dt)
    # one (BB*S, D) @ (D, 3D) matmul; q columns pre-scaled by hd^-0.5 on the host
    qkv = jnp.dot(hn, p["pred_wqkv"],
                  preferred_element_type=jnp.float32).astype(dt)   # (BB*S, 3D)

    def split_heads(y):  # (BB*S, D) -> (H*BB, S, hd), head-major
        return jnp.stack([y[:, i * hd:(i + 1) * hd] for i in range(nh)],
                         axis=0).reshape(nh * bb, s, hd)

    q = split_heads(qkv[:, 0 * d:1 * d])
    k = split_heads(qkv[:, 1 * d:2 * d])
    v = split_heads(qkv[:, 2 * d:3 * d])

    logits = jnp.einsum("xse,xte->xst", q, k,
                        preferred_element_type=jnp.float32)        # (H*BB, S, S)
    attn = _softmax(logits, axis=-1, recip=recip)
    o = jnp.einsum("xst,xte->xse", attn.astype(dt), v,
                   preferred_element_type=jnp.float32)             # (H*BB, S, hd)
    o = o.reshape(nh, bb * s, hd)
    # concat heads back on the lane axis -> (BB*S, H*hd = D), single K=128 matmul
    o_flat = jnp.concatenate([o[i] for i in range(nh)], axis=-1).astype(dt)
    attn_out = jnp.dot(o_flat, p["pred_wo"],
                       preferred_element_type=jnp.float32).reshape(bb, s, d)

    x = x + attn_out
    h2 = _layer_norm(x).reshape(bb * s, d).astype(dt)
    ff = jnp.dot(jax.nn.relu(jnp.dot(h2, p["pred_f1"],
                                     preferred_element_type=jnp.float32)).astype(dt),
                 p["pred_f2"], preferred_element_type=jnp.float32)
    return x + ff.reshape(bb, s, d)


def _frame_core(x_t, slots_in, p, recip=_jnp_recip):
    """Slot-attention iterations for one frame (no prior / predictor).

    x_t: (BB, N, C); slots_in: (BB, S, D).  Returns slots_out (BB, S, D) f32.
    BB batch elements are folded into the matmul M dimension.
    # TODO(synk): at production token counts, pad N to a multiple of 128 for
    # lane-dense (S, N) attention tiles (review item 11).
    """
    bb, n, c = x_t.shape
    s, d = slots_in.shape[1], slots_in.shape[2]
    dt = p["wq"].dtype                                           # MXU input dtype

    xn = _layer_norm(x_t)                                        # norm_input
    kv = jnp.dot(xn.reshape(bb * n, c).astype(dt), p["wkv"],     # fused k|v projection
                 preferred_element_type=jnp.float32).reshape(bb, n, 2 * d)
    k = kv[:, :, :d].astype(dt)                                  # SCALE folded into wkv
    v = kv[:, :, d:].astype(dt)

    slots = slots_in
    for i in range(ITERS):
        slots_prev = slots
        q = jnp.dot(_layer_norm(slots).reshape(bb * s, d).astype(dt), p["wq"],
                    preferred_element_type=jnp.float32).reshape(bb, s, d)
        # (BB, S, N) layout: softmax over slots = axis -2; token-norm = lane reduction.
        dots = jnp.einsum("bsd,bnd->bsn", q.astype(dt), k,
                          preferred_element_type=jnp.float32)
        attn = _softmax(dots, axis=-2, recip=recip) + ATTN_EPS
        attn = attn * recip(jnp.sum(attn, axis=-1, keepdims=True))
        updates = jnp.einsum("bsn,bnd->bsd", attn.astype(dt), v,
                             preferred_element_type=jnp.float32)
        slots = _gru_cell_fused(updates.reshape(bb * s, d),
                                slots_prev.reshape(bb * s, d),
                                p["gru_w_a"], p["gru_w_hn"], dt).reshape(bb, s, d)
        if i < ITERS - 1:
            hm = _layer_norm(slots).reshape(bb * s, d).astype(dt)   # norm_pre_ff
            mlp = jnp.dot(
                jax.nn.relu(jnp.dot(hm, p["mlp_w1"],
                                    preferred_element_type=jnp.float32)).astype(dt),
                p["mlp_w2"], preferred_element_type=jnp.float32)
            slots = slots + mlp.reshape(bb, s, d)
    return slots


def _carry_update(slots_in, slots_out, t_is_pos, p, recip=_jnp_recip):
    """prior_class == 'mlp': at t > 0 the predictor input is prior(slots_init)."""
    bb, s, d = slots_out.shape
    dt = p["wq"].dtype
    si = slots_in.reshape(bb * s, d).astype(dt)
    prior_out = jnp.dot(
        jax.nn.relu(jnp.dot(si, p["prior_w1"],
                            preferred_element_type=jnp.float32)).astype(dt),
        p["prior_w2"], preferred_element_type=jnp.float32).reshape(bb, s, d)
    # prior always computed, selected with jnp.where (negligible: 2 small matmuls).
    return _predictor(jnp.where(t_is_pos, prior_out, slots_out), p, recip=recip)


# ---------------- Pallas kernel ----------------
def _slot_attention_kernel(x_ref, slots0_ref, *rest):
    n_w = len(W_NAMES)
    w_refs = rest[:n_w]
    slots_out_ref = rest[n_w]
    slots_init_out_ref = rest[n_w + 1]
    slots_c = rest[n_w + 2]                    # (BB, S, D) VMEM carry across time

    t = pl.program_id(1)
    recip = lambda v: pl.reciprocal(v, approx=True)   # divides -> EUP slot

    @pl.when(t == 0)
    def _():
        slots_c[...] = slots0_ref[...]         # restart the recurrence for this batch block

    p = {name: r[...] for name, r in zip(W_NAMES, w_refs)}
    slots_in = slots_c[...]
    slots_init_out_ref[...] = slots_in
    slots_out = _frame_core(x_ref[...], slots_in, p, recip=recip)
    slots_out_ref[...] = slots_out

    # The carry produced at the last frame is never read -> skip prior + predictor there.
    @pl.when(t + 1 < pl.num_programs(1))
    def _():
        slots_c[...] = _carry_update(slots_in, slots_out, t > 0, p, recip=recip)


@partial(jax.jit, static_argnames=("batch_block",))
def slot_attention_video(x, slots0, params, *, batch_block=None):
    b, t_, n, c = x.shape
    s, d = slots0.shape[1], slots0.shape[2]
    bb = b if batch_block is None else batch_block
    assert b % bb == 0
    weights = [params[name] for name in W_NAMES]

    def _wspec(arr):
        nd = arr.ndim
        # Constant index map -> no per-step re-DMA.  Left at default buffering: the
        # ~2 MB weight set is negligible next to VMEM on every generation at these
        # shapes; revisit (Buffered(1) / vmem_limit_bytes) at real DINO token counts.
        return pl.BlockSpec(arr.shape, lambda i, j, _nd=nd: (0,) * _nd)

    grid_spec = pltpu.PrefetchScalarGridSpec(
        num_scalar_prefetch=0,
        grid=(b // bb, t_),
        in_specs=[
            pl.BlockSpec((bb, None, n, c), lambda i, j: (i, j, 0, 0)),
            pl.BlockSpec((bb, s, d), lambda i, j: (i, 0, 0)),
        ] + [_wspec(w) for w in weights],
        out_specs=[
            pl.BlockSpec((bb, None, s, d), lambda i, j: (i, j, 0, 0)),
            pl.BlockSpec((bb, None, s, d), lambda i, j: (i, j, 0, 0)),
        ],
        scratch_shapes=[pltpu.VMEM((bb, s, d), jnp.float32)],
    )
    out_shape = (jax.ShapeDtypeStruct((b, t_, s, d), jnp.float32),
                 jax.ShapeDtypeStruct((b, t_, s, d), jnp.float32))
    fn = pl.pallas_call(
        _slot_attention_kernel,
        out_shape=out_shape,
        grid_spec=grid_spec,
        compiler_params=pltpu.CompilerParams(
            # Batch-block axis sharded across TensorCores (v7x); safe because the carry
            # scratch is re-initialized at t == 0 for every batch block.
            dimension_semantics=("parallel", "arbitrary")),
    )
    return fn(x, slots0, *weights)


# ---------------- pure-JAX reference (same math helpers, exact divides) ----------------
@jax.jit
def reference_forward(x, slots0, params):
    t_total = x.shape[1]
    slots = slots0
    outs, inits = [], []
    for t in range(t_total):
        inits.append(slots)
        slots_out = _frame_core(x[:, t], slots, params)
        outs.append(slots_out)
        slots = _carry_update(slots, slots_out, t > 0, params)
    return jnp.stack(outs, axis=1), jnp.stack(inits, axis=1)


# ---------------- deterministic synthetic weights + host-side fusions ----------------
def _xavier(key, shape):
    limit = sqrt(6.0 / (shape[0] + shape[1]))
    return jax.random.uniform(key, shape, jnp.float32, -limit, limit)


def make_params(key, compute_dtype=jnp.float32):
    d, c, h, hd = SLOT_DIM, CHANNELS_ENC, NUM_HEADS, HEAD_DIM
    ks = jax.random.split(key, 16)

    wk = _xavier(ks[0], (c, d))
    wv = _xavier(ks[1], (c, d))
    wq = _xavier(ks[2], (d, d))
    gru_w_ih = _xavier(ks[3], (d, 3 * d))
    gru_w_hh = _xavier(ks[4], (d, 3 * d))   # TODO(synk): torch uses orthogonal_ init here
    mlp_w1 = _xavier(ks[5], (d, 4 * d))
    mlp_w2 = _xavier(ks[6], (4 * d, d))
    prior_w1 = _xavier(ks[7], (d, d))
    prior_w2 = _xavier(ks[8], (d, d))
    pred_wq = _xavier(ks[9], (d, d))
    pred_wk = _xavier(ks[10], (d, d))
    pred_wv = _xavier(ks[11], (d, d))
    pred_wo = _xavier(ks[12], (d, d))
    pred_f1 = _xavier(ks[13], (d, 4 * d))
    pred_f2 = _xavier(ks[14], (4 * d, d))

    # fuse k|v projections and fold the attention scale into the k half
    wkv = jnp.concatenate([wk * SCALE, wv], axis=1)                       # (C, 2D)
    # fuse the GRU r/z gates (+ gi_n) into one matmul; gh_n kept separate
    gru_w_a = jnp.concatenate(
        [gru_w_ih,
         jnp.concatenate([gru_w_hh[:, :2 * d], jnp.zeros((d, d), jnp.float32)], axis=1)],
        axis=0)                                                           # (2D, 3D)
    gru_w_hn = gru_w_hh[:, 2 * d:]                                        # (D, D)

    # single lane-dense QKV weight (q pre-scaled by hd^-0.5); full output projection
    pred_wqkv = jnp.concatenate([pred_wq * (hd ** -0.5), pred_wk, pred_wv], axis=1)  # (D, 3D)

    params = dict(wkv=wkv, wq=wq, gru_w_a=gru_w_a, gru_w_hn=gru_w_hn,
                  mlp_w1=mlp_w1, mlp_w2=mlp_w2,
                  prior_w1=prior_w1, prior_w2=prior_w2,
                  pred_wqkv=pred_wqkv, pred_wo=pred_wo,
                  pred_f1=pred_f1, pred_f2=pred_f2)
    # optional bf16 MXU inputs (accumulation stays f32 in-kernel); prefer f32 on v5e
    return {k_: v_.astype(compute_dtype) for k_, v_ in params.items()}


if __name__ == "__main__":
    key = jax.random.PRNGKey(0)
    k_par, k_mu, k_sig, k_noise, k_x = jax.random.split(key, 5)

    lim = sqrt(6.0 / (1 + SLOT_DIM))
    slots_mu = jax.random.uniform(k_mu, (1, 1, SLOT_DIM), jnp.float32, -lim, lim)
    slots_log_sigma = jax.random.uniform(k_sig, (1, 1, SLOT_DIM), jnp.float32, -lim, lim)
    # slots = torch.normal(mu, sigma): sampled once in the wrapper (glue, not in-kernel)
    slots0 = (slots_mu + jnp.exp(slots_log_sigma)
              * jax.random.normal(k_noise, (B, NUM_SLOTS, SLOT_DIM), jnp.float32))
    x = jax.random.normal(k_x, (B, T, N, CHANNELS_ENC), jnp.float32)

    params_f32 = make_params(k_par, jnp.float32)
    params_bf16 = make_params(k_par, jnp.bfloat16)

    configs = [
        # bb=B: single-TC chips (v5e/v6e) -> fold all batch into the matmul M dim.
        ("fold-B f32 (v5e/v6e)", params_f32, B, 1e-2),
        # B//bb = 2: dual-TC v7x -> batch axis feeds both TensorCores.  For production
        # B, pick the largest bb with B//bb an even number >= 2 (target bb*S -> 256).
        ("parallel-B f32 (v7x)", params_f32, 1, 1e-2),
        ("fold-B bf16 (v6e/v7x)", params_bf16, B, 4e-2),
    ]
    for name, prm, bb, tol in configs:
        out, init = slot_attention_video(x, slots0, prm, batch_block=bb)
        jax.block_until_ready((out, init))
        assert out.shape == (B, T, NUM_SLOTS, SLOT_DIM)
        assert init.shape == (B, T, NUM_SLOTS, SLOT_DIM)
        ref_out, ref_init = reference_forward(x, slots0, prm)
        err = max(float(jnp.max(jnp.abs(out - ref_out))),
                  float(jnp.max(jnp.abs(init - ref_init))))
        assert err < tol, f"{name}: mismatch vs pure-JAX reference: {err}"

    print("KERNEL_OK")
</pallas_src>

<mosaic_0001>
module attributes {stable_mosaic.version = 11 : i64} {
  func.func @_slot_attention_kernel(%arg0: i32, %arg1: i32, %arg2: memref<2x1x16x64xf32, #tpu.memory_space<vmem>>, %arg3: memref<2x8x128xf32, #tpu.memory_space<vmem>>, %arg4: memref<64x256xf32, #tpu.memory_space<vmem>>, %arg5: memref<128x128xf32, #tpu.memory_space<vmem>>, %arg6: memref<256x384xf32, #tpu.memory_space<vmem>>, %arg7: memref<128x128xf32, #tpu.memory_space<vmem>>, %arg8: memref<128x512xf32, #tpu.memory_space<vmem>>, %arg9: memref<512x128xf32, #tpu.memory_space<vmem>>, %arg10: memref<128x128xf32, #tpu.memory_space<vmem>>, %arg11: memref<128x128xf32, #tpu.memory_space<vmem>>, %arg12: memref<128x384xf32, #tpu.memory_space<vmem>>, %arg13: memref<128x128xf32, #tpu.memory_space<vmem>>, %arg14: memref<128x512xf32, #tpu.memory_space<vmem>>, %arg15: memref<512x128xf32, #tpu.memory_space<vmem>>, %arg16: memref<2x1x8x128xf32, #tpu.memory_space<vmem>>, %arg17: memref<2x1x8x128xf32, #tpu.memory_space<vmem>>, %arg18: memref<2x8x128xf32, #tpu.memory_space<vmem>>) attributes {dimension_semantics = [#tpu.dimension_semantics<parallel>, #tpu.dimension_semantics<arbitrary>], iteration_bounds = array<i64: 1, 3>, scalar_prefetch = 0 : i64, scratch_operands = 1 : i64, tpu.core_type = #tpu.core_type<tc>, window_params = [{transform_indices = @transform_0, window_bounds = array<i64: 2, 1, 16, 64>}, {transform_indices = @transform_1, window_bounds = array<i64: 2, 8, 128>}, {pipeline_mode = #tpu.pipeline_mode<synchronous>, transform_indices = @transform_2, window_bounds = array<i64: 64, 256>}, {pipeline_mode = #tpu.pipeline_mode<synchronous>, transform_indices = @transform_3, window_bounds = array<i64: 128, 128>}, {pipeline_mode = #tpu.pipeline_mode<synchronous>, transform_indices = @transform_4, window_bounds = array<i64: 256, 384>}, {pipeline_mode = #tpu.pipeline_mode<synchronous>, transform_indices = @transform_5, window_bounds = array<i64: 128, 128>}, {pipeline_mode = #tpu.pipeline_mode<synchronous>, transform_indices = @transform_6, window_bounds = array<i64: 128, 512>}, {pipeline_mode = #tpu.pipeline_mode<synchronous>, transform_indices = @transform_7, window_bounds = array<i64: 512, 128>}, {pipeline_mode = #tpu.pipeline_mode<synchronous>, transform_indices = @transform_8, window_bounds = array<i64: 128, 128>}, {pipeline_mode = #tpu.pipeline_mode<synchronous>, transform_indices = @transform_9, window_bounds = array<i64: 128, 128>}, {pipeline_mode = #tpu.pipeline_mode<synchronous>, transform_indices = @transform_10, window_bounds = array<i64: 128, 384>}, {pipeline_mode = #tpu.pipeline_mode<synchronous>, transform_indices = @transform_11, window_bounds = array<i64: 128, 128>}, {pipeline_mode = #tpu.pipeline_mode<synchronous>, transform_indices = @transform_12, window_bounds = array<i64: 128, 512>}, {pipeline_mode = #tpu.pipeline_mode<synchronous>, transform_indices = @transform_13, window_bounds = array<i64: 512, 128>}, {transform_indices = @transform_14, window_bounds = array<i64: 2, 1, 8, 128>}, {transform_indices = @transform_15, window_bounds = array<i64: 2, 1, 8, 128>}]} {
    %c0_i32 = arith.constant 0 : i32
    %0 = arith.cmpi eq, %arg1, %c0_i32 : i32
    %1 = arith.extui %0 : i1 to i32
    %c0_i32_0 = arith.constant 0 : i32
    %2 = arith.cmpi ne, %1, %c0_i32_0 : i32
    scf.if %2 {
      %c0_87 = arith.constant 0 : index
      %c0_88 = arith.constant 0 : index
      %c0_89 = arith.constant 0 : index
      %210 = vector.load %arg3[%c0_87, %c0_88, %c0_89] : memref<2x8x128xf32, #tpu.memory_space<vmem>>, vector<2x8x128xf32>
      %c0_90 = arith.constant 0 : index
      %c0_91 = arith.constant 0 : index
      %c0_92 = arith.constant 0 : index
      %211 = vector.load %arg18[%c0_90, %c0_91, %c0_92] : memref<2x8x128xf32, #tpu.memory_space<vmem>>, vector<2x8x128xf32>
      tpu.vector_store %arg18[%c0_90, %c0_91, %c0_92], %210 {strides = array<i32>} : memref<2x8x128xf32, #tpu.memory_space<vmem>>, vector<2x8x128xf32>,
    } else {
    }
    %c0 = arith.constant 0 : index
    %c0_1 = arith.constant 0 : index
    %3 = vector.load %arg4[%c0, %c0_1] : memref<64x256xf32, #tpu.memory_space<vmem>>, vector<64x256xf32>
    %c0_2 = arith.constant 0 : index
    %c0_3 = arith.constant 0 : index
    %4 = vector.load %arg5[%c0_2, %c0_3] : memref<128x128xf32, #tpu.memory_space<vmem>>, vector<128x128xf32>
    %c0_4 = arith.constant 0 : index
    %c0_5 = arith.constant 0 : index
    %5 = vector.load %arg6[%c0_4, %c0_5] : memref<256x384xf32, #tpu.memory_space<vmem>>, vector<256x384xf32>
    %c0_6 = arith.constant 0 : index
    %c0_7 = arith.constant 0 : index
    %6 = vector.load %arg7[%c0_6, %c0_7] : memref<128x128xf32, #tpu.memory_space<vmem>>, vector<128x128xf32>
    %c0_8 = arith.constant 0 : index
    %c0_9 = arith.constant 0 : index
    %7 = vector.load %arg8[%c0_8, %c0_9] : memref<128x512xf32, #tpu.memory_space<vmem>>, vector<128x512xf32>
    %c0_10 = arith.constant 0 : index
    %c0_11 = arith.constant 0 : index
    %8 = vector.load %arg9[%c0_10, %c0_11] : memref<512x128xf32, #tpu.memory_space<vmem>>, vector<512x128xf32>
    %c0_12 = arith.constant 0 : index
    %c0_13 = arith.constant 0 : index
    %9 = vector.load %arg10[%c0_12, %c0_13] : memref<128x128xf32, #tpu.memory_space<vmem>>, vector<128x128xf32>
    %c0_14 = arith.constant 0 : index
    %c0_15 = arith.constant 0 : index
    %10 = vector.load %arg11[%c0_14, %c0_15] : memref<128x128xf32, #tpu.memory_space<vmem>>, vector<128x128xf32>
    %c0_16 = arith.constant 0 : index
    %c0_17 = arith.constant 0 : index
    %11 = vector.load %arg12[%c0_16, %c0_17] : memref<128x384xf32, #tpu.memory_space<vmem>>, vector<128x384xf32>
    %c0_18 = arith.constant 0 : index
    %c0_19 = arith.constant 0 : index
    %12 = vector.load %arg13[%c0_18, %c0_19] : memref<128x128xf32, #tpu.memory_space<vmem>>, vector<128x128xf32>
    %c0_20 = arith.constant 0 : index
    %c0_21 = arith.constant 0 : index
    %13 = vector.load %arg14[%c0_20, %c0_21] : memref<128x512xf32, #tpu.memory_space<vmem>>, vector<128x512xf32>
    %c0_22 = arith.constant 0 : index
    %c0_23 = arith.constant 0 : index
    %14 = vector.load %arg15[%c0_22, %c0_23] : memref<512x128xf32, #tpu.memory_space<vmem>>, vector<512x128xf32>
    %c0_24 = arith.constant 0 : index
    %c0_25 = arith.constant 0 : index
    %c0_26 = arith.constant 0 : index
    %15 = vector.load %arg18[%c0_24, %c0_25, %c0_26] : memref<2x8x128xf32, #tpu.memory_space<vmem>>, vector<2x8x128xf32>
    %c0_27 = arith.constant 0 : index
    %c0_28 = arith.constant 0 : index
    %c0_29 = arith.constant 0 : index
    %c0_30 = arith.constant 0 : index
    %16 = vector.load %arg17[%c0_27, %c0_28, %c0_29, %c0_30] : memref<2x1x8x128xf32, #tpu.memory_space<vmem>>, vector<2x1x8x128xf32>
    %17 = vector.shape_cast %16 : vector<2x1x8x128xf32> to vector<2x8x128xf32>
    %18 = vector.shape_cast %15 : vector<2x8x128xf32> to vector<2x1x8x128xf32>
    tpu.vector_store %arg17[%c0_27, %c0_28, %c0_29, %c0_30], %18 {strides = array<i32>} : memref<2x1x8x128xf32, #tpu.memory_space<vmem>>, vector<2x1x8x128xf32>,
    %c0_31 = arith.constant 0 : index
    %c0_32 = arith.constant 0 : index
    %c0_33 = arith.constant 0 : index
    %c0_34 = arith.constant 0 : index
    %19 = vector.load %arg2[%c0_31, %c0_32, %c0_33, %c0_34] : memref<2x1x16x64xf32, #tpu.memory_space<vmem>>, vector<2x1x16x64xf32>
    %20 = vector.shape_cast %19 : vector<2x1x16x64xf32> to vector<2x16x64xf32>
    %cst = arith.constant dense<0.000000e+00> : vector<2x16xf32>
    %21 = vector.multi_reduction <add>, %20, %cst [2] : vector<2x16x64xf32> to vector<2x16xf32>
    %22 = vector.shape_cast %21 : vector<2x16xf32> to vector<2x16x1xf32>
    %cst_35 = arith.constant 6.400000e+01 : f32
    %23 = vector.broadcast %cst_35 : f32 to vector<2x16x1xf32>
    %24 = arith.divf %22, %23 : vector<2x16x1xf32>
    %25 = vector.broadcast %24 : vector<2x16x1xf32> to vector<2x16x64xf32>
    %26 = arith.subf %20, %25 : vector<2x16x64xf32>
    %27 = arith.mulf %26, %26 : vector<2x16x64xf32>
    %cst_36 = arith.constant dense<0.000000e+00> : vector<2x16xf32>
    %28 = vector.multi_reduction <add>, %27, %cst_36 [2] : vector<2x16x64xf32> to vector<2x16xf32>
    %29 = vector.shape_cast %28 : vector<2x16xf32> to vector<2x16x1xf32>
    %cst_37 = arith.constant 6.400000e+01 : f32
    %30 = vector.broadcast %cst_37 : f32 to vector<2x16x1xf32>
    %31 = arith.divf %29, %30 : vector<2x16x1xf32>
    %32 = vector.broadcast %24 : vector<2x16x1xf32> to vector<2x16x64xf32>
    %33 = arith.subf %20, %32 : vector<2x16x64xf32>
    %cst_38 = arith.constant 9.99999974E-6 : f32
    %34 = vector.broadcast %cst_38 : f32 to vector<2x16x1xf32>
    %35 = arith.addf %31, %34 : vector<2x16x1xf32>
    %36 = math.rsqrt %35 : vector<2x16x1xf32>
    %37 = vector.broadcast %36 : vector<2x16x1xf32> to vector<2x16x64xf32>
    %38 = arith.mulf %33, %37 : vector<2x16x64xf32>
    %39 = vector.shape_cast %38 : vector<2x16x64xf32> to vector<32x64xf32>
    %cst_39 = arith.constant dense<0.000000e+00> : vector<32x256xf32>
    %40 = tpu.matmul %39, %3, %cst_39 {dimension_numbers = #tpu.dot_dimension_numbers<[1], [0], [0], [1], [0, 0, 1, 1], [], []>} : vector<32x64xf32>, vector<64x256xf32>, vector<32x256xf32> -> vector<32x256xf32>
    %41 = vector.shape_cast %40 : vector<32x256xf32> to vector<2x16x256xf32>
    %42 = vector.extract_strided_slice %41 {offsets = [0, 0, 0], sizes = [2, 16, 128], strides = [1, 1, 1]} : vector<2x16x256xf32> to vector<2x16x128xf32>
    %43 = vector.extract_strided_slice %41 {offsets = [0, 0, 128], sizes = [2, 16, 128], strides = [1, 1, 1]} : vector<2x16x256xf32> to vector<2x16x128xf32>
    %cst_40 = arith.constant dense<0.000000e+00> : vector<2x8xf32>
    %44 = vector.multi_reduction <add>, %15, %cst_40 [2] : vector<2x8x128xf32> to vector<2x8xf32>
    %45 = vector.shape_cast %44 : vector<2x8xf32> to vector<2x8x1xf32>
    %cst_41 = arith.constant 1.280000e+02 : f32
    %46 = vector.broadcast %cst_41 : f32 to vector<2x8x1xf32>
    %47 = arith.divf %45, %46 : vector<2x8x1xf32>
    %48 = vector.broadcast %47 : vector<2x8x1xf32> to vector<2x8x128xf32>
    %49 = arith.subf %15, %48 : vector<2x8x128xf32>
    %50 = arith.mulf %49, %49 : vector<2x8x128xf32>
    %cst_42 = arith.constant dense<0.000000e+00> : vector<2x8xf32>
    %51 = vector.multi_reduction <add>, %50, %cst_42 [2] : vector<2x8x128xf32> to vector<2x8xf32>
    %52 = vector.shape_cast %51 : vector<2x8xf32> to vector<2x8x1xf32>
    %cst_43 = arith.constant 1.280000e+02 : f32
    %53 = vector.broadcast %cst_43 : f32 to vector<2x8x1xf32>
    %54 = arith.divf %52, %53 : vector<2x8x1xf32>
    %55 = vector.broadcast %47 : vector<2x8x1xf32> to vector<2x8x128xf32>
    %56 = arith.subf %15, %55 : vector<2x8x128xf32>
    %cst_44 = arith.constant 9.99999974E-6 : f32
    %57 = vector.broadcast %cst_44 : f32 to vector<2x8x1xf32>
    %58 = arith.addf %54, %57 : vector<2x8x1xf32>
    %59 = math.rsqrt %58 : vector<2x8x1xf32>
    %60 = vector.broadcast %59 : vector<2x8x1xf32> to vector<2x8x128xf32>
    %61 = arith.mulf %56, %60 : vector<2x8x128xf32>
    %62 = vector.shape_cast %61 : vector<2x8x128xf32> to vector<16x128xf32>
    %cst_45 = arith.constant dense<0.000000e+00> : vector<16x128xf32>
    %63 = tpu.matmul %62, %4, %cst_45 {dimension_numbers = #tpu.dot_dimension_numbers<[1], [0], [0], [1], [0, 0, 1, 1], [], []>} : vector<16x128xf32>, vector<128x128xf32>, vector<16x128xf32> -> vector<16x128xf32>
    %64 = vector.shape_cast %63 : vector<16x128xf32> to vector<2x8x128xf32>
    "tpu.trace_start"() <{level = 10 : i32, message = "bsd,bnd->bsn"}> : () -> ()
    %cst_46 = arith.constant dense<0.000000e+00> : vector<2x8x16xf32>
    %65 = tpu.matmul %64, %42, %cst_46 {dimension_numbers = #tpu.dot_dimension_numbers<[2], [2], [1], [1], [0, 0, 0, 1, 1, 1], [0], [0]>} : vector<2x8x128xf32>, vector<2x16x128xf32>, vector<2x8x16xf32> -> vector<2x8x16xf32>
    "tpu.trace_stop"() : () -> ()
    %cst_47 = arith.constant dense<0xFF800000> : vector<2x16xf32>
    %66 = vector.multi_reduction <maximumf>, %65, %cst_47 [1] : vector<2x8x16xf32> to vector<2x16xf32>
    %67 = vector.shape_cast %66 : vector<2x16xf32> to vector<2x1x16xf32>
    %68 = vector.broadcast %67 : vector<2x1x16xf32> to vector<2x8x16xf32>
    %69 = arith.subf %65, %68 : vector<2x8x16xf32>
    %70 = math.exp %69 : vector<2x8x16xf32>
    %cst_48 = arith.constant dense<0.000000e+00> : vector<2x16xf32>
    %71 = vector.multi_reduction <add>, %70, %cst_48 [1] : vector<2x8x16xf32> to vector<2x16xf32>
    %72 = vector.shape_cast %71 : vector<2x16xf32> to vector<2x1x16xf32>
    %73 = tpu.reciprocal %72 {approx = true} : vector<2x1x16xf32> -> vector<2x1x16xf32>
    %74 = vector.broadcast %73 : vector<2x1x16xf32> to vector<2x8x16xf32>
    %75 = arith.mulf %70, %74 : vector<2x8x16xf32>
    %cst_49 = arith.constant 9.99999993E-9 : f32
    %76 = vector.broadcast %cst_49 : f32 to vector<2x8x16xf32>
    %77 = arith.addf %75, %76 : vector<2x8x16xf32>
    %cst_50 = arith.constant dense<0.000000e+00> : vector<2x8xf32>
    %78 = vector.multi_reduction <add>, %77, %cst_50 [2] : vector<2x8x16xf32> to vector<2x8xf32>
    %79 = vector.shape_cast %78 : vector<2x8xf32> to vector<2x8x1xf32>
    %80 = tpu.reciprocal %79 {approx = true} : vector<2x8x1xf32> -> vector<2x8x1xf32>
    %81 = vector.broadcast %80 : vector<2x8x1xf32> to vector<2x8x16xf32>
    %82 = arith.mulf %77, %81 : vector<2x8x16xf32>
    "tpu.trace_start"() <{level = 10 : i32, message = "bsn,bnd->bsd"}> : () -> ()
    %cst_51 = arith.constant dense<0.000000e+00> : vector<2x8x128xf32>
    %83 = tpu.matmul %82, %43, %cst_51 {dimension_numbers = #tpu.dot_dimension_numbers<[2], [1], [1], [2], [0, 0, 0, 1, 1, 2], [0], [0]>} : vector<2x8x16xf32>, vector<2x16x128xf32>, vector<2x8x128xf32> -> vector<2x8x128xf32>
    "tpu.trace_stop"() : () -> ()
    %84 = vector.shape_cast %83 : vector<2x8x128xf32> to vector<16x128xf32>
    %85 = vector.shape_cast %15 : vector<2x8x128xf32> to vector<16x128xf32>
    %86 = tpu.concatenate %84, %85 in 1 : vector<16x128xf32>, vector<16x128xf32> -> vector<16x256xf32>
    %cst_52 = arith.constant dense<0.000000e+00> : vector<16x384xf32>
    %87 = tpu.matmul %86, %5, %cst_52 {dimension_numbers = #tpu.dot_dimension_numbers<[1], [0], [0], [1], [0, 0, 1, 1], [], []>} : vector<16x256xf32>, vector<256x384xf32>, vector<16x384xf32> -> vector<16x384xf32>
    %cst_53 = arith.constant dense<0.000000e+00> : vector<16x128xf32>
    %88 = tpu.matmul %85, %6, %cst_53 {dimension_numbers = #tpu.dot_dimension_numbers<[1], [0], [0], [1], [0, 0, 1, 1], [], []>} : vector<16x128xf32>, vector<128x128xf32>, vector<16x128xf32> -> vector<16x128xf32>
    %89 = vector.extract_strided_slice %87 {offsets = [0, 0], sizes = [16, 128], strides = [1, 1]} : vector<16x384xf32> to vector<16x128xf32>
    %90 = arith.negf %89 : vector<16x128xf32>
    %91 = math.exp %90 : vector<16x128xf32>
    %cst_54 = arith.constant 1.000000e+00 : f32
    %92 = vector.broadcast %cst_54 : f32 to vector<16x128xf32>
    %93 = arith.addf %92, %91 : vector<16x128xf32>
    %94 = arith.divf %92, %93 : vector<16x128xf32>
    %95 = vector.extract_strided_slice %87 {offsets = [0, 128], sizes = [16, 128], strides = [1, 1]} : vector<16x384xf32> to vector<16x128xf32>
    %96 = arith.negf %95 : vector<16x128xf32>
    %97 = math.exp %96 : vector<16x128xf32>
    %cst_55 = arith.constant 1.000000e+00 : f32
    %98 = vector.broadcast %cst_55 : f32 to vector<16x128xf32>
    %99 = arith.addf %98, %97 : vector<16x128xf32>
    %100 = arith.divf %98, %99 : vector<16x128xf32>
    %101 = vector.extract_strided_slice %87 {offsets = [0, 256], sizes = [16, 128], strides = [1, 1]} : vector<16x384xf32> to vector<16x128xf32>
    %102 = arith.mulf %94, %88 : vector<16x128xf32>
    %103 = arith.addf %101, %102 : vector<16x128xf32>
    %104 = math.tanh %103 : vector<16x128xf32>
    %cst_56 = arith.constant 1.000000e+00 : f32
    %105 = vector.broadcast %cst_56 : f32 to vector<16x128xf32>
    %106 = arith.subf %105, %100 : vector<16x128xf32>
    %107 = arith.mulf %106, %104 : vector<16x128xf32>
    %108 = arith.mulf %100, %85 : vector<16x128xf32>
    %109 = arith.addf %107, %108 : vector<16x128xf32>
    %110 = vector.shape_cast %109 : vector<16x128xf32> to vector<2x8x128xf32>
    %cst_57 = arith.constant dense<0.000000e+00> : vector<2x8xf32>
    %111 = vector.multi_reduction <add>, %110, %cst_57 [2] : vector<2x8x128xf32> to vector<2x8xf32>
    %112 = vector.shape_cast %111 : vector<2x8xf32> to vector<2x8x1xf32>
    %cst_58 = arith.constant 1.280000e+02 : f32
    %113 = vector.broadcast %cst_58 : f32 to vector<2x8x1xf32>
    %114 = arith.divf %112, %113 : vector<2x8x1xf32>
    %115 = vector.broadcast %114 : vector<2x8x1xf32> to vector<2x8x128xf32>
    %116 = arith.subf %110, %115 : vector<2x8x128xf32>
    %117 = arith.mulf %116, %116 : vector<2x8x128xf32>
    %cst_59 = arith.constant dense<0.000000e+00> : vector<2x8xf32>
    %118 = vector.multi_reduction <add>, %117, %cst_59 [2] : vector<2x8x128xf32> to vector<2x8xf32>
    %119 = vector.shape_cast %118 : vector<2x8xf32> to vector<2x8x1xf32>
    %cst_60 = arith.constant 1.280000e+02 : f32
    %120 = vector.broadcast %cst_60 : f32 to vector<2x8x1xf32>
    %121 = arith.divf %119, %120 : vector<2x8x1xf32>
    %122 = vector.broadcast %114 : vector<2x8x1xf32> to vector<2x8x128xf32>
    %123 = arith.subf %110, %122 : vector<2x8x128xf32>
    %cst_61 = arith.constant 9.99999974E-6 : f32
    %124 = vector.broadcast %cst_61 : f32 to vector<2x8x1xf32>
    %125 = arith.addf %121, %124 : vector<2x8x1xf32>
    %126 = math.rsqrt %125 : vector<2x8x1xf32>
    %127 = vector.broadcast %126 : vector<2x8x1xf32> to vector<2x8x128xf32>
    %128 = arith.mulf %123, %127 : vector<2x8x128xf32>
    %129 = vector.shape_cast %128 : vector<2x8x128xf32> to vector<16x128xf32>
    %cst_62 = arith.constant dense<0.000000e+00> : vector<16x512xf32>
    %130 = tpu.matmul %129, %7, %cst_62 {dimension_numbers = #tpu.dot_dimension_numbers<[1], [0], [0], [1], [0, 0, 1, 1], [], []>} : vector<16x128xf32>, vector<128x512xf32>, vector<16x512xf32> -> vector<16x512xf32>
    %cst_63 = arith.constant 0.000000e+00 : f32
    %131 = vector.broadcast %cst_63 : f32 to vector<16x512xf32>
    %132 = arith.maximumf %130, %131 : vector<16x512xf32>
    %cst_64 = arith.constant dense<0.000000e+00> : vector<16x128xf32>
    %133 = tpu.matmul %132, %8, %cst_64 {dimension_numbers = #tpu.dot_dimension_numbers<[1], [0], [0], [1], [0, 0, 1, 1], [], []>} : vector<16x512xf32>, vector<512x128xf32>, vector<16x128xf32> -> vector<16x128xf32>
    %134 = vector.shape_cast %133 : vector<16x128xf32> to vector<2x8x128xf32>
    %135 = arith.addf %110, %134 : vector<2x8x128xf32>
    %cst_65 = arith.constant dense<0.000000e+00> : vector<2x8xf32>
    %136 = vector.multi_reduction <add>, %135, %cst_65 [2] : vector<2x8x128xf32> to vector<2x8xf32>
    %137 = vector.shape_cast %136 : vector<2x8xf32> to vector<2x8x1xf32>
    %cst_66 = arith.constant 1.280000e+02 : f32
    %138 = vector.broadcast %cst_66 : f32 to vector<2x8x1xf32>
    %139 = arith.divf %137, %138 : vector<2x8x1xf32>
    %140 = vector.broadcast %139 : vector<2x8x1xf32> to vector<2x8x128xf32>
    %141 = arith.subf %135, %140 : vector<2x8x128xf32>
    %142 = arith.mulf %141, %141 : vector<2x8x128xf32>
    %cst_67 = arith.constant dense<0.000000e+00> : vector<2x8xf32>
    %143 = vector.multi_reduction <add>, %142, %cst_67 [2] : vector<2x8x128xf32> to vector<2x8xf32>
    %144 = vector.shape_cast %143 : vector<2x8xf32> to vector<2x8x1xf32>
    %cst_68 = arith.constant 1.280000e+02 : f32
    %145 = vector.broadcast %cst_68 : f32 to vector<2x8x1xf32>
    %146 = arith.divf %144, %145 : vector<2x8x1xf32>
    %147 = vector.broadcast %139 : vector<2x8x1xf32> to vector<2x8x128xf32>
    %148 = arith.subf %135, %147 : vector<2x8x128xf32>
    %cst_69 = arith.constant 9.99999974E-6 : f32
    %149 = vector.broadcast %cst_69 : f32 to vector<2x8x1xf32>
    %150 = arith.addf %146, %149 : vector<2x8x1xf32>
    %151 = math.rsqrt %150 : vector<2x8x1xf32>
    %152 = vector.broadcast %151 : vector<2x8x1xf32> to vector<2x8x128xf32>
    %153 = arith.mulf %148, %152 : vector<2x8x128xf32>
    %154 = vector.shape_cast %153 : vector<2x8x128xf32> to vector<16x128xf32>
    %cst_70 = arith.constant dense<0.000000e+00> : vector<16x128xf32>
    %155 = tpu.matmul %154, %4, %cst_70 {dimension_numbers = #tpu.dot_dimension_numbers<[1], [0], [0], [1], [0, 0, 1, 1], [], []>} : vector<16x128xf32>, vector<128x128xf32>, vector<16x128xf32> -> vector<16x128xf32>
    %156 = vector.shape_cast %155 : vector<16x128xf32> to vector<2x8x128xf32>
    "tpu.trace_start"() <{level = 10 : i32, message = "bsd,bnd->bsn"}> : () -> ()
    %cst_71 = arith.constant dense<0.000000e+00> : vector<2x8x16xf32>
    %157 = tpu.matmul %156, %42, %cst_71 {dimension_numbers = #tpu.dot_dimension_numbers<[2], [2], [1], [1], [0, 0, 0, 1, 1, 1], [0], [0]>} : vector<2x8x128xf32>, vector<2x16x128xf32>, vector<2x8x16xf32> -> vector<2x8x16xf32>
    "tpu.trace_stop"() : () -> ()
    %cst_72 = arith.constant dense<0xFF800000> : vector<2x16xf32>
    %158 = vector.multi_reduction <maximumf>, %157, %cst_72 [1] : vector<2x8x16xf32> to vector<2x16xf32>
    %159 = vector.shape_cast %158 : vector<2x16xf32> to vector<2x1x16xf32>
    %160 = vector.broadcast %159 : vector<2x1x16xf32> to vector<2x8x16xf32>
    %161 = arith.subf %157, %160 : vector<2x8x16xf32>
    %162 = math.exp %161 : vector<2x8x16xf32>
    %cst_73 = arith.constant dense<0.000000e+00> : vector<2x16xf32>
    %163 = vector.multi_reduction <add>, %162, %cst_73 [1] : vector<2x8x16xf32> to vector<2x16xf32>
    %164 = vector.shape_cast %163 : vector<2x16xf32> to vector<2x1x16xf32>
    %165 = tpu.reciprocal %164 {approx = true} : vector<2x1x16xf32> -> vector<2x1x16xf32>
    %166 = vector.broadcast %165 : vector<2x1x16xf32> to vector<2x8x16xf32>
    %167 = arith.mulf %162, %166 : vector<2x8x16xf32>
    %cst_74 = arith.constant 9.99999993E-9 : f32
    %168 = vector.broadcast %cst_74 : f32 to vector<2x8x16xf32>
    %169 = arith.addf %167, %168 : vector<2x8x16xf32>
    %cst_75 = arith.constant dense<0.000000e+00> : vector<2x8xf32>
    %170 = vector.multi_reduction <add>, %169, %cst_75 [2] : vector<2x8x16xf32> to vector<2x8xf32>
    %171 = vector.shape_cast %170 : vector<2x8xf32> to vector<2x8x1xf32>
    %172 = tpu.reciprocal %171 {approx = true} : vector<2x8x1xf32> -> vector<2x8x1xf32>
    %173 = vector.broadcast %172 : vector<2x8x1xf32> to vector<2x8x16xf32>
    %174 = arith.mulf %169, %173 : vector<2x8x16xf32>
    "tpu.trace_start"() <{level = 10 : i32, message = "bsn,bnd->bsd"}> : () -> ()
    %cst_76 = arith.constant dense<0.000000e+00> : vector<2x8x128xf32>
    %175 = tpu.matmul %174, %43, %cst_76 {dimension_numbers = #tpu.dot_dimension_numbers<[2], [1], [1], [2], [0, 0, 0, 1, 1, 2], [0], [0]>} : vector<2x8x16xf32>, vector<2x16x128xf32>, vector<2x8x128xf32> -> vector<2x8x128xf32>
    "tpu.trace_stop"() : () -> ()
    %176 = vector.shape_cast %175 : vector<2x8x128xf32> to vector<16x128xf32>
    %177 = vector.shape_cast %135 : vector<2x8x128xf32> to vector<16x128xf32>
    %178 = tpu.concatenate %176, %177 in 1 : vector<16x128xf32>, vector<16x128xf32> -> vector<16x256xf32>
    %cst_77 = arith.constant dense<0.000000e+00> : vector<16x384xf32>
    %179 = tpu.matmul %178, %5, %cst_77 {dimension_numbers = #tpu.dot_dimension_numbers<[1], [0], [0], [1], [0, 0, 1, 1], [], []>} : vector<16x256xf32>, vector<256x384xf32>, vector<16x384xf32> -> vector<16x384xf32>
    %cst_78 = arith.constant dense<0.000000e+00> : vector<16x128xf32>
    %180 = tpu.matmul %177, %6, %cst_78 {dimension_numbers = #tpu.dot_dimension_numbers<[1], [0], [0], [1], [0, 0, 1, 1], [], []>} : vector<16x128xf32>, vector<128x128xf32>, vector<16x128xf32> -> vector<16x128xf32>
    %181 = vector.extract_strided_slice %179 {offsets = [0, 0], sizes = [16, 128], strides = [1, 1]} : vector<16x384xf32> to vector<16x128xf32>
    %182 = arith.negf %181 : vector<16x128xf32>
    %183 = math.exp %182 : vector<16x128xf32>
    %cst_79 = arith.constant 1.000000e+00 : f32
    %184 = vector.broadcast %cst_79 : f32 to vector<16x128xf32>
    %185 = arith.addf %184, %183 : vector<16x128xf32>
    %186 = arith.divf %184, %185 : vector<16x128xf32>
    %187 = vector.extract_strided_slice %179 {offsets = [0, 128], sizes = [16, 128], strides = [1, 1]} : vector<16x384xf32> to vector<16x128xf32>
    %188 = arith.negf %187 : vector<16x128xf32>
    %189 = math.exp %188 : vector<16x128xf32>
    %cst_80 = arith.constant 1.000000e+00 : f32
    %190 = vector.broadcast %cst_80 : f32 to vector<16x128xf32>
    %191 = arith.addf %190, %189 : vector<16x128xf32>
    %192 = arith.divf %190, %191 : vector<16x128xf32>
    %193 = vector.extract_strided_slice %179 {offsets = [0, 256], sizes = [16, 128], strides = [1, 1]} : vector<16x384xf32> to vector<16x128xf32>
    %194 = arith.mulf %186, %180 : vector<16x128xf32>
    %195 = arith.addf %193, %194 : vector<16x128xf32>
    %196 = math.tanh %195 : vector<16x128xf32>
    %cst_81 = arith.constant 1.000000e+00 : f32
    %197 = vector.broadcast %cst_81 : f32 to vector<16x128xf32>
    %198 = arith.subf %197, %192 : vector<16x128xf32>
    %199 = arith.mulf %198, %196 : vector<16x128xf32>
    %200 = arith.mulf %192, %177 : vector<16x128xf32>
    %201 = arith.addf %199, %200 : vector<16x128xf32>
    %202 = vector.shape_cast %201 : vector<16x128xf32> to vector<2x8x128xf32>
    %c0_82 = arith.constant 0 : index
    %c0_83 = arith.constant 0 : index
    %c0_84 = arith.constant 0 : index
    %c0_85 = arith.constant 0 : index
    %203 = vector.load %arg16[%c0_82, %c0_83, %c0_84, %c0_85] : memref<2x1x8x128xf32, #tpu.memory_space<vmem>>, vector<2x1x8x128xf32>
    %204 = vector.shape_cast %203 : vector<2x1x8x128xf32> to vector<2x8x128xf32>
    %205 = vector.shape_cast %202 : vector<2x8x128xf32> to vector<2x1x8x128xf32>
    tpu.vector_store %arg16[%c0_82, %c0_83, %c0_84, %c0_85], %205 {strides = array<i32>} : memref<2x1x8x128xf32, #tpu.memory_space<vmem>>, vector<2x1x8x128xf32>,
    %c1_i32 = arith.constant 1 : i32
    %206 = arith.addi %arg1, %c1_i32 : i32
    %c3_i32 = arith.constant 3 : i32
    %207 = arith.cmpi slt, %206, %c3_i32 : i32
    %208 = arith.extui %207 : i1 to i32
    %c0_i32_86 = arith.constant 0 : i32
    %209 = arith.cmpi ne, %208, %c0_i32_86 : i32
    scf.if %209 {
      %c0_i32_87 = arith.constant 0 : i32
      %210 = arith.cmpi sgt, %arg1, %c0_i32_87 : i32
      %211 = vector.shape_cast %15 : vector<2x8x128xf32> to vector<16x128xf32>
      %cst_88 = arith.constant dense<0.000000e+00> : vector<16x128xf32>
      %212 = tpu.matmul %211, %9, %cst_88 {dimension_numbers = #tpu.dot_dimension_numbers<[1], [0], [0], [1], [0, 0, 1, 1], [], []>} : vector<16x128xf32>, vector<128x128xf32>, vector<16x128xf32> -> vector<16x128xf32>
      %cst_89 = arith.constant 0.000000e+00 : f32
      %213 = vector.broadcast %cst_89 : f32 to vector<16x128xf32>
      %214 = arith.maximumf %212, %213 : vector<16x128xf32>
      %cst_90 = arith.constant dense<0.000000e+00> : vector<16x128xf32>
      %215 = tpu.matmul %214, %10, %cst_90 {dimension_numbers = #tpu.dot_dimension_numbers<[1], [0], [0], [1], [0, 0, 1, 1], [], []>} : vector<16x128xf32>, vector<128x128xf32>, vector<16x128xf32> -> vector<16x128xf32>
      %216 = vector.shape_cast %215 : vector<16x128xf32> to vector<2x8x128xf32>
      %217 = arith.select %210, %216, %202 : vector<2x8x128xf32>
      %cst_91 = arith.constant dense<0.000000e+00> : vector<2x8xf32>
      %218 = vector.multi_reduction <add>, %217, %cst_91 [2] : vector<2x8x128xf32> to vector<2x8xf32>
      %219 = vector.shape_cast %218 : vector<2x8xf32> to vector<2x8x1xf32>
      %cst_92 = arith.constant 1.280000e+02 : f32
      %220 = vector.broadcast %cst_92 : f32 to vector<2x8x1xf32>
      %221 = arith.divf %219, %220 : vector<2x8x1xf32>
      %222 = vector.broadcast %221 : vector<2x8x1xf32> to vector<2x8x128xf32>
      %223 = arith.subf %217, %222 : vector<2x8x128xf32>
      %224 = arith.mulf %223, %223 : vector<2x8x128xf32>
      %cst_93 = arith.constant dense<0.000000e+00> : vector<2x8xf32>
      %225 = vector.multi_reduction <add>, %224, %cst_93 [2] : vector<2x8x128xf32> to vector<2x8xf32>
      %226 = vector.shape_cast %225 : vector<2x8xf32> to vector<2x8x1xf32>
      %cst_94 = arith.constant 1.280000e+02 : f32
      %227 = vector.broadcast %cst_94 : f32 to vector<2x8x1xf32>
      %228 = arith.divf %226, %227 : vector<2x8x1xf32>
      %229 = vector.broadcast %221 : vector<2x8x1xf32> to vector<2x8x128xf32>
      %230 = arith.subf %217, %229 : vector<2x8x128xf32>
      %cst_95 = arith.constant 9.99999974E-6 : f32
      %231 = vector.broadcast %cst_95 : f32 to vector<2x8x1xf32>
      %232 = arith.addf %228, %231 : vector<2x8x1xf32>
      %233 = math.rsqrt %232 : vector<2x8x1xf32>
      %234 = vector.broadcast %233 : vector<2x8x1xf32> to vector<2x8x128xf32>
      %235 = arith.mulf %230, %234 : vector<2x8x128xf32>
      %236 = vector.shape_cast %235 : vector<2x8x128xf32> to vector<16x128xf32>
      %cst_96 = arith.constant dense<0.000000e+00> : vector<16x384xf32>
      %237 = tpu.matmul %236, %11, %cst_96 {dimension_numbers = #tpu.dot_dimension_numbers<[1], [0], [0], [1], [0, 0, 1, 1], [], []>} : vector<16x128xf32>, vector<128x384xf32>, vector<16x384xf32> -> vector<16x384xf32>
      %238 = vector.extract_strided_slice %237 {offsets = [0, 0], sizes = [16, 128], strides = [1, 1]} : vector<16x384xf32> to vector<16x128xf32>
      %239 = vector.extract_strided_slice %238 {offsets = [0, 0], sizes = [16, 32], strides = [1, 1]} : vector<16x128xf32> to vector<16x32xf32>
      %240 = vector.extract_strided_slice %238 {offsets = [0, 32], sizes = [16, 32], strides = [1, 1]} : vector<16x128xf32> to vector<16x32xf32>
      %241 = vector.extract_strided_slice %238 {offsets = [0, 64], sizes = [16, 32], strides = [1, 1]} : vector<16x128xf32> to vector<16x32xf32>
      %242 = vector.extract_strided_slice %238 {offsets = [0, 96], sizes = [16, 32], strides = [1, 1]} : vector<16x128xf32> to vector<16x32xf32>
      %243 = vector.shape_cast %239 : vector<16x32xf32> to vector<1x16x32xf32>
      %244 = vector.shape_cast %240 : vector<16x32xf32> to vector<1x16x32xf32>
      %245 = vector.shape_cast %241 : vector<16x32xf32> to vector<1x16x32xf32>
      %246 = vector.shape_cast %242 : vector<16x32xf32> to vector<1x16x32xf32>
      %247 = tpu.concatenate %243, %244, %245, %246 in 0 : vector<1x16x32xf32>, vector<1x16x32xf32>, vector<1x16x32xf32>, vector<1x16x32xf32> -> vector<4x16x32xf32>
      %248 = vector.shape_cast %247 : vector<4x16x32xf32> to vector<8x8x32xf32>
      %249 = vector.extract_strided_slice %237 {offsets = [0, 128], sizes = [16, 128], strides = [1, 1]} : vector<16x384xf32> to vector<16x128xf32>
      %250 = vector.extract_strided_slice %249 {offsets = [0, 0], sizes = [16, 32], strides = [1, 1]} : vector<16x128xf32> to vector<16x32xf32>
      %251 = vector.extract_strided_slice %249 {offsets = [0, 32], sizes = [16, 32], strides = [1, 1]} : vector<16x128xf32> to vector<16x32xf32>
      %252 = vector.extract_strided_slice %249 {offsets = [0, 64], sizes = [16, 32], strides = [1, 1]} : vector<16x128xf32> to vector<16x32xf32>
      %253 = vector.extract_strided_slice %249 {offsets = [0, 96], sizes = [16, 32], strides = [1, 1]} : vector<16x128xf32> to vector<16x32xf32>
      %254 = vector.shape_cast %250 : vector<16x32xf32> to vector<1x16x32xf32>
      %255 = vector.shape_cast %251 : vector<16x32xf32> to vector<1x16x32xf32>
      %256 = vector.shape_cast %252 : vector<16x32xf32> to vector<1x16x32xf32>
      %257 = vector.shape_cast %253 : vector<16x32xf32> to vector<1x16x32xf32>
      %258 = tpu.concatenate %254, %255, %256, %257 in 0 : vector<1x16x32xf32>, vector<1x16x32xf32>, vector<1x16x32xf32>, vector<1x16x32xf32> -> vector<4x16x32xf32>
      %259 = vector.shape_cast %258 : vector<4x16x32xf32> to vector<8x8x32xf32>
      %260 = vector.extract_strided_slice %237 {offsets = [0, 256], sizes = [16, 128], strides = [1, 1]} : vector<16x384xf32> to vector<16x128xf32>
      %261 = vector.extract_strided_slice %260 {offsets = [0, 0], sizes = [16, 32], strides = [1, 1]} : vector<16x128xf32> to vector<16x32xf32>
      %262 = vector.extract_strided_slice %260 {offsets = [0, 32], sizes = [16, 32], strides = [1, 1]} : vector<16x128xf32> to vector<16x32xf32>
      %263 = vector.extract_strided_slice %260 {offsets = [0, 64], sizes = [16, 32], strides = [1, 1]} : vector<16x128xf32> to vector<16x32xf32>
      %264 = vector.extract_strided_slice %260 {offsets = [0, 96], sizes = [16, 32], strides = [1, 1]} : vector<16x128xf32> to vector<16x32xf32>
      %265 = vector.shape_cast %261 : vector<16x32xf32> to vector<1x16x32xf32>
      %266 = vector.shape_cast %262 : vector<16x32xf32> to vector<1x16x32xf32>
      %267 = vector.shape_cast %263 : vector<16x32xf32> to vector<1x16x32xf32>
      %268 = vector.shape_cast %264 : vector<16x32xf32> to vector<1x16x32xf32>
      %269 = tpu.concatenate %265, %266, %267, %268 in 0 : vector<1x16x32xf32>, vector<1x16x32xf32>, vector<1x16x32xf32>, vector<1x16x32xf32> -> vector<4x16x32xf32>
      %270 = vector.shape_cast %269 : vector<4x16x32xf32> to vector<8x8x32xf32>
      "tpu.trace_start"() <{level = 10 : i32, message = "xse,xte->xst"}> : () -> ()
      %cst_97 = arith.constant dense<0.000000e+00> : vector<8x8x8xf32>
      %271 = tpu.matmul %248, %259, %cst_97 {dimension_numbers = #tpu.dot_dimension_numbers<[2], [2], [1], [1], [0, 0, 0, 1, 1, 1], [0], [0]>} : vector<8x8x32xf32>, vector<8x8x32xf32>, vector<8x8x8xf32> -> vector<8x8x8xf32>
      "tpu.trace_stop"() : () -> ()
      %cst_98 = arith.constant dense<0xFF800000> : vector<8x8xf32>
      %272 = vector.multi_reduction <maximumf>, %271, %cst_98 [2] : vector<8x8x8xf32> to vector<8x8xf32>
      %273 = vector.shape_cast %272 : vector<8x8xf32> to vector<8x8x1xf32>
      %274 = vector.broadcast %273 : vector<8x8x1xf32> to vector<8x8x8xf32>
      %275 = arith.subf %271, %274 : vector<8x8x8xf32>
      %276 = math.exp %275 : vector<8x8x8xf32>
      %cst_99 = arith.constant dense<0.000000e+00> : vector<8x8xf32>
      %277 = vector.multi_reduction <add>, %276, %cst_99 [2] : vector<8x8x8xf32> to vector<8x8xf32>
      %278 = vector.shape_cast %277 : vector<8x8xf32> to vector<8x8x1xf32>
      %279 = tpu.reciprocal %278 {approx = true} : vector<8x8x1xf32> -> vector<8x8x1xf32>
      %280 = vector.broadcast %279 : vector<8x8x1xf32> to vector<8x8x8xf32>
      %281 = arith.mulf %276, %280 : vector<8x8x8xf32>
      "tpu.trace_start"() <{level = 10 : i32, message = "xst,xte->xse"}> : () -> ()
      %cst_100 = arith.constant dense<0.000000e+00> : vector<8x8x32xf32>
      %282 = tpu.matmul %281, %270, %cst_100 {dimension_numbers = #tpu.dot_dimension_numbers<[2], [1], [1], [2], [0, 0, 0, 1, 1, 2], [0], [0]>} : vector<8x8x8xf32>, vector<8x8x32xf32>, vector<8x8x32xf32> -> vector<8x8x32xf32>
      "tpu.trace_stop"() : () -> ()
      %283 = vector.shape_cast %282 : vector<8x8x32xf32> to vector<4x16x32xf32>
      %284 = vector.extract_strided_slice %283 {offsets = [0, 0, 0], sizes = [1, 16, 32], strides = [1, 1, 1]} : vector<4x16x32xf32> to vector<1x16x32xf32>
      %285 = vector.shape_cast %284 : vector<1x16x32xf32> to vector<16x32xf32>
      %286 = vector.extract_strided_slice %283 {offsets = [1, 0, 0], sizes = [1, 16, 32], strides = [1, 1, 1]} : vector<4x16x32xf32> to vector<1x16x32xf32>
      %287 = vector.shape_cast %286 : vector<1x16x32xf32> to vector<16x32xf32>
      %288 = vector.extract_strided_slice %283 {offsets = [2, 0, 0], sizes = [1, 16, 32], strides = [1, 1, 1]} : vector<4x16x32xf32> to vector<1x16x32xf32>
      %289 = vector.shape_cast %288 : vector<1x16x32xf32> to vector<16x32xf32>
      %290 = vector.extract_strided_slice %283 {offsets = [3, 0, 0], sizes = [1, 16, 32], strides = [1, 1, 1]} : vector<4x16x32xf32> to vector<1x16x32xf32>
      %291 = vector.shape_cast %290 : vector<1x16x32xf32> to vector<16x32xf32>
      %292 = tpu.concatenate %285, %287, %289, %291 in 1 : vector<16x32xf32>, vector<16x32xf32>, vector<16x32xf32>, vector<16x32xf32> -> vector<16x128xf32>
      %cst_101 = arith.constant dense<0.000000e+00> : vector<16x128xf32>
      %293 = tpu.matmul %292, %12, %cst_101 {dimension_numbers = #tpu.dot_dimension_numbers<[1], [0], [0], [1], [0, 0, 1, 1], [], []>} : vector<16x128xf32>, vector<128x128xf32>, vector<16x128xf32> -> vector<16x128xf32>
      %294 = vector.shape_cast %293 : vector<16x128xf32> to vector<2x8x128xf32>
      %295 = arith.addf %217, %294 : vector<2x8x128xf32>
      %cst_102 = arith.constant dense<0.000000e+00> : vector<2x8xf32>
      %296 = vector.multi_reduction <add>, %295, %cst_102 [2] : vector<2x8x128xf32> to vector<2x8xf32>
      %297 = vector.shape_cast %296 : vector<2x8xf32> to vector<2x8x1xf32>
      %cst_103 = arith.constant 1.280000e+02 : f32
      %298 = vector.broadcast %cst_103 : f32 to vector<2x8x1xf32>
      %299 = arith.divf %297, %298 : vector<2x8x1xf32>
      %300 = vector.broadcast %299 : vector<2x8x1xf32> to vector<2x8x128xf32>
      %301 = arith.subf %295, %300 : vector<2x8x128xf32>
      %302 = arith.mulf %301, %301 : vector<2x8x128xf32>
      %cst_104 = arith.constant dense<0.000000e+00> : vector<2x8xf32>
      %303 = vector.multi_reduction <add>, %302, %cst_104 [2] : vector<2x8x128xf32> to vector<2x8xf32>
      %304 = vector.shape_cast %303 : vector<2x8xf32> to vector<2x8x1xf32>
      %cst_105 = arith.constant 1.280000e+02 : f32
      %305 = vector.broadcast %cst_105 : f32 to vector<2x8x1xf32>
      %306 = arith.divf %304, %305 : vector<2x8x1xf32>
      %307 = vector.broadcast %299 : vector<2x8x1xf32> to vector<2x8x128xf32>
      %308 = arith.subf %295, %307 : vector<2x8x128xf32>
      %cst_106 = arith.constant 9.99999974E-6 : f32
      %309 = vector.broadcast %cst_106 : f32 to vector<2x8x1xf32>
      %310 = arith.addf %306, %309 : vector<2x8x1xf32>
      %311 = math.rsqrt %310 : vector<2x8x1xf32>
      %312 = vector.broadcast %311 : vector<2x8x1xf32> to vector<2x8x128xf32>
      %313 = arith.mulf %308, %312 : vector<2x8x128xf32>
      %314 = vector.shape_cast %313 : vector<2x8x128xf32> to vector<16x128xf32>
      %cst_107 = arith.constant dense<0.000000e+00> : vector<16x512xf32>
      %315 = tpu.matmul %314, %13, %cst_107 {dimension_numbers = #tpu.dot_dimension_numbers<[1], [0], [0], [1], [0, 0, 1, 1], [], []>} : vector<16x128xf32>, vector<128x512xf32>, vector<16x512xf32> -> vector<16x512xf32>
      %cst_108 = arith.constant 0.000000e+00 : f32
      %316 = vector.broadcast %cst_108 : f32 to vector<16x512xf32>
      %317 = arith.maximumf %315, %316 : vector<16x512xf32>
      %cst_109 = arith.constant dense<0.000000e+00> : vector<16x128xf32>
      %318 = tpu.matmul %317, %14, %cst_109 {dimension_numbers = #tpu.dot_dimension_numbers<[1], [0], [0], [1], [0, 0, 1, 1], [], []>} : vector<16x512xf32>, vector<512x128xf32>, vector<16x128xf32> -> vector<16x128xf32>
      %319 = vector.shape_cast %318 : vector<16x128xf32> to vector<2x8x128xf32>
      %320 = arith.addf %295, %319 : vector<2x8x128xf32>
      %c0_110 = arith.constant 0 : index
      %c0_111 = arith.constant 0 : index
      %c0_112 = arith.constant 0 : index
      %321 = vector.load %arg18[%c0_110, %c0_111, %c0_112] : memref<2x8x128xf32, #tpu.memory_space<vmem>>, vector<2x8x128xf32>
      tpu.vector_store %arg18[%c0_110, %c0_111, %c0_112], %320 {strides = array<i32>} : memref<2x8x128xf32, #tpu.memory_space<vmem>>, vector<2x8x128xf32>,
    } else {
    }
    return
  }
  func.func @transform_0(%arg0: i32, %arg1: i32) -> (i32, i32, i32, i32) {
    %c0_i32 = arith.constant 0 : i32
    %c0_i32_0 = arith.constant 0 : i32
    %c0_i32_1 = arith.constant 0 : i32
    return %arg0, %arg1, %c0_i32, %c0_i32_0 : i32, i32, i32, i32
  }
  func.func @transform_1(%arg0: i32, %arg1: i32) -> (i32, i32, i32) {
    %c0_i32 = arith.constant 0 : i32
    %c0_i32_0 = arith.constant 0 : i32
    %c0_i32_1 = arith.constant 0 : i32
    return %arg0, %c0_i32, %c0_i32_0 : i32, i32, i32
  }
  func.func @transform_2(%arg0: i32, %arg1: i32) -> (i32, i32) {
    %c0_i32 = arith.constant 0 : i32
    %c0_i32_0 = arith.constant 0 : i32
    %c0_i32_1 = arith.constant 0 : i32
    return %c0_i32, %c0_i32_0 : i32, i32
  }
  func.func @transform_3(%arg0: i32, %arg1: i32) -> (i32, i32) {
    %c0_i32 = arith.constant 0 : i32
    %c0_i32_0 = arith.constant 0 : i32
    %c0_i32_1 = arith.constant 0 : i32
    return %c0_i32, %c0_i32_0 : i32, i32
  }
  func.func @transform_4(%arg0: i32, %arg1: i32) -> (i32, i32) {
    %c0_i32 = arith.constant 0 : i32
    %c0_i32_0 = arith.constant 0 : i32
    %c0_i32_1 = arith.constant 0 : i32
    return %c0_i32, %c0_i32_0 : i32, i32
  }
  func.func @transform_5(%arg0: i32, %arg1: i32) -> (i32, i32) {
    %c0_i32 = arith.constant 0 : i32
    %c0_i32_0 = arith.constant 0 : i32
    %c0_i32_1 = arith.constant 0 : i32
    return %c0_i32, %c0_i32_0 : i32, i32
  }
  func.func @transform_6(%arg0: i32, %arg1: i32) -> (i32, i32) {
    %c0_i32 = arith.constant 0 : i32
    %c0_i32_0 = arith.constant 0 : i32
    %c0_i32_1 = arith.constant 0 : i32
    return %c0_i32, %c0_i32_0 : i32, i32
  }
  func.func @transform_7(%arg0: i32, %arg1: i32) -> (i32, i32) {
    %c0_i32 = arith.constant 0 : i32
    %c0_i32_0 = arith.constant 0 : i32
    %c0_i32_1 = arith.constant 0 : i32
    return %c0_i32, %c0_i32_0 : i32, i32
  }
  func.func @transform_8(%arg0: i32, %arg1: i32) -> (i32, i32) {
    %c0_i32 = arith.constant 0 : i32
    %c0_i32_0 = arith.constant 0 : i32
    %c0_i32_1 = arith.constant 0 : i32
    return %c0_i32, %c0_i32_0 : i32, i32
  }
  func.func @transform_9(%arg0: i32, %arg1: i32) -> (i32, i32) {
    %c0_i32 = arith.constant 0 : i32
    %c0_i32_0 = arith.constant 0 : i32
    %c0_i32_1 = arith.constant 0 : i32
    return %c0_i32, %c0_i32_0 : i32, i32
  }
  func.func @transform_10(%arg0: i32, %arg1: i32) -> (i32, i32) {
    %c0_i32 = arith.constant 0 : i32
    %c0_i32_0 = arith.constant 0 : i32
    %c0_i32_1 = arith.constant 0 : i32
    return %c0_i32, %c0_i32_0 : i32, i32
  }
  func.func @transform_11(%arg0: i32, %arg1: i32) -> (i32, i32) {
    %c0_i32 = arith.constant 0 : i32
    %c0_i32_0 = arith.constant 0 : i32
    %c0_i32_1 = arith.constant 0 : i32
    return %c0_i32, %c0_i32_0 : i32, i32
  }
  func.func @transform_12(%arg0: i32, %arg1: i32) -> (i32, i32) {
    %c0_i32 = arith.constant 0 : i32
    %c0_i32_0 = arith.constant 0 : i32
    %c0_i32_1 = arith.constant 0 : i32
    return %c0_i32, %c0_i32_0 : i32, i32
  }
  func.func @transform_13(%arg0: i32, %arg1: i32) -> (i32, i32) {
    %c0_i32 = arith.constant 0 : i32
    %c0_i32_0 = arith.constant 0 : i32
    %c0_i32_1 = arith.constant 0 : i32
    return %c0_i32, %c0_i32_0 : i32, i32
  }
  func.func @transform_14(%arg0: i32, %arg1: i32) -> (i32, i32, i32, i32) {
    %c0_i32 = arith.constant 0 : i32
    %c0_i32_0 = arith.constant 0 : i32
    %c0_i32_1 = arith.constant 0 : i32
    return %arg0, %arg1, %c0_i32, %c0_i32_0 : i32, i32, i32, i32
  }
  func.func @transform_15(%arg0: i32, %arg1: i32) -> (i32, i32, i32, i32) {
    %c0_i32 = arith.constant 0 : i32
    %c0_i32_0 = arith.constant 0 : i32
    %c0_i32_1 = arith.constant 0 : i32
    return %arg0, %arg1, %c0_i32, %c0_i32_0 : i32, i32, i32, i32
  }
}

</mosaic_0001>

<bundles_post_ra>
// kernel: slot_attention_video.1
= control target key start
LH: loop header
LB: loop body
LE: loop exit
PB: predicated region body
PF: predicated region fallthrough
CT: control target
= control target key end

     0   :  { %s9084_s0 = inlined_call_operand.hbm [shape: f32[2,3,16,64], index: 0, kind: input, shape index: {}]   ;;  %s9085_s1 = inlined_call_operand.hbm [shape: f32[2,8,128], index: 1, kind: input, shape index: {}]   ;;  %s9086_s2 = inlined_call_operand.hbm [shape: f32[64,256], index: 2, kind: input, shape index: {}]   ;;  %s9087_s3 = inlined_call_operand.hbm [shape: f32[128,128], index: 3, kind: input, shape index: {}]   ;;  %s9088_s4 = inlined_call_operand.hbm [shape: f32[256,384], index: 4, kind: input, shape index: {}]   ;;  %s9089_s5 = inlined_call_operand.hbm [shape: f32[128,128], index: 5, kind: input, shape index: {}]   ;;  %s9090_s6 = inlined_call_operand.hbm [shape: f32[128,512], index: 6, kind: input, shape index: {}]   ;;  %s9091_s7 = inlined_call_operand.hbm [shape: f32[512,128], index: 7, kind: input, shape index: {}]   ;;  %s9092_s8 = inlined_call_operand.hbm [shape: f32[128,128], index: 8, kind: input, shape index: {}]   ;;  %s9093_s9 = inlined_call_operand.hbm [shape: f32[128,128], index: 9, kind: input, shape index: {}]   ;;  %s9094_s10 = inlined_call_operand.hbm [shape: f32[128,384], index: 10, kind: input, shape index: {}]   ;;  %s9095_s11 = inlined_call_operand.hbm [shape: f32[128,128], index: 11, kind: input, shape index: {}]   ;;  %s9096_s12 = inlined_call_operand.hbm [shape: f32[128,512], index: 12, kind: input, shape index: {}]   ;;  %s9097_s13 = inlined_call_operand.hbm [shape: f32[512,128], index: 13, kind: input, shape index: {}]   ;;  %s9098_s14 = inlined_call_operand.hbm [shape: f32[2,3,8,128], index: 14, kind: output, shape index: {0}]   ;;  %s9099_s15 = inlined_call_operand.hbm [shape: f32[2,3,8,128], index: 15, kind: output, shape index: {1}]  }
   0x1   :  { %9163 = sst [smem:[#allocation247_spill]] %s9084_s0 }
   0x2   :  { %9164 = sst [smem:[#allocation248_spill]] %s9085_s1 }
   0x3   :  { %9165 = sst [smem:[#allocation249_spill]] %s9086_s2 }
   0x4   :  { %9166 = sst [smem:[#allocation250_spill]] %s9087_s3 }
   0x5   :  { %9167 = sst [smem:[#allocation251_spill]] %s9088_s4 }
   0x6   :  { %9168 = sst [smem:[#allocation252_spill]] %s9089_s5 }
   0x7   :  { %9169 = sst [smem:[#allocation253_spill]] %s9090_s6 }
   0x8   :  { %9170 = sst [smem:[#allocation254_spill]] %s9098_s14 }
   0x9   :  { %9171 = sst [smem:[#allocation255_spill]] %s9099_s15 }
   0xa   :  { %21 = vsyncpa [#allocation4], 0 }
   0xb   :  { %23 = vsyncpa [#allocation4 + $0x1], 0 }
   0xc   :  { %24 = vsyncpa [#allocation7], 0 }
   0xd   :  { %25 = vsyncpa [#allocation10], 0 }
   0xe   :  { %26 = vsyncpa [#allocation13], 0 }
   0xf   :  { %27 = vsyncpa [#allocation16], 0 }
  0x10   :  { %28 = vsyncpa [#allocation19], 0 }
  0x11   :  { %29 = vsyncpa [#allocation22], 0 }
  0x12   :  { %30 = vsyncpa [#allocation25], 0 }
  0x13   :  { %31 = vsyncpa [#allocation5], 0 }
  0x14   :  { %33 = vsyncpa [#allocation5 + $0x1], 0 }
  0x15   :  { %34 = vsyncpa [#allocation28], 0 }
  0x16   :  { %36 = vsyncpa [#allocation28 + $0x1], 0  ;;  %s7578_s18 = smov 0   ;;  %s7580_s19 = smov 0  }
  0x17   :  { %s7582_s20 = smov 0   ;;  %s7584_s21 = smov 0  }
  0x18   :  { %s7586_s22 = smov 0   ;;  %s7588_s23 = smov 0  }
  0x19 LB: > { %9172 = sst [smem:[#allocation42_spill]] %s7437_s18  ;;  %s5556_s24 = sadd.s32 4294967295, %s7457_s23   ;;  %s7457_s23 = sphi %s7588_s23, %s42_s23   ;;  %s7453_s22 = sphi %s7586_s22, %s9618_s22   ;;  %s7449_s21 = sphi %s7584_s21, %s9617_s21   ;;  %s7445_s20 = sphi %s7582_s20, %s9616_s20   ;;  %s7441_s19 = sphi %s7580_s19, %s9615_s19   ;;  %s7437_s18 = sphi %s7578_s18, %s9614_s18  }
  0x1a   : > { %9173 = sst [smem:[#allocation43_spill]] %s7449_s21  ;;  %s5557_s25 = sadd.s32 4294967294, %s7457_s23  }
  0x1b   : > { %s51_s26 = sadd.s32 1, %s7453_s22  ;;  %s63_s27 = sadd.s32 1, %s7445_s20 }
  0x1c   : > { %p52_p0 = scmp.ge.s32.totalorder %s51_s26, 3  ;;  %p70_p1 = scmp.ne.s32.totalorder %s7445_s20, %s7441_s19 }
  0x1d   : > { %p71_p2 = scmp.eq.s32.totalorder %s7457_s23, 0  ;;  %p76_p3 = scmp.ne.s32.totalorder %s7441_s19, %s7437_s18 }
  0x1e   : > { %s9620_s26 = smov (%p52_p0, %s51_s26), 0  ;;  %p7623_p5 = scmp.eq.s32.totalorder %s5556_s24, 0 }
  0x1f   : > { %9174 = sst [smem:[#allocation44_spill]] %s9620_s26  ;;  %p7619_p4 = por %p71_p2, %p70_p1 }
  0x20   : > { %s9176_s29 = scalar_select %p7623_p5, 1, 0 }
  0x21   : > { %s59_s30 = ssub.s32 %s7453_s22, %s9620_s26  ;;  %p380_p6 = scmp.eq.s32.totalorder %s5556_s24, 2 }
  0x22   : > { %9177 = sst [smem:[#allocation45_spill]] %s9176_s29  ;;  %p61_p7 = scmp.eq.s32.totalorder %s59_s30, 0 }
  0x23   : > { %p7631_p8 = por %p7623_p5, %p76_p3  ;;  %p7635_p9 = por %p380_p6, %p70_p1 }
  0x24   : > { %p386_p10 = scmp.eq.s32.totalorder %s5557_s25, 2  ;;  %p5558_p12 = scmp.ge.s32.totalorder %s7457_s23, 1 }
  0x25   : > { %s9178_s16 = scalar_select %p7631_p8, 1, 0 }
  0x26   : > { %s9180_s17 = scalar_select %p7635_p9, 1, 0 }
  0x27   : > { %9179 = sst [smem:[#allocation46_spill]] %s9178_s16  ;;  %p7642_p11 = por %p386_p10, %p76_p3 }
  0x28   : > { %9181 = sst [smem:[#allocation47_spill]] %s9180_s17  ;;  %p421_p13 = scmp.lt.s32.totalorder %s7457_s23, 4 }
  0x29   : > { %s7640_s18 = scalar_select %p61_p7, %s7445_s20, %s63_s27  }
  0x2a   : > { %s9183_s15 = scalar_select %p7642_p11, 1, 0 }
  0x2b   : > { %9182 = sst [smem:[#allocation48_spill]] %s7640_s18  ;;  %p7648_p0 = pnand %p5558_p12, %p421_p13 }
  0x2c   : > { %9184 = sst [smem:[#allocation49_spill]] %s9183_s15  ;;  %s7459_s30 = smov [#allocation6]  }
  0x2d   : > { %s436_s26 = sshll.u32 %s7459_s30, 4  ;;  %p6553_p1 = pneg %p7648_p0  ;;  %s437_s26 = int_to_ptr.vmem [resolvable:$true] %s436_s26 }
  0x2e   : > { %s7460_s14 = smov [#allocation9]   ;;  %s7461_s18 = smov [#allocation12]  }
  0x2f   : > { %s462_s25 = sshll.u32 %s7460_s14, 4  ;;  %p7656_p2 = pnand %p6553_p1, %p7623_p5  ;;  %s7660_s25 = int_to_ptr.vmem [resolvable:$true] %s462_s25 }
  0x30   : > { %s488_s15 = sshll.u32 %s7461_s18, 4  ;;  %s6992_s17 = scalar_lea.vmem %s437_s26, 256  ;;  %s7662_s15 = int_to_ptr.vmem [resolvable:$true] %s488_s15 }
  0x31   : > { %p7666_p3 = pneg %p7656_p2  ;;  %p6993_p6 = scmp.ne.s32.totalorder %s437_s26, %s6992_s17 }
  0x32   : > { %p7000_p12 = scmp.lt.s32.totalorder %s437_s26, %s437_s26  ;;  %p7001_p13 = scmp.lt.s32.totalorder %s6992_s17, %s6992_s17 }
  0x33   : > { %p6995_p7 = pnand %p6993_p6, %p7666_p3 }
  0x34   : > { %p7002_p1 = por %p7001_p13, %p7000_p12 }
  0x35   : > { %p6996_p10 = pneg %p6995_p7 }
  0x37   : > { %p7003_p11 = pnand %p7002_p1, %p6996_p10 }
  0x39   : > { %7006 = shalt.err (!%p7003_p11)
}
  0x3a   : > { %s9116_s14 = smov 128   ;;  %s9121_s18 = smov 8  }
  0x3b   : > { %s9188_s1 = sld [smem:[#allocation248_spill]]  ;;  %s7018_s16 = scalar_lea.vmem %s7660_s25, 2048 }
  0x3c   : > { %p7019_p6 = scmp.ne.s32.totalorder %s7660_s25, %s7018_s16  ;;  %p7026_p10 = scmp.lt.s32.totalorder %s7660_s25, %s7660_s25 }
  0x3d   : > { %p7027_p12 = scmp.lt.s32.totalorder %s7018_s16, %s7018_s16 }
  0x3e   : > { %p7021_p7 = pnand %p7019_p6, %p7666_p3 }
  0x3f   : > { %p7028_p13 = por %p7027_p12, %p7026_p10 }
  0x40   : > { %p7022_p11 = pneg %p7021_p7 }
  0x41   : > { %6556 = dma.hbm_to_vmem [thread:$0]  (!%p7656_p2), %s9188_s1, 256, %s437_s26, [#allocation7], %s9116_s14, %s9116_s14, %s9121_s18  }
  0x42   : > { %p7029_p1 = pnand %p7028_p13, %p7022_p11 }
  0x44   : > { %7032 = shalt.err (!%p7029_p1)
}
  0x45   : > { %s9189_s3 = sld [smem:[#allocation250_spill]]  ;;  %s7044_s26 = scalar_lea.vmem %s7662_s15, 2048 }
  0x46   : > { %p7045_p6 = scmp.ne.s32.totalorder %s7662_s15, %s7044_s26  ;;  %p7052_p10 = scmp.lt.s32.totalorder %s7662_s15, %s7662_s15 }
  0x47   : > { %p7053_p12 = scmp.lt.s32.totalorder %s7044_s26, %s7044_s26 }
  0x48   : > { %p7047_p7 = pnand %p7045_p6, %p7666_p3 }
  0x49   : > { %p7054_p13 = por %p7053_p12, %p7052_p10 }
  0x4a   : > { %p7048_p11 = pneg %p7047_p7 }
  0x4b   : > { %6562 = dma.hbm_to_vmem [thread:$0]  (!%p7656_p2), %s9189_s3, 2048, %s7660_s25, [#allocation10], %s9116_s14, %s9116_s14, %s9121_s18  }
  0x4c   : > { %p7055_p1 = pnand %p7054_p13, %p7048_p11 }
  0x4e   : > { %7058 = shalt.err (!%p7055_p1)
}
  0x4f   : > { %s9190_s5 = sld [smem:[#allocation252_spill]]  ;;  %s7464_s25 = smov [#allocation15]  }
  0x50   : > { %s514_s17 = sshll.u32 %s7464_s25, 4  ;;  %s7465_s21 = smov [#allocation18]   ;;  %s515_s17 = int_to_ptr.vmem [resolvable:$true] %s514_s17 }
  0x51   : > { %s540_s1 = sshll.u32 %s7465_s21, 4  ;;  %s7070_s26 = scalar_lea.vmem %s515_s17, 8192  ;;  %s541_s1 = int_to_ptr.vmem [resolvable:$true] %s540_s1 }
  0x52   : > { %p7071_p6 = scmp.ne.s32.totalorder %s515_s17, %s7070_s26  ;;  %p7078_p10 = scmp.lt.s32.totalorder %s515_s17, %s515_s17 }
  0x53   : > { %p7079_p12 = scmp.lt.s32.totalorder %s7070_s26, %s7070_s26 }
  0x54   : > { %p7073_p7 = pnand %p7071_p6, %p7666_p3 }
  0x55   : > { %6568 = dma.hbm_to_vmem [thread:$0]  (!%p7656_p2), %s9190_s5, 2048, %s7662_s15, [#allocation13], %s9116_s14, %s9116_s14, %s9121_s18  }
  0x56   : > { %p7074_p11 = pneg %p7073_p7  ;;  %p7080_p13 = por %p7079_p12, %p7078_p10 }
  0x58   : > { %p7081_p1 = pnand %p7080_p13, %p7074_p11 }
  0x5a   : > { %7084 = shalt.err (!%p7081_p1)
}
  0x5b   : > { %6574 = dma.hbm_to_vmem [thread:$0]  (!%p7656_p2), %s9091_s7, 8192, %s515_s17, [#allocation16], %s9116_s14, %s9116_s14, %s9121_s18  }
  0x5c   : > { %s7096_s16 = scalar_lea.vmem %s541_s1, 2048  ;;  %p7104_p5 = scmp.lt.s32.totalorder %s541_s1, %s541_s1 }
  0x5d   : > { %p7097_p9 = scmp.ne.s32.totalorder %s541_s1, %s7096_s16  ;;  %p7105_p10 = scmp.lt.s32.totalorder %s7096_s16, %s7096_s16 }
  0x5f   : > { %p7099_p6 = pnand %p7097_p9, %p7666_p3  ;;  %p7106_p11 = por %p7105_p10, %p7104_p5 }
  0x61   : > { %p7100_p7 = pneg %p7099_p6 }
  0x63   : > { %p7107_p12 = pnand %p7106_p11, %p7100_p7 }
  0x65   : > { %7110 = shalt.err (!%p7107_p12)
}
  0x66   : > { %6580 = dma.hbm_to_vmem [thread:$0]  (!%p7656_p2), %s9093_s9, 2048, %s541_s1, [#allocation19], %s9116_s14, %s9116_s14, %s9121_s18  }
  0x67   : > { %s7466_s17 = smov [#allocation21]   ;;  %s7467_s15 = smov [#allocation8]  }
  0x68   : > { %s566_s26 = sshll.u32 %s7466_s17, 4  ;;  %s449_s29 = sshll.u32 %s7467_s15, 4  ;;  %s567_s26 = int_to_ptr.vmem [resolvable:$true] %s566_s26  ;;  %s450_s29 = int_to_ptr.vmem [resolvable:$true] %s449_s29 }
  0x69   : > { %s7122_s3 = scalar_lea.vmem %s567_s26, 2048  ;;  %p7130_p1 = scmp.lt.s32.totalorder %s567_s26, %s567_s26 }
  0x6a   : > { %p7123_p9 = scmp.ne.s32.totalorder %s567_s26, %s7122_s3  ;;  %p7131_p6 = scmp.lt.s32.totalorder %s7122_s3, %s7122_s3 }
  0x6c   : > { %p7125_p5 = pnand %p7123_p9, %p7666_p3  ;;  %p7132_p7 = por %p7131_p6, %p7130_p1 }
  0x6e   : > { %p7126_p13 = pneg %p7125_p5 }
  0x70   : > { %p7133_p10 = pnand %p7132_p7, %p7126_p13 }
  0x72   : > { %7136 = shalt.err (!%p7133_p10)
}
  0x73   : > { %6586 = dma.hbm_to_vmem [thread:$0]  (!%p7656_p2), %s9095_s11, 2048, %s567_s26, [#allocation22], %s9116_s14, %s9116_s14, %s9121_s18  }
  0x74   : > { %s7148_s25 = scalar_lea.vmem %s450_s29, 2048  ;;  %p7156_p5 = scmp.lt.s32.totalorder %s450_s29, %s450_s29 }
  0x75   : > { %p7149_p11 = scmp.ne.s32.totalorder %s450_s29, %s7148_s25  ;;  %p7157_p1 = scmp.lt.s32.totalorder %s7148_s25, %s7148_s25 }
  0x77   : > { %p7151_p12 = pnand %p7149_p11, %p7666_p3  ;;  %p7158_p13 = por %p7157_p1, %p7156_p5 }
  0x79   : > { %p7152_p9 = pneg %p7151_p12 }
  0x7b   : > { %p7159_p6 = pnand %p7158_p13, %p7152_p9 }
  0x7d   : > { %7162 = shalt.err (!%p7159_p6)
}
  0x7e   : > { %s7468_s3 = smov 256   ;;  %s7469_s21 = smov 16  }
  0x7f   : > { %s9191_s2 = sld [smem:[#allocation249_spill]]  ;;  %s7470_s26 = smov [#allocation11]  }
  0x80   : > { %s475_s1 = sshll.u32 %s7470_s26, 4  ;;  %s476_s1 = int_to_ptr.vmem [resolvable:$true] %s475_s1 }
  0x81   : > { %s7174_s16 = scalar_lea.vmem %s476_s1, 12288  ;;  %p7182_p12 = scmp.lt.s32.totalorder %s476_s1, %s476_s1 }
  0x82   : > { %p7175_p7 = scmp.ne.s32.totalorder %s476_s1, %s7174_s16  ;;  %p7183_p9 = scmp.lt.s32.totalorder %s7174_s16, %s7174_s16 }
  0x84   : > { %p7177_p10 = pnand %p7175_p7, %p7666_p3  ;;  %p7184_p5 = por %p7183_p9, %p7182_p12 }
  0x85   : > { %6559 = dma.hbm_to_vmem [thread:$0]  (!%p7656_p2), %s9191_s2, 2048, %s450_s29, [#allocation7], %s7468_s3, %s7468_s3, %s7469_s21  }
  0x86   : > { %p7178_p11 = pneg %p7177_p10 }
  0x88   : > { %p7185_p1 = pnand %p7184_p5, %p7178_p11 }
  0x8a   : > { %7188 = shalt.err (!%p7185_p1)
}
  0x8b   : > { %s9118_s25 = smov 384   ;;  %s9119_s14 = smov 24  }
  0x8c   : > { %s9192_s4 = sld [smem:[#allocation251_spill]]  ;;  %s7473_s21 = smov [#allocation14]  }
  0x8d   : > { %s501_s17 = sshll.u32 %s7473_s21, 4  ;;  %s502_s17 = int_to_ptr.vmem [resolvable:$true] %s501_s17 }
  0x8e   : > { %s7200_s15 = scalar_lea.vmem %s502_s17, 8192  ;;  %p7208_p10 = scmp.lt.s32.totalorder %s502_s17, %s502_s17 }
  0x8f   : > { %p7201_p13 = scmp.ne.s32.totalorder %s502_s17, %s7200_s15  ;;  %p7209_p11 = scmp.lt.s32.totalorder %s7200_s15, %s7200_s15 }
  0x91   : > { %p7203_p6 = pnand %p7201_p13, %p7666_p3  ;;  %p7210_p12 = por %p7209_p11, %p7208_p10 }
  0x92   : > { %6565 = dma.hbm_to_vmem [thread:$0]  (!%p7656_p2), %s9192_s4, 12288, %s476_s1, [#allocation10], %s9118_s25, %s9118_s25, %s9119_s14  }
  0x93   : > { %p7204_p7 = pneg %p7203_p6 }
  0x95   : > { %p7211_p9 = pnand %p7210_p12, %p7204_p7 }
  0x97   : > { %7214 = shalt.err (!%p7211_p9)
}
  0x98   : > { %s9120_s26 = smov 512   ;;  %s9122_s16 = smov 32  }
  0x99   : > { %s9193_s6 = sld [smem:[#allocation253_spill]]  ;;  %s7476_s3 = smov [#allocation17]  }
  0x9a   : > { %s527_s21 = sshll.u32 %s7476_s3, 4  ;;  %s7477_s25 = smov [#allocation20]   ;;  %s528_s21 = int_to_ptr.vmem [resolvable:$true] %s527_s21 }
  0x9b   : > { %s553_s15 = sshll.u32 %s7477_s25, 4  ;;  %s7226_s14 = scalar_lea.vmem %s528_s21, 2048  ;;  %s554_s15 = int_to_ptr.vmem [resolvable:$true] %s553_s15 }
  0x9c   : > { %p7227_p5 = scmp.ne.s32.totalorder %s528_s21, %s7226_s14  ;;  %p7234_p6 = scmp.lt.s32.totalorder %s528_s21, %s528_s21 }
  0x9d   : > { %p7235_p7 = scmp.lt.s32.totalorder %s7226_s14, %s7226_s14 }
  0x9e   : > { %p7229_p1 = pnand %p7227_p5, %p7666_p3 }
  0x9f   : > { %6571 = dma.hbm_to_vmem [thread:$0]  (!%p7656_p2), %s9193_s6, 8192, %s502_s17, [#allocation13], %s9120_s26, %s9120_s26, %s9122_s16  }
  0xa0   : > { %p7230_p13 = pneg %p7229_p1  ;;  %p7236_p10 = por %p7235_p7, %p7234_p6 }
  0xa2   : > { %p7237_p11 = pnand %p7236_p10, %p7230_p13 }
  0xa4   : > { %7240 = shalt.err (!%p7237_p11)
}
  0xa5   : > { %s9194_s1 = smov 128   ;;  %s7252_s25 = scalar_lea.vmem %s554_s15, 6144 }
  0xa6   : > { %6577 = dma.hbm_to_vmem [thread:$0]  (!%p7656_p2), %s9092_s8, 2048, %s528_s21, [#allocation16], %s9194_s1, %s9194_s1, %s9121_s18  }
  0xa7   : > { %p7253_p12 = scmp.ne.s32.totalorder %s554_s15, %s7252_s25  ;;  %p7260_p1 = scmp.lt.s32.totalorder %s554_s15, %s554_s15 }
  0xa8   : > { %p7261_p6 = scmp.lt.s32.totalorder %s7252_s25, %s7252_s25 }
  0xa9   : > { %p7255_p9 = pnand %p7253_p12, %p7666_p3 }
  0xaa   : > { %p7262_p13 = por %p7261_p6, %p7260_p1 }
  0xab   : > { %p7256_p5 = pneg %p7255_p9 }
  0xad   : > { %p7263_p7 = pnand %p7262_p13, %p7256_p5 }
  0xaf   : > { %7266 = shalt.err (!%p7263_p7)
}
  0xb0   : > { %s9195_s14 = smov 24   ;;  %s9196_s3 = smov 384  }
  0xb1   : > { %6583 = dma.hbm_to_vmem [thread:$0]  (!%p7656_p2), %s9094_s10, 6144, %s554_s15, [#allocation19], %s9196_s3, %s9196_s3, %s9195_s14  }
  0xb2   : > { %s7478_s21 = smov [#allocation23]   ;;  %s7479_s18 = smov [#allocation24]  }
  0xb3   : > { %s579_s29 = sshll.u32 %s7478_s21, 4  ;;  %s592_s16 = sshll.u32 %s7479_s18, 4  ;;  %s580_s29 = int_to_ptr.vmem [resolvable:$true] %s579_s29  ;;  %s593_s16 = int_to_ptr.vmem [resolvable:$true] %s592_s16 }
  0xb4   : > { %s7278_s2 = scalar_lea.vmem %s580_s29, 8192  ;;  %p7286_p9 = scmp.lt.s32.totalorder %s580_s29, %s580_s29 }
  0xb5   : > { %p7279_p10 = scmp.ne.s32.totalorder %s580_s29, %s7278_s2  ;;  %p7287_p5 = scmp.lt.s32.totalorder %s7278_s2, %s7278_s2 }
  0xb7   : > { %p7281_p11 = pnand %p7279_p10, %p7666_p3  ;;  %p7288_p1 = por %p7287_p5, %p7286_p9 }
  0xb9   : > { %p7282_p12 = pneg %p7281_p11 }
  0xbb   : > { %p7289_p6 = pnand %p7288_p1, %p7282_p12 }
  0xbd   : > { %7292 = shalt.err (!%p7289_p6)
}
  0xbe   : > { %s9197_s26 = smov 32   ;;  %s9198_s25 = smov 512  }
  0xbf   : > { %6589 = dma.hbm_to_vmem [thread:$0]  (!%p7656_p2), %s9096_s12, 8192, %s580_s29, [#allocation22], %s9198_s25, %s9198_s25, %s9197_s26  }
  0xc0   : > { %s7304_s18 = scalar_lea.vmem %s593_s16, 8192  ;;  %p7312_p11 = scmp.lt.s32.totalorder %s593_s16, %s593_s16 }
  0xc1   : > { %p7305_p13 = scmp.ne.s32.totalorder %s593_s16, %s7304_s18  ;;  %p7313_p9 = scmp.lt.s32.totalorder %s7304_s18, %s7304_s18 }
  0xc3   : > { %p7307_p7 = pnand %p7305_p13, %p7666_p3  ;;  %p7314_p12 = por %p7313_p9, %p7312_p11 }
  0xc5   : > { %p7308_p10 = pneg %p7307_p7 }
  0xc7   : > { %p7315_p5 = pnand %p7314_p12, %p7308_p10 }
  0xc9   : > { %7318 = shalt.err (!%p7315_p5)
}
  0xca   : > { %s9199_s2 = smov 8   ;;  %p5572_p1 = scmp.ge.s32.totalorder %s7457_s23, 3 }
  0xcb   : > { %6592 = dma.hbm_to_vmem [thread:$0]  (!%p7656_p2), %s9097_s13, 8192, %s593_s16, [#allocation25], %s9194_s1, %s9194_s1, %s9199_s2  }
  0xcc   : > { %602 = sbr.rel (%p5572_p1) target bundleno = 223 (0xdf), region = 68 }
  0xd1   : > { %s606_s30 = sand.u32 1, %s7445_s20   ;;  %s5643_s21 = sshll.u32 %s7453_s22, 8 }
  0xd2   : > { %s5573_s27 = sshll.u32 %s606_s30, 5  ;;  %s9200_s0 = sld [smem:[#allocation247_spill]] }
  0xd3   : > { %s6514_s16 = scalar_select %p7619_p4, [#allocation0], [#allocation31] }
  0xd4   : > { %s610_s1 = scalar_lea.vmem [#allocation3], %s5573_s27  ;;  %s7480_s18 = smov 768  }
  0xd5   : > { %s632_s15 = sshll.u32 %s610_s1, 4  ;;  %s624_s14 = sld [smem:[%s6514_s16]]   ;;  %s633_s15 = int_to_ptr.vmem [resolvable:$true] %s632_s15 }
  0xd6   : > { %6515 = sst [smem:[#allocation30]] (%p7619_p4), %s7480_s18  ;;  %s7481_s2 = smov 256  }
  0xd7   : > { %6516 = sst [smem:[#allocation30 + $0x1]] (%p7619_p4), %s7481_s2  ;;  %s7482_s3 = smov 2  }
  0xd8   : > { %s619_s25 = scalar_lea.hbm %s9200_s0, %s5643_s21  ;;  %6517 = sst [smem:[#allocation30 + $0x2]] (%p7619_p4), %s7482_s3 }
  0xd9   : > { %s7483_s17 = smov 128   ;;  %s7484_s27 = smov 8  }
  0xda   : > { %6518 = sst [smem:[#allocation30 + $0x3]] (%p7619_p4), %s7483_s17  ;;  %s607_s26 = scalar_lea.sflag [#allocation4], %s606_s30 }
  0xdb   : > { %6519 = sst [smem:[#allocation30 + $0x4]] (%p7619_p4), %s7483_s17  ;;  %s5576_s21 = sshll.u32 %s624_s14, 26 }
  0xdc   : > { %6520 = sst [smem:[#allocation30 + $0x5]] (%p7619_p4), %s7484_s27  ;;  %s5577_s29 = sadd.s32 134217728, %s5576_s21 }
  0xdd   : > { %s7485_s16 = smov 131072  }
  0xde   : > { %6521 = dma.general (%p7619_p4), %s619_s25, 512, %s633_s15, %s607_s26, %s7485_s16, [#allocation30], %s5577_s29, 0  }
  0xdf PF: > { %657 = sbr.rel (%p7648_p0) target bundleno = 6532 (0x1984), region = 76 }
  0xe4   : > { %s7832_s18 = sand.u32 1, %s7441_s19  }
  0xe5   : > { %s5579_s2 = sshll.u32 %s7832_s18, 5  ;;  %s660_s14 = scalar_lea.sflag [#allocation4], %s7832_s18 }
  0xe6   : > { %s7836_s3 = scalar_lea.vmem [#allocation3], %s5579_s2 }
  0xe7   : > { %7396 = dma.done.wait (%p7631_p8), %s660_s14, 512  }
  0xe8   : > { %7398 = vsyncadd (%p7631_p8), %s660_s14, 4294966784  ;;  %s9202_s28 = sld [smem:[#allocation45_spill]] }
  0xee   : > { %p9203_p4 = scmp.ne.s32.totalorder %s9202_s28, 0 }
  0xf0   : > { %7400 = dma.done.wait (%p9203_p4), [#allocation7], 2304  }
  0xf1   : > { %7402 = vsyncadd (%p9203_p4), [#allocation7], 4294964992 }
  0xf2   : > { %7404 = dma.done.wait (%p9203_p4), [#allocation10], 14336  }
  0xf3   : > { %7406 = vsyncadd (%p9203_p4), [#allocation10], 4294952960 }
  0xf4   : > { %7408 = dma.done.wait (%p9203_p4), [#allocation13], 10240  }
  0xf5   : > { %7410 = vsyncadd (%p9203_p4), [#allocation13], 4294957056 }
  0xf6   : > { %7412 = dma.done.wait (%p9203_p4), [#allocation16], 10240  }
  0xf7   : > { %7414 = vsyncadd (%p9203_p4), [#allocation16], 4294957056 }
  0xf8   : > { %7416 = dma.done.wait (%p9203_p4), [#allocation19], 8192  }
  0xf9   : > { %7418 = vsyncadd (%p9203_p4), [#allocation19], 4294959104 }
  0xfa   : > { %7420 = dma.done.wait (%p9203_p4), [#allocation22], 10240  }
  0xfb   : > { %7422 = vsyncadd (%p9203_p4), [#allocation22], 4294957056 }
  0xfc   : > { %7424 = dma.done.wait (%p9203_p4), [#allocation25], 8192  }
  0xfd   : > { %7426 = vsyncadd (%p9203_p4), [#allocation25], 4294959104  ;;  %s5593_s24 = sshll.u32 %s7832_s18, 4  ;;  %s9204_s15 = sld [smem:[#allocation43_spill]] }
  0xfe   : > { %s7871_s30 = scalar_lea.vmem [#allocation26], %s5593_s24  ;;  %s7873_s25 = scalar_lea.vmem [#allocation27], %s5593_s24 }
 0x103   : > { %p5595_p8 = scmp.ne.s32.totalorder %s9204_s15, 0 }
 0x105   : > { %774 = sbr.rel (%p5595_p8) target bundleno = 268 (0x10c), region = 136 }
 0x10a   : > { %v775_v0 = vld [vmem:[#allocation6] sm:$0xff]  ;;  %v776_v1 = vld [vmem:[#allocation6 + $0x8] sm:$0xff] }
 0x10b   : > { %777 = vst [vmem:[#allocation2] sm:$0xff] %v775_v0  ;;  %778 = vst [vmem:[#allocation2 + $0x8] sm:$0xff] %v776_v1 }
 0x10c PF: > { %v1279_v2 = vld [vmem:[%s7836_s3] sm:$0xff]  ;;  %vm1283_vm0 = vcmask 523264   ;;  %v1281_v3 = vld [vmem:[%s7836_s3 + $0x10] sm:$0xff]  ;;  %v1280_v4 = vld [vmem:[%s7836_s3 + $0x8] sm:$0xff]  ;;  %vm7487_vm1 = vmmov 0   ;;  %vm1676_vm2 = vcmask 130048  }
 0x10d   : > { %v1284_v5 = vsel %vm1283_vm0, %v1279_v2, 0.0  ;;  %v1290_v6 = vsel %vm1283_vm0, %v1281_v3, 0.0  ;;  %v1287_v9 = vsel %vm1283_vm0, %v1280_v4, 0.0  ;;  %v1282_v10 = vld [vmem:[%s7836_s3 + $0x18] sm:$0xff]  ;;  %v810_v12 = vld [vmem:[#allocation9 + $0x78] sm:$0xff]  ;;  %v809_v40 = vld [vmem:[#allocation9 + $0x70] sm:$0xff] }
 0x10e   : > { %1285 = vadd.xlane.f32.xlu0 %v1284_v5  ;;  %1291 = vadd.xlane.f32.xlu1 %v1290_v6  ;;  %v1293_v11 = vsel %vm1283_vm0, %v1282_v10, 0.0  ;;  %v808_v42 = vld [vmem:[#allocation9 + $0x68] sm:$0xff]  ;;  %v807_v43 = vld [vmem:[#allocation9 + $0x60] sm:$0xff]  ;;  %v794_v44 = vld [vmem:[#allocation8 + $0x78] sm:$0xff]  ;;  %s9403_s17 = sld [smem:[#allocation43_spill]] }
 0x10f   : > { %6072 = vmatprep.subr.mxu1 %v810_v12  ;;  %1365 = vmatprep.subr.mxu0 %v794_v44  ;;  %v793_v45 = vld [vmem:[#allocation8 + $0x70] sm:$0xff]  ;;  %v806_v46 = vld [vmem:[#allocation9 + $0x58] sm:$0xff]  ;;  %v792_v47 = vld [vmem:[#allocation8 + $0x68] sm:$0xff] }
 0x110   : > { %6073 = vmatpush3.msra.mxu1 %v810_v12  ;;  %1366 = vmatpush1.msra.mxu0 %v793_v45  ;;  %v791_v48 = vld [vmem:[#allocation8 + $0x60] sm:$0xff]  ;;  %v805_v49 = vld [vmem:[#allocation9 + $0x50] sm:$0xff]  ;;  %v790_v50 = vld [vmem:[#allocation8 + $0x58] sm:$0xff] }
 0x111   : > { %6074 = vmatprep.subr.mxu1 %v809_v40  ;;  %1367 = vmatprep.subr.mxu0 %v792_v47  ;;  %v7924_v51 = vld [vmem:[#allocation17] sm:$0xff]  ;;  %v7926_v52 = vld [vmem:[#allocation17 + $0x8] sm:$0xff]  ;;  %v7928_v53 = vld [vmem:[#allocation17 + $0x10] sm:$0xff] }
 0x112   : > { %v7881_v7 = vld [vmem:[#allocation2] sm:$0xff]  ;;  %v7883_v8 = vld [vmem:[#allocation2 + $0x8] sm:$0xff]  ;;  %1288 = vadd.xlane.f32.xlu0 %v1287_v9  ;;  %6075 = vmatpush3.msra.mxu1 %v809_v40  ;;  %9206 = vst [vmem:[#allocation51_spill] sm:$0xff] %v7924_v51  ;;  %9207 = vst [vmem:[#allocation52_spill] sm:$0xff] %v7926_v52 }
 0x113   : > { %9205 = vst [vmem:[#allocation50_spill] sm:$0xff] %v7883_v8  ;;  %1277 = vst [vmem:[%s7873_s25] sm:$0xff] %v7881_v7  ;;  %1438 = vadd.xlane.f32.xlu1 %v7881_v7  ;;  %6076 = vmatprep.subr.mxu1 %v808_v42  ;;  %v7930_v54 = vld [vmem:[#allocation17 + $0x18] sm:$0xff]  ;;  %v7932_v55 = vld [vmem:[#allocation17 + $0x20] sm:$0xff] }
 0x114   : > { %1278 = vst [vmem:[%s7873_s25 + $0x8] sm:$0xff] %v7883_v8  ;;  %6077 = vmatpush3.msra.mxu1 %v808_v42  ;;  %1368 = vmatpush1.msra.mxu0 %v791_v48  ;;  %v7934_v56 = vld [vmem:[#allocation17 + $0x28] sm:$0xff]  ;;  %v7936_v57 = vld [vmem:[#allocation17 + $0x30] sm:$0xff]  ;;  %v7938_v58 = vld [vmem:[#allocation17 + $0x38] sm:$0xff]  ;;  %s3174_s21 = sadd.s32 1, %s9403_s17 }
 0x115   : > { %6078 = vmatprep.subr.mxu1 %v807_v43  ;;  %1369 = vmatprep.subr.mxu0 %v790_v50  ;;  %v7940_v59 = vld [vmem:[#allocation17 + $0x40] sm:$0xff]  ;;  %v7942_v60 = vld [vmem:[#allocation17 + $0x48] sm:$0xff]  ;;  %v7944_v61 = vld [vmem:[#allocation17 + $0x50] sm:$0xff]  ;;  %p5612_p0 = scmp.ge.s32.totalorder %s3174_s21, 3 }
 0x116   : > { %1440 = vadd.xlane.f32.xlu0 %v7883_v8  ;;  %6079 = vmatpush3.msra.mxu1 %v807_v43  ;;  %v7946_v62 = vld [vmem:[#allocation17 + $0x58] sm:$0xff]  ;;  %v7948_v63 = vld [vmem:[#allocation17 + $0x60] sm:$0xff]  ;;  %v7950_v0 = vld [vmem:[#allocation17 + $0x68] sm:$0xff]  ;;  %s9450_s27 = sld [smem:[#allocation43_spill]] (!%p5612_p0)  ;;  %s7490_s26 = smov (!%p5612_p0), 96  }
 0x117   : > { %1294 = vadd.xlane.f32.xlu1 %v1293_v11  ;;  %6080 = vmatprep.subr.mxu1 %v806_v46  ;;  %v7952_v1 = vld [vmem:[#allocation17 + $0x70] sm:$0xff]  ;;  %v7962_v6 = vld [vmem:[#allocation18 + $0x18] sm:$0xff]  ;;  %v7964_v9 = vld [vmem:[#allocation18 + $0x20] sm:$0xff]  ;;  %s7491_s16 = smov (!%p5612_p0), 64   ;;  %s7492_s1 = smov (!%p5612_p0), 32  }
 0x118   : > { %6081 = vmatpush3.msra.mxu1 %v806_v46  ;;  %v7960_v5 = vld [vmem:[#allocation18 + $0x10] sm:$0xff]  ;;  %v7970_v12 = vld [vmem:[#allocation18 + $0x38] sm:$0xff]  ;;  %v8013_v40 = vld [vmem:[#allocation20 + $0x60] sm:$0xff] }
 0x119   : > { %6082 = vmatprep.subr.mxu1 %v805_v49  ;;  %v7968_v11 = vld [vmem:[#allocation18 + $0x30] sm:$0xff]  ;;  %9222 = vst [vmem:[#allocation67_spill] sm:$0xff] %v8013_v40  ;;  %v8019_v43 = vld [vmem:[#allocation20 + $0x78] sm:$0xff]  ;;  %v8021_v44 = vld [vmem:[#allocation20 + $0x80] sm:$0xff] }
 0x11a   : > { %6083 = vmatpush3.msra.mxu1 %v805_v49  ;;  %v8017_v42 = vld [vmem:[#allocation20 + $0x70] sm:$0xff]  ;;  %9225 = vst [vmem:[#allocation70_spill] sm:$0xff] %v8019_v43  ;;  %9226 = vst [vmem:[#allocation71_spill] sm:$0xff] %v8021_v44  ;;  %v8023_v45 = vld [vmem:[#allocation20 + $0x88] sm:$0xff] }
 0x11b   : > { %9224 = vst [vmem:[#allocation69_spill] sm:$0xff] %v8017_v42  ;;  %9227 = vst [vmem:[#allocation72_spill] sm:$0xff] %v8023_v45  ;;  %v8025_v46 = vld [vmem:[#allocation20 + $0x90] sm:$0xff]  ;;  %v8027_v47 = vld [vmem:[#allocation20 + $0x98] sm:$0xff] }
 0x11c   : > { %9228 = vst [vmem:[#allocation73_spill] sm:$0xff] %v8025_v46  ;;  %9229 = vst [vmem:[#allocation74_spill] sm:$0xff] %v8027_v47  ;;  %v8029_v48 = vld [vmem:[#allocation20 + $0xa0] sm:$0xff]  ;;  %v8031_v49 = vld [vmem:[#allocation20 + $0xa8] sm:$0xff]  ;;  %p3179_p2 = scmp.gt.s32.totalorder (!%p5612_p0), %s9450_s27, 0 }
 0x11d   : > { %9230 = vst [vmem:[#allocation75_spill] sm:$0xff] %v8029_v48  ;;  %9231 = vst [vmem:[#allocation76_spill] sm:$0xff] %v8031_v49  ;;  %v8033_v50 = vld [vmem:[#allocation20 + $0xb0] sm:$0xff]  ;;  %v8045_v42 = vld [vmem:[#allocation20 + $0xe0] sm:$0xff] }
 0x11e   : > { %9232 = vst [vmem:[#allocation77_spill] sm:$0xff] %v8033_v50  ;;  %9238 = vst [vmem:[#allocation83_spill] sm:$0xff] %v8045_v42  ;;  %v8047_v45 = vld [vmem:[#allocation20 + $0xe8] sm:$0xff]  ;;  %v8051_v48 = vld [vmem:[#allocation20 + $0xf8] sm:$0xff] }
 0x11f   : > { %9239 = vst [vmem:[#allocation84_spill] sm:$0xff] %v8047_v45  ;;  %9241 = vst [vmem:[#allocation86_spill] sm:$0xff] %v8051_v48  ;;  %v8069_v45 = vld [vmem:[#allocation20 + $0x140] sm:$0xff]  ;;  %v8073_v40 = vld [vmem:[#allocation20 + $0x150] sm:$0xff] }
 0x120   : > { %9250 = vst [vmem:[#allocation95_spill] sm:$0xff] %v8069_v45  ;;  %9252 = vst [vmem:[#allocation97_spill] sm:$0xff] %v8073_v40  ;;  %v8079_v43 = vld [vmem:[#allocation20 + $0x168] sm:$0xff]  ;;  %v8083_v44 = vld [vmem:[#allocation20 + $0x178] sm:$0xff] }
 0x121   : > { %9255 = vst [vmem:[#allocation100_spill] sm:$0xff] %v8079_v43  ;;  %9257 = vst [vmem:[#allocation102_spill] sm:$0xff] %v8083_v44  ;;  %v8085_v46 = vld [vmem:[#allocation21] sm:$0xff]  ;;  %v8089_v47 = vld [vmem:[#allocation21 + $0x10] sm:$0xff] }
 0x122   : > { %9258 = vst [vmem:[#allocation103_spill] sm:$0xff] %v8085_v46  ;;  %9260 = vst [vmem:[#allocation105_spill] sm:$0xff] %v8089_v47  ;;  %v8091_v49 = vld [vmem:[#allocation21 + $0x18] sm:$0xff]  ;;  %v8095_v50 = vld [vmem:[#allocation21 + $0x28] sm:$0xff] }
 0x123   : > { %9261 = vst [vmem:[#allocation106_spill] sm:$0xff] %v8091_v49  ;;  %9263 = vst [vmem:[#allocation108_spill] sm:$0xff] %v8095_v50  ;;  %v8105_v42 = vld [vmem:[#allocation21 + $0x50] sm:$0xff]  ;;  %v8107_v46 = vld [vmem:[#allocation21 + $0x58] sm:$0xff] }
 0x124   : > { %9268 = vst [vmem:[#allocation113_spill] sm:$0xff] %v8105_v42  ;;  %9269 = vst [vmem:[#allocation114_spill] sm:$0xff] %v8107_v46  ;;  %v8111_v47 = vld [vmem:[#allocation21 + $0x68] sm:$0xff]  ;;  %v8113_v49 = vld [vmem:[#allocation21 + $0x70] sm:$0xff] }
 0x125   : > { %9271 = vst [vmem:[#allocation116_spill] sm:$0xff] %v8111_v47  ;;  %9272 = vst [vmem:[#allocation117_spill] sm:$0xff] %v8113_v49  ;;  %v8117_v50 = vld [vmem:[#allocation23] sm:$0xff]  ;;  %v8127_v42 = vld [vmem:[#allocation23 + $0x28] sm:$0xff] }
 0x126   : > { %9274 = vst [vmem:[#allocation119_spill] sm:$0xff] %v8117_v50  ;;  %9279 = vst [vmem:[#allocation124_spill] sm:$0xff] %v8127_v42  ;;  %v8129_v46 = vld [vmem:[#allocation23 + $0x30] sm:$0xff]  ;;  %v8133_v47 = vld [vmem:[#allocation23 + $0x40] sm:$0xff] }
 0x127   : > { %9280 = vst [vmem:[#allocation125_spill] sm:$0xff] %v8129_v46  ;;  %9282 = vst [vmem:[#allocation127_spill] sm:$0xff] %v8133_v47  ;;  %v8135_v49 = vld [vmem:[#allocation23 + $0x48] sm:$0xff]  ;;  %v8139_v50 = vld [vmem:[#allocation23 + $0x58] sm:$0xff] }
 0x128   : > { %9283 = vst [vmem:[#allocation128_spill] sm:$0xff] %v8135_v49  ;;  %9285 = vst [vmem:[#allocation130_spill] sm:$0xff] %v8139_v50  ;;  %v8149_v42 = vld [vmem:[#allocation23 + $0x80] sm:$0xff]  ;;  %v8151_v46 = vld [vmem:[#allocation23 + $0x88] sm:$0xff] }
 0x129   : > { %9290 = vst [vmem:[#allocation135_spill] sm:$0xff] %v8149_v42  ;;  %9291 = vst [vmem:[#allocation136_spill] sm:$0xff] %v8151_v46  ;;  %v8155_v47 = vld [vmem:[#allocation23 + $0x98] sm:$0xff]  ;;  %v8157_v49 = vld [vmem:[#allocation23 + $0xa0] sm:$0xff] }
 0x12a   : > { %9293 = vst [vmem:[#allocation138_spill] sm:$0xff] %v8155_v47  ;;  %9294 = vst [vmem:[#allocation139_spill] sm:$0xff] %v8157_v49  ;;  %v8161_v50 = vld [vmem:[#allocation23 + $0xb0] sm:$0xff]  ;;  %v8171_v42 = vld [vmem:[#allocation23 + $0xd8] sm:$0xff] }
 0x12b   : > { %9296 = vst [vmem:[#allocation141_spill] sm:$0xff] %v8161_v50  ;;  %9301 = vst [vmem:[#allocation146_spill] sm:$0xff] %v8171_v42  ;;  %v8173_v46 = vld [vmem:[#allocation23 + $0xe0] sm:$0xff]  ;;  %v8177_v47 = vld [vmem:[#allocation23 + $0xf0] sm:$0xff] }
 0x12c   : > { %9302 = vst [vmem:[#allocation147_spill] sm:$0xff] %v8173_v46  ;;  %9304 = vst [vmem:[#allocation149_spill] sm:$0xff] %v8177_v47  ;;  %v8179_v49 = vld [vmem:[#allocation23 + $0xf8] sm:$0xff]  ;;  %v8183_v50 = vld [vmem:[#allocation23 + $0x108] sm:$0xff] }
 0x12d   : > { %9305 = vst [vmem:[#allocation150_spill] sm:$0xff] %v8179_v49  ;;  %9307 = vst [vmem:[#allocation152_spill] sm:$0xff] %v8183_v50  ;;  %v8193_v42 = vld [vmem:[#allocation23 + $0x130] sm:$0xff]  ;;  %v8195_v46 = vld [vmem:[#allocation23 + $0x138] sm:$0xff] }
 0x12e   : > { %9312 = vst [vmem:[#allocation157_spill] sm:$0xff] %v8193_v42  ;;  %9313 = vst [vmem:[#allocation158_spill] sm:$0xff] %v8195_v46  ;;  %v8199_v47 = vld [vmem:[#allocation23 + $0x148] sm:$0xff]  ;;  %v8201_v49 = vld [vmem:[#allocation23 + $0x150] sm:$0xff] }
 0x12f   : > { %9315 = vst [vmem:[#allocation160_spill] sm:$0xff] %v8199_v47  ;;  %9316 = vst [vmem:[#allocation161_spill] sm:$0xff] %v8201_v49  ;;  %v8205_v50 = vld [vmem:[#allocation23 + $0x160] sm:$0xff]  ;;  %v8215_v42 = vld [vmem:[#allocation23 + $0x188] sm:$0xff] }
 0x130   : > { %9318 = vst [vmem:[#allocation163_spill] sm:$0xff] %v8205_v50  ;;  %9323 = vst [vmem:[#allocation168_spill] sm:$0xff] %v8215_v42  ;;  %v8217_v46 = vld [vmem:[#allocation23 + $0x190] sm:$0xff]  ;;  %v8221_v47 = vld [vmem:[#allocation23 + $0x1a0] sm:$0xff] }
 0x131   : > { %9324 = vst [vmem:[#allocation169_spill] sm:$0xff] %v8217_v46  ;;  %9326 = vst [vmem:[#allocation171_spill] sm:$0xff] %v8221_v47  ;;  %v8223_v49 = vld [vmem:[#allocation23 + $0x1a8] sm:$0xff]  ;;  %v8227_v50 = vld [vmem:[#allocation23 + $0x1b8] sm:$0xff] }
 0x132   : > { %9327 = vst [vmem:[#allocation172_spill] sm:$0xff] %v8223_v49  ;;  %9329 = vst [vmem:[#allocation174_spill] sm:$0xff] %v8227_v50  ;;  %v8237_v42 = vld [vmem:[#allocation23 + $0x1e0] sm:$0xff]  ;;  %v8239_v46 = vld [vmem:[#allocation23 + $0x1e8] sm:$0xff] }
 0x133   : > { %9334 = vst [vmem:[#allocation179_spill] sm:$0xff] %v8237_v42  ;;  %9335 = vst [vmem:[#allocation180_spill] sm:$0xff] %v8239_v46  ;;  %v8243_v47 = vld [vmem:[#allocation23 + $0x1f8] sm:$0xff]  ;;  %v8245_v49 = vld [vmem:[#allocation24] sm:$0xff] }
 0x134   : > { %9337 = vst [vmem:[#allocation182_spill] sm:$0xff] %v8243_v47  ;;  %9338 = vst [vmem:[#allocation183_spill] sm:$0xff] %v8245_v49  ;;  %v8249_v50 = vld [vmem:[#allocation24 + $0x10] sm:$0xff]  ;;  %v8259_v42 = vld [vmem:[#allocation24 + $0x38] sm:$0xff] }
 0x135   : > { %9340 = vst [vmem:[#allocation185_spill] sm:$0xff] %v8249_v50  ;;  %9345 = vst [vmem:[#allocation190_spill] sm:$0xff] %v8259_v42  ;;  %v8261_v46 = vld [vmem:[#allocation24 + $0x40] sm:$0xff]  ;;  %v8265_v47 = vld [vmem:[#allocation24 + $0x50] sm:$0xff] }
 0x136   : > { %9346 = vst [vmem:[#allocation191_spill] sm:$0xff] %v8261_v46  ;;  %9348 = vst [vmem:[#allocation193_spill] sm:$0xff] %v8265_v47  ;;  %v8267_v49 = vld [vmem:[#allocation24 + $0x58] sm:$0xff]  ;;  %v8271_v50 = vld [vmem:[#allocation24 + $0x68] sm:$0xff] }
 0x137   : > { %9349 = vst [vmem:[#allocation194_spill] sm:$0xff] %v8267_v49  ;;  %9351 = vst [vmem:[#allocation196_spill] sm:$0xff] %v8271_v50  ;;  %v8281_v42 = vld [vmem:[#allocation24 + $0x90] sm:$0xff]  ;;  %v8283_v46 = vld [vmem:[#allocation24 + $0x98] sm:$0xff] }
 0x138   : > { %9356 = vst [vmem:[#allocation201_spill] sm:$0xff] %v8281_v42  ;;  %9357 = vst [vmem:[#allocation202_spill] sm:$0xff] %v8283_v46  ;;  %v8287_v47 = vld [vmem:[#allocation24 + $0xa8] sm:$0xff]  ;;  %v8289_v49 = vld [vmem:[#allocation24 + $0xb0] sm:$0xff] }
 0x139   : > { %9359 = vst [vmem:[#allocation204_spill] sm:$0xff] %v8287_v47  ;;  %9360 = vst [vmem:[#allocation205_spill] sm:$0xff] %v8289_v49  ;;  %v8293_v50 = vld [vmem:[#allocation24 + $0xc0] sm:$0xff]  ;;  %v8303_v42 = vld [vmem:[#allocation24 + $0xe8] sm:$0xff] }
 0x13a   : > { %9362 = vst [vmem:[#allocation207_spill] sm:$0xff] %v8293_v50  ;;  %9367 = vst [vmem:[#allocation212_spill] sm:$0xff] %v8303_v42  ;;  %v8305_v46 = vld [vmem:[#allocation24 + $0xf0] sm:$0xff]  ;;  %v8309_v47 = vld [vmem:[#allocation24 + $0x100] sm:$0xff] }
 0x13b   : > { %9368 = vst [vmem:[#allocation213_spill] sm:$0xff] %v8305_v46  ;;  %9370 = vst [vmem:[#allocation215_spill] sm:$0xff] %v8309_v47  ;;  %v8311_v49 = vld [vmem:[#allocation24 + $0x108] sm:$0xff]  ;;  %v8315_v50 = vld [vmem:[#allocation24 + $0x118] sm:$0xff] }
 0x13c   : > { %9371 = vst [vmem:[#allocation216_spill] sm:$0xff] %v8311_v49  ;;  %9373 = vst [vmem:[#allocation218_spill] sm:$0xff] %v8315_v50  ;;  %v8325_v42 = vld [vmem:[#allocation24 + $0x140] sm:$0xff]  ;;  %v8327_v46 = vld [vmem:[#allocation24 + $0x148] sm:$0xff] }
 0x13d   : > { %9378 = vst [vmem:[#allocation223_spill] sm:$0xff] %v8325_v42  ;;  %9379 = vst [vmem:[#allocation224_spill] sm:$0xff] %v8327_v46  ;;  %v8331_v47 = vld [vmem:[#allocation24 + $0x158] sm:$0xff]  ;;  %v8333_v49 = vld [vmem:[#allocation24 + $0x160] sm:$0xff] }
 0x13e   : > { %9381 = vst [vmem:[#allocation226_spill] sm:$0xff] %v8331_v47  ;;  %9382 = vst [vmem:[#allocation227_spill] sm:$0xff] %v8333_v49  ;;  %v8337_v50 = vld [vmem:[#allocation24 + $0x170] sm:$0xff]  ;;  %v8347_v42 = vld [vmem:[#allocation24 + $0x198] sm:$0xff] }
 0x13f   : > { %9384 = vst [vmem:[#allocation229_spill] sm:$0xff] %v8337_v50  ;;  %9389 = vst [vmem:[#allocation234_spill] sm:$0xff] %v8347_v42  ;;  %v8349_v46 = vld [vmem:[#allocation24 + $0x1a0] sm:$0xff]  ;;  %v8353_v47 = vld [vmem:[#allocation24 + $0x1b0] sm:$0xff] }
 0x140   : > { %9390 = vst [vmem:[#allocation235_spill] sm:$0xff] %v8349_v46  ;;  %9392 = vst [vmem:[#allocation237_spill] sm:$0xff] %v8353_v47  ;;  %v8355_v49 = vld [vmem:[#allocation24 + $0x1b8] sm:$0xff]  ;;  %v8359_v50 = vld [vmem:[#allocation24 + $0x1c8] sm:$0xff] }
 0x141   : > { %9393 = vst [vmem:[#allocation238_spill] sm:$0xff] %v8355_v49  ;;  %9395 = vst [vmem:[#allocation240_spill] sm:$0xff] %v8359_v50  ;;  %v8369_v42 = vld [vmem:[#allocation24 + $0x1f0] sm:$0xff]  ;;  %v8371_v46 = vld [vmem:[#allocation24 + $0x1f8] sm:$0xff] }
 0x142   : > { %9400 = vst [vmem:[#allocation245_spill] sm:$0xff] %v8369_v42  ;;  %9401 = vst [vmem:[#allocation246_spill] sm:$0xff] %v8371_v46  ;;  %v804_v47 = vld [vmem:[#allocation9 + $0x48] sm:$0xff]  ;;  %v786_v50 = vld [vmem:[#allocation8 + $0x38] sm:$0xff] }
 0x143   : > { %v788_v49 = vld [vmem:[#allocation8 + $0x48] sm:$0xff]  ;;  %6084 = vmatprep.subr.mxu1 %v804_v47  ;;  %v801_v42 = vld [vmem:[#allocation9 + $0x30] sm:$0xff]  ;;  %v782_v46 = vld [vmem:[#allocation8 + $0x18] sm:$0xff] }
 0x144   : > { %6085 = vmatpush3.msra.mxu1 %v804_v47  ;;  %v780_v48 = vld [vmem:[#allocation8 + $0x8] sm:$0xff]  ;;  %v779_v47 = vld [vmem:[#allocation8] sm:$0xff] }
 0x197   : > { %v1286_v13 = vpop.xlane.xlu0 %1285  ;;  %v1292_v14 = vpop.xlane.xlu1 %1291 }
 0x198   : > { %v1297_v15 = vmul.f32 0.015625, %v1286_v13  ;;  %v1299_v16 = vmul.f32 0.015625, %v1292_v14  ;;  %v7972_v13 = vld [vmem:[#allocation18 + $0x40] sm:$0xff]  ;;  %v7974_v14 = vld [vmem:[#allocation18 + $0x48] sm:$0xff] }
 0x19a   : > { %v7894_v17 = vsub.f32 %v1279_v2, %v1297_v15  ;;  %v7896_v18 = vsub.f32 %v1281_v3, %v1299_v16  ;;  %v7954_v2 = vld [vmem:[#allocation17 + $0x78] sm:$0xff]  ;;  %v7956_v3 = vld [vmem:[#allocation18] sm:$0xff]  ;;  %v7976_v15 = vld [vmem:[#allocation18 + $0x50] sm:$0xff]  ;;  %v9123_v16 = vmov 0.0  }
 0x19b   : > { %v1289_v19 = vpop.xlane.xlu0 %1288  ;;  %9208 = vst [vmem:[#allocation53_spill] sm:$0xff] %v7956_v3  ;;  %1413 = vmatprep.mubr.f32.mxu0 %v9123_v16  ;;  %v8035_v16 = vld [vmem:[#allocation20 + $0xb8] sm:$0xff] }
 0x19c   : > { %v1439_v20 = vpop.xlane.xlu1 %1438  ;;  %v1298_v21 = vmul.f32 0.015625, %v1289_v19  ;;  %v1305_v22 = vmul.f32 %v7894_v17, %v7894_v17  ;;  %v1307_v24 = vmul.f32 %v7896_v18, %v7896_v18  ;;  %v7979_v19 = vld [vmem:[#allocation18 + $0x58] sm:$0xff]  ;;  %9233 = vst [vmem:[#allocation78_spill] sm:$0xff] %v8035_v16  ;;  %v8057_v16 = vld [vmem:[#allocation20 + $0x110] sm:$0xff] }
 0x19d   : > { %v1443_v23 = vmul.f32 0.0078125, %v1439_v20  ;;  %v7981_v20 = vld [vmem:[#allocation18 + $0x60] sm:$0xff]  ;;  %9244 = vst [vmem:[#allocation89_spill] sm:$0xff] %v8057_v16 }
 0x19e   : > { %v7902_v25 = vsub.f32 %v1280_v4, %v1298_v21  ;;  %v1309_v26 = vsel %vm1283_vm0, %v1305_v22, 0.0  ;;  %v1315_v31 = vsel %vm1283_vm0, %v1307_v24, 0.0  ;;  %v7958_v4 = vld [vmem:[#allocation18 + $0x8] sm:$0xff]  ;;  %v7985_v22 = vld [vmem:[#allocation18 + $0x70] sm:$0xff]  ;;  %v7989_v24 = vld [vmem:[#allocation20] sm:$0xff] }
 0x19f   : > { %1310 = vadd.xlane.f32.xlu0 %v1309_v26  ;;  %v7906_v27 = vsub.f32 %v7881_v7, %v1443_v23  ;;  %v1441_v28 = vpop.xlane.xlu0 %1440  ;;  %9209 = vst [vmem:[#allocation54_spill] sm:$0xff] %v7958_v4  ;;  %v7983_v21 = vld [vmem:[#allocation18 + $0x68] sm:$0xff]  ;;  %v7987_v23 = vld [vmem:[#allocation18 + $0x78] sm:$0xff]  ;;  %9210 = vst [vmem:[#allocation55_spill] sm:$0xff] %v7989_v24 }
 0x1a0   : > { %v1295_v29 = vpop.xlane.xlu1 %1294  ;;  %v1444_v30 = vmul.f32 0.0078125, %v1441_v28  ;;  %v1306_v32 = vmul.f32 %v7902_v25, %v7902_v25  ;;  %v7991_v26 = vld [vmem:[#allocation20 + $0x8] sm:$0xff]  ;;  %v7993_v28 = vld [vmem:[#allocation20 + $0x10] sm:$0xff] }
 0x1a1   : > { %v1300_v33 = vmul.f32 0.015625, %v1295_v29  ;;  %v1447_v37 = vmul.f32 %v7906_v27, %v7906_v27  ;;  %9211 = vst [vmem:[#allocation56_spill] sm:$0xff] %v7991_v26  ;;  %9212 = vst [vmem:[#allocation57_spill] sm:$0xff] %v7993_v28  ;;  %v7995_v29 = vld [vmem:[#allocation20 + $0x18] sm:$0xff]  ;;  %v8037_v28 = vld [vmem:[#allocation20 + $0xc0] sm:$0xff] }
 0x1a2   : > { %v7912_v34 = vsub.f32 %v7883_v8, %v1444_v30  ;;  %v1312_v35 = vsel %vm1283_vm0, %v1306_v32, 0.0  ;;  %9213 = vst [vmem:[#allocation58_spill] sm:$0xff] %v7995_v29  ;;  %v7997_v30 = vld [vmem:[#allocation20 + $0x20] sm:$0xff]  ;;  %v8001_v32 = vld [vmem:[#allocation20 + $0x30] sm:$0xff]  ;;  %9234 = vst [vmem:[#allocation79_spill] sm:$0xff] %v8037_v28 }
 0x1a3   : > { %v7915_v36 = vsub.f32 %v1282_v10, %v1300_v33  ;;  %1316 = vadd.xlane.f32.xlu0 %v1315_v31  ;;  %1313 = vadd.xlane.f32.xlu1 %v1312_v35  ;;  %v7966_v10 = vld [vmem:[#allocation18 + $0x28] sm:$0xff]  ;;  %9214 = vst [vmem:[#allocation59_spill] sm:$0xff] %v7997_v30  ;;  %9216 = vst [vmem:[#allocation61_spill] sm:$0xff] %v8001_v32  ;;  %v8003_v33 = vld [vmem:[#allocation20 + $0x38] sm:$0xff] }
 0x1a4   : > { %v1448_v38 = vmul.f32 %v7912_v34, %v7912_v34  ;;  %v7999_v31 = vld [vmem:[#allocation20 + $0x28] sm:$0xff]  ;;  %9217 = vst [vmem:[#allocation62_spill] sm:$0xff] %v8003_v33  ;;  %v8005_v35 = vld [vmem:[#allocation20 + $0x40] sm:$0xff]  ;;  %v8049_v24 = vld [vmem:[#allocation20 + $0xf0] sm:$0xff] }
 0x1a5   : > { %v1308_v39 = vmul.f32 %v7915_v36, %v7915_v36  ;;  %9215 = vst [vmem:[#allocation60_spill] sm:$0xff] %v7999_v31  ;;  %9218 = vst [vmem:[#allocation63_spill] sm:$0xff] %v8005_v35  ;;  %v8039_v31 = vld [vmem:[#allocation20 + $0xc8] sm:$0xff]  ;;  %v8041_v35 = vld [vmem:[#allocation20 + $0xd0] sm:$0xff] }
 0x1a6   : > { %9235 = vst [vmem:[#allocation80_spill] sm:$0xff] %v8039_v31  ;;  %9236 = vst [vmem:[#allocation81_spill] sm:$0xff] %v8041_v35  ;;  %v8053_v26 = vld [vmem:[#allocation20 + $0x100] sm:$0xff]  ;;  %v8055_v29 = vld [vmem:[#allocation20 + $0x108] sm:$0xff] }
 0x1a7   : > { %1451 = vadd.xlane.f32.xlu0 %v1448_v38  ;;  %1449 = vadd.xlane.f32.xlu1 %v1447_v37  ;;  %v1318_v41 = vsel %vm1283_vm0, %v1308_v39, 0.0  ;;  %v8007_v37 = vld [vmem:[#allocation20 + $0x48] sm:$0xff]  ;;  %v8009_v38 = vld [vmem:[#allocation20 + $0x50] sm:$0xff]  ;;  %v8011_v39 = vld [vmem:[#allocation20 + $0x58] sm:$0xff]  ;;  %9240 = vst [vmem:[#allocation85_spill] sm:$0xff] %v8049_v24 }
 0x1a8   : > { %9219 = vst [vmem:[#allocation64_spill] sm:$0xff] %v8007_v37  ;;  %9220 = vst [vmem:[#allocation65_spill] sm:$0xff] %v8009_v38  ;;  %v8059_v30 = vld [vmem:[#allocation20 + $0x118] sm:$0xff]  ;;  %v8061_v32 = vld [vmem:[#allocation20 + $0x120] sm:$0xff] }
 0x1a9   : > { %9221 = vst [vmem:[#allocation66_spill] sm:$0xff] %v8011_v39  ;;  %v8043_v39 = vld [vmem:[#allocation20 + $0xd8] sm:$0xff]  ;;  %9242 = vst [vmem:[#allocation87_spill] sm:$0xff] %v8053_v26  ;;  %v8063_v35 = vld [vmem:[#allocation20 + $0x128] sm:$0xff] }
 0x1aa   : > { %9237 = vst [vmem:[#allocation82_spill] sm:$0xff] %v8043_v39  ;;  %9243 = vst [vmem:[#allocation88_spill] sm:$0xff] %v8055_v29  ;;  %v8065_v33 = vld [vmem:[#allocation20 + $0x130] sm:$0xff]  ;;  %v8067_v37 = vld [vmem:[#allocation20 + $0x138] sm:$0xff] }
 0x1ab   : > { %1319 = vadd.xlane.f32.xlu1 %v1318_v41  ;;  %v8015_v41 = vld [vmem:[#allocation20 + $0x68] sm:$0xff]  ;;  %9245 = vst [vmem:[#allocation90_spill] sm:$0xff] %v8059_v30  ;;  %9246 = vst [vmem:[#allocation91_spill] sm:$0xff] %v8061_v32  ;;  %v8075_v26 = vld [vmem:[#allocation20 + $0x158] sm:$0xff] }
 0x1ac   : > { %9223 = vst [vmem:[#allocation68_spill] sm:$0xff] %v8015_v41  ;;  %9247 = vst [vmem:[#allocation92_spill] sm:$0xff] %v8063_v35  ;;  %v8071_v38 = vld [vmem:[#allocation20 + $0x148] sm:$0xff]  ;;  %v8077_v41 = vld [vmem:[#allocation20 + $0x160] sm:$0xff] }
 0x1ad   : > { %9248 = vst [vmem:[#allocation93_spill] sm:$0xff] %v8065_v33  ;;  %9249 = vst [vmem:[#allocation94_spill] sm:$0xff] %v8067_v37  ;;  %v8081_v30 = vld [vmem:[#allocation20 + $0x170] sm:$0xff]  ;;  %v8087_v33 = vld [vmem:[#allocation21 + $0x8] sm:$0xff] }
 0x1ae   : > { %9251 = vst [vmem:[#allocation96_spill] sm:$0xff] %v8071_v38  ;;  %9253 = vst [vmem:[#allocation98_spill] sm:$0xff] %v8075_v26  ;;  %v8093_v38 = vld [vmem:[#allocation21 + $0x20] sm:$0xff]  ;;  %v8097_v28 = vld [vmem:[#allocation21 + $0x30] sm:$0xff] }
 0x1af   : > { %9254 = vst [vmem:[#allocation99_spill] sm:$0xff] %v8077_v41  ;;  %9256 = vst [vmem:[#allocation101_spill] sm:$0xff] %v8081_v30  ;;  %v8099_v41 = vld [vmem:[#allocation21 + $0x38] sm:$0xff]  ;;  %v8101_v31 = vld [vmem:[#allocation21 + $0x40] sm:$0xff] }
 0x1b0   : > { %9259 = vst [vmem:[#allocation104_spill] sm:$0xff] %v8087_v33  ;;  %9262 = vst [vmem:[#allocation107_spill] sm:$0xff] %v8093_v38  ;;  %v8103_v39 = vld [vmem:[#allocation21 + $0x48] sm:$0xff]  ;;  %v8109_v33 = vld [vmem:[#allocation21 + $0x60] sm:$0xff] }
 0x1b1   : > { %9264 = vst [vmem:[#allocation109_spill] sm:$0xff] %v8097_v28  ;;  %9265 = vst [vmem:[#allocation110_spill] sm:$0xff] %v8099_v41  ;;  %v8115_v38 = vld [vmem:[#allocation21 + $0x78] sm:$0xff]  ;;  %v8119_v28 = vld [vmem:[#allocation23 + $0x8] sm:$0xff] }
 0x1b2   : > { %9266 = vst [vmem:[#allocation111_spill] sm:$0xff] %v8101_v31  ;;  %9267 = vst [vmem:[#allocation112_spill] sm:$0xff] %v8103_v39  ;;  %v8121_v41 = vld [vmem:[#allocation23 + $0x10] sm:$0xff]  ;;  %v8123_v31 = vld [vmem:[#allocation23 + $0x18] sm:$0xff] }
 0x1b3   : > { %9270 = vst [vmem:[#allocation115_spill] sm:$0xff] %v8109_v33  ;;  %9273 = vst [vmem:[#allocation118_spill] sm:$0xff] %v8115_v38  ;;  %v8125_v39 = vld [vmem:[#allocation23 + $0x20] sm:$0xff]  ;;  %v8131_v33 = vld [vmem:[#allocation23 + $0x38] sm:$0xff] }
 0x1b4   : > { %9275 = vst [vmem:[#allocation120_spill] sm:$0xff] %v8119_v28  ;;  %9276 = vst [vmem:[#allocation121_spill] sm:$0xff] %v8121_v41  ;;  %v8137_v38 = vld [vmem:[#allocation23 + $0x50] sm:$0xff]  ;;  %v8141_v28 = vld [vmem:[#allocation23 + $0x60] sm:$0xff] }
 0x1b5   : > { %9277 = vst [vmem:[#allocation122_spill] sm:$0xff] %v8123_v31  ;;  %9278 = vst [vmem:[#allocation123_spill] sm:$0xff] %v8125_v39  ;;  %v8143_v41 = vld [vmem:[#allocation23 + $0x68] sm:$0xff]  ;;  %v8145_v31 = vld [vmem:[#allocation23 + $0x70] sm:$0xff] }
 0x1b6   : > { %9281 = vst [vmem:[#allocation126_spill] sm:$0xff] %v8131_v33  ;;  %9284 = vst [vmem:[#allocation129_spill] sm:$0xff] %v8137_v38  ;;  %v8147_v39 = vld [vmem:[#allocation23 + $0x78] sm:$0xff]  ;;  %v8153_v33 = vld [vmem:[#allocation23 + $0x90] sm:$0xff] }
 0x1b7   : > { %9286 = vst [vmem:[#allocation131_spill] sm:$0xff] %v8141_v28  ;;  %9287 = vst [vmem:[#allocation132_spill] sm:$0xff] %v8143_v41  ;;  %v8159_v38 = vld [vmem:[#allocation23 + $0xa8] sm:$0xff]  ;;  %v8163_v28 = vld [vmem:[#allocation23 + $0xb8] sm:$0xff] }
 0x1b8   : > { %9288 = vst [vmem:[#allocation133_spill] sm:$0xff] %v8145_v31  ;;  %9289 = vst [vmem:[#allocation134_spill] sm:$0xff] %v8147_v39  ;;  %v8165_v41 = vld [vmem:[#allocation23 + $0xc0] sm:$0xff]  ;;  %v8167_v31 = vld [vmem:[#allocation23 + $0xc8] sm:$0xff] }
 0x1b9   : > { %9292 = vst [vmem:[#allocation137_spill] sm:$0xff] %v8153_v33  ;;  %9295 = vst [vmem:[#allocation140_spill] sm:$0xff] %v8159_v38  ;;  %v8169_v39 = vld [vmem:[#allocation23 + $0xd0] sm:$0xff]  ;;  %v8175_v33 = vld [vmem:[#allocation23 + $0xe8] sm:$0xff] }
 0x1ba   : > { %9297 = vst [vmem:[#allocation142_spill] sm:$0xff] %v8163_v28  ;;  %9298 = vst [vmem:[#allocation143_spill] sm:$0xff] %v8165_v41  ;;  %v8181_v38 = vld [vmem:[#allocation23 + $0x100] sm:$0xff]  ;;  %v8185_v28 = vld [vmem:[#allocation23 + $0x110] sm:$0xff] }
 0x1bb   : > { %9299 = vst [vmem:[#allocation144_spill] sm:$0xff] %v8167_v31  ;;  %9300 = vst [vmem:[#allocation145_spill] sm:$0xff] %v8169_v39  ;;  %v8187_v41 = vld [vmem:[#allocation23 + $0x118] sm:$0xff]  ;;  %v8189_v31 = vld [vmem:[#allocation23 + $0x120] sm:$0xff] }
 0x1bc   : > { %9303 = vst [vmem:[#allocation148_spill] sm:$0xff] %v8175_v33  ;;  %9306 = vst [vmem:[#allocation151_spill] sm:$0xff] %v8181_v38  ;;  %v8191_v39 = vld [vmem:[#allocation23 + $0x128] sm:$0xff]  ;;  %v8197_v33 = vld [vmem:[#allocation23 + $0x140] sm:$0xff] }
 0x1bd   : > { %9308 = vst [vmem:[#allocation153_spill] sm:$0xff] %v8185_v28  ;;  %9309 = vst [vmem:[#allocation154_spill] sm:$0xff] %v8187_v41  ;;  %v8203_v38 = vld [vmem:[#allocation23 + $0x158] sm:$0xff]  ;;  %v8207_v28 = vld [vmem:[#allocation23 + $0x168] sm:$0xff] }
 0x1be   : > { %9310 = vst [vmem:[#allocation155_spill] sm:$0xff] %v8189_v31  ;;  %9311 = vst [vmem:[#allocation156_spill] sm:$0xff] %v8191_v39  ;;  %v8209_v41 = vld [vmem:[#allocation23 + $0x170] sm:$0xff]  ;;  %v8211_v31 = vld [vmem:[#allocation23 + $0x178] sm:$0xff] }
 0x1bf   : > { %9314 = vst [vmem:[#allocation159_spill] sm:$0xff] %v8197_v33  ;;  %9317 = vst [vmem:[#allocation162_spill] sm:$0xff] %v8203_v38  ;;  %v8213_v39 = vld [vmem:[#allocation23 + $0x180] sm:$0xff]  ;;  %v8219_v33 = vld [vmem:[#allocation23 + $0x198] sm:$0xff] }
 0x1c0   : > { %9319 = vst [vmem:[#allocation164_spill] sm:$0xff] %v8207_v28  ;;  %9320 = vst [vmem:[#allocation165_spill] sm:$0xff] %v8209_v41  ;;  %v8225_v38 = vld [vmem:[#allocation23 + $0x1b0] sm:$0xff]  ;;  %v8229_v28 = vld [vmem:[#allocation23 + $0x1c0] sm:$0xff] }
 0x1c1   : > { %9321 = vst [vmem:[#allocation166_spill] sm:$0xff] %v8211_v31  ;;  %9322 = vst [vmem:[#allocation167_spill] sm:$0xff] %v8213_v39  ;;  %v8231_v41 = vld [vmem:[#allocation23 + $0x1c8] sm:$0xff]  ;;  %v8233_v31 = vld [vmem:[#allocation23 + $0x1d0] sm:$0xff] }
 0x1c2   : > { %9325 = vst [vmem:[#allocation170_spill] sm:$0xff] %v8219_v33  ;;  %9328 = vst [vmem:[#allocation173_spill] sm:$0xff] %v8225_v38  ;;  %v8235_v39 = vld [vmem:[#allocation23 + $0x1d8] sm:$0xff]  ;;  %v8241_v33 = vld [vmem:[#allocation23 + $0x1f0] sm:$0xff] }
 0x1c3   : > { %9330 = vst [vmem:[#allocation175_spill] sm:$0xff] %v8229_v28  ;;  %9331 = vst [vmem:[#allocation176_spill] sm:$0xff] %v8231_v41  ;;  %v8247_v38 = vld [vmem:[#allocation24 + $0x8] sm:$0xff]  ;;  %v8251_v28 = vld [vmem:[#allocation24 + $0x18] sm:$0xff] }
 0x1c4   : > { %9332 = vst [vmem:[#allocation177_spill] sm:$0xff] %v8233_v31  ;;  %9333 = vst [vmem:[#allocation178_spill] sm:$0xff] %v8235_v39  ;;  %v8253_v41 = vld [vmem:[#allocation24 + $0x20] sm:$0xff]  ;;  %v8255_v31 = vld [vmem:[#allocation24 + $0x28] sm:$0xff] }
 0x1c5   : > { %9336 = vst [vmem:[#allocation181_spill] sm:$0xff] %v8241_v33  ;;  %9339 = vst [vmem:[#allocation184_spill] sm:$0xff] %v8247_v38  ;;  %v8257_v39 = vld [vmem:[#allocation24 + $0x30] sm:$0xff]  ;;  %v8263_v33 = vld [vmem:[#allocation24 + $0x48] sm:$0xff] }
 0x1c6   : > { %9341 = vst [vmem:[#allocation186_spill] sm:$0xff] %v8251_v28  ;;  %9342 = vst [vmem:[#allocation187_spill] sm:$0xff] %v8253_v41  ;;  %v8269_v38 = vld [vmem:[#allocation24 + $0x60] sm:$0xff]  ;;  %v8273_v28 = vld [vmem:[#allocation24 + $0x70] sm:$0xff] }
 0x1c7   : > { %9343 = vst [vmem:[#allocation188_spill] sm:$0xff] %v8255_v31  ;;  %9344 = vst [vmem:[#allocation189_spill] sm:$0xff] %v8257_v39  ;;  %v8275_v41 = vld [vmem:[#allocation24 + $0x78] sm:$0xff]  ;;  %v8277_v31 = vld [vmem:[#allocation24 + $0x80] sm:$0xff] }
 0x1c8   : > { %9347 = vst [vmem:[#allocation192_spill] sm:$0xff] %v8263_v33  ;;  %9350 = vst [vmem:[#allocation195_spill] sm:$0xff] %v8269_v38  ;;  %v8279_v39 = vld [vmem:[#allocation24 + $0x88] sm:$0xff]  ;;  %v8285_v33 = vld [vmem:[#allocation24 + $0xa0] sm:$0xff] }
 0x1c9   : > { %9352 = vst [vmem:[#allocation197_spill] sm:$0xff] %v8273_v28  ;;  %9353 = vst [vmem:[#allocation198_spill] sm:$0xff] %v8275_v41  ;;  %v8291_v38 = vld [vmem:[#allocation24 + $0xb8] sm:$0xff]  ;;  %v8295_v28 = vld [vmem:[#allocation24 + $0xc8] sm:$0xff] }
 0x1ca   : > { %9354 = vst [vmem:[#allocation199_spill] sm:$0xff] %v8277_v31  ;;  %9355 = vst [vmem:[#allocation200_spill] sm:$0xff] %v8279_v39  ;;  %v8297_v41 = vld [vmem:[#allocation24 + $0xd0] sm:$0xff]  ;;  %v8299_v31 = vld [vmem:[#allocation24 + $0xd8] sm:$0xff] }
 0x1cb   : > { %9358 = vst [vmem:[#allocation203_spill] sm:$0xff] %v8285_v33  ;;  %9361 = vst [vmem:[#allocation206_spill] sm:$0xff] %v8291_v38  ;;  %v8301_v39 = vld [vmem:[#allocation24 + $0xe0] sm:$0xff]  ;;  %v8307_v33 = vld [vmem:[#allocation24 + $0xf8] sm:$0xff] }
 0x1cc   : > { %9363 = vst [vmem:[#allocation208_spill] sm:$0xff] %v8295_v28  ;;  %9364 = vst [vmem:[#allocation209_spill] sm:$0xff] %v8297_v41  ;;  %v8313_v38 = vld [vmem:[#allocation24 + $0x110] sm:$0xff]  ;;  %v8317_v28 = vld [vmem:[#allocation24 + $0x120] sm:$0xff] }
 0x1cd   : > { %9365 = vst [vmem:[#allocation210_spill] sm:$0xff] %v8299_v31  ;;  %9366 = vst [vmem:[#allocation211_spill] sm:$0xff] %v8301_v39  ;;  %v8319_v41 = vld [vmem:[#allocation24 + $0x128] sm:$0xff]  ;;  %v8321_v31 = vld [vmem:[#allocation24 + $0x130] sm:$0xff] }
 0x1ce   : > { %9369 = vst [vmem:[#allocation214_spill] sm:$0xff] %v8307_v33  ;;  %9372 = vst [vmem:[#allocation217_spill] sm:$0xff] %v8313_v38  ;;  %v8323_v39 = vld [vmem:[#allocation24 + $0x138] sm:$0xff]  ;;  %v8329_v33 = vld [vmem:[#allocation24 + $0x150] sm:$0xff] }
 0x1cf   : > { %9374 = vst [vmem:[#allocation219_spill] sm:$0xff] %v8317_v28  ;;  %9375 = vst [vmem:[#allocation220_spill] sm:$0xff] %v8319_v41  ;;  %v8335_v38 = vld [vmem:[#allocation24 + $0x168] sm:$0xff]  ;;  %v8339_v28 = vld [vmem:[#allocation24 + $0x178] sm:$0xff] }
 0x1d0   : > { %9376 = vst [vmem:[#allocation221_spill] sm:$0xff] %v8321_v31  ;;  %9377 = vst [vmem:[#allocation222_spill] sm:$0xff] %v8323_v39  ;;  %v8341_v41 = vld [vmem:[#allocation24 + $0x180] sm:$0xff]  ;;  %v8343_v31 = vld [vmem:[#allocation24 + $0x188] sm:$0xff] }
 0x1d1   : > { %9380 = vst [vmem:[#allocation225_spill] sm:$0xff] %v8329_v33  ;;  %9383 = vst [vmem:[#allocation228_spill] sm:$0xff] %v8335_v38  ;;  %v8345_v39 = vld [vmem:[#allocation24 + $0x190] sm:$0xff]  ;;  %v8351_v33 = vld [vmem:[#allocation24 + $0x1a8] sm:$0xff] }
 0x1d2   : > { %9385 = vst [vmem:[#allocation230_spill] sm:$0xff] %v8339_v28  ;;  %9386 = vst [vmem:[#allocation231_spill] sm:$0xff] %v8341_v41  ;;  %v8357_v38 = vld [vmem:[#allocation24 + $0x1c0] sm:$0xff]  ;;  %v8361_v28 = vld [vmem:[#allocation24 + $0x1d0] sm:$0xff] }
 0x1d3   : > { %9387 = vst [vmem:[#allocation232_spill] sm:$0xff] %v8343_v31  ;;  %9388 = vst [vmem:[#allocation233_spill] sm:$0xff] %v8345_v39  ;;  %v8363_v41 = vld [vmem:[#allocation24 + $0x1d8] sm:$0xff]  ;;  %v8365_v31 = vld [vmem:[#allocation24 + $0x1e0] sm:$0xff] }
 0x1d4   : > { %9391 = vst [vmem:[#allocation236_spill] sm:$0xff] %v8351_v33  ;;  %9394 = vst [vmem:[#allocation239_spill] sm:$0xff] %v8357_v38  ;;  %v8367_v39 = vld [vmem:[#allocation24 + $0x1e8] sm:$0xff]  ;;  %v789_v33 = vld [vmem:[#allocation8 + $0x50] sm:$0xff] }
 0x1d5   : > { %9396 = vst [vmem:[#allocation241_spill] sm:$0xff] %v8361_v28  ;;  %9397 = vst [vmem:[#allocation242_spill] sm:$0xff] %v8363_v41  ;;  %1370 = vmatpush1.msra.mxu0 %v789_v33  ;;  %v787_v24 = vld [vmem:[#allocation8 + $0x40] sm:$0xff]  ;;  %v785_v28 = vld [vmem:[#allocation8 + $0x30] sm:$0xff] }
 0x1d6   : > { %9398 = vst [vmem:[#allocation243_spill] sm:$0xff] %v8365_v31  ;;  %9399 = vst [vmem:[#allocation244_spill] sm:$0xff] %v8367_v39  ;;  %1371 = vmatprep.subr.mxu0 %v788_v49  ;;  %v803_v38 = vld [vmem:[#allocation9 + $0x40] sm:$0xff]  ;;  %v802_v41 = vld [vmem:[#allocation9 + $0x38] sm:$0xff] }
 0x1d7   : > { %1372 = vmatpush1.msra.mxu0 %v787_v24  ;;  %v784_v31 = vld [vmem:[#allocation8 + $0x28] sm:$0xff]  ;;  %6086 = vmatprep.subr.mxu1 %v803_v38  ;;  %v783_v39 = vld [vmem:[#allocation8 + $0x20] sm:$0xff]  ;;  %v781_v33 = vld [vmem:[#allocation8 + $0x10] sm:$0xff] }
 0x1d8   : > { %1373 = vmatprep.subr.mxu0 %v786_v50  ;;  %6087 = vmatpush3.msra.mxu1 %v803_v38  ;;  %v800_v49 = vld [vmem:[#allocation9 + $0x28] sm:$0xff]  ;;  %v799_v24 = vld [vmem:[#allocation9 + $0x20] sm:$0xff]  ;;  %v9402_v38 = vmov 0.0  }
 0x1d9   : > { %1374 = vmatpush1.msra.mxu0 %v785_v28  ;;  %6088 = vmatprep.subr.mxu1 %v802_v41  ;;  %v798_v28 = vld [vmem:[#allocation9 + $0x18] sm:$0xff] }
 0x1da   : > { %1375 = vmatprep.subr.mxu0 %v784_v31  ;;  %6089 = vmatpush3.msra.mxu1 %v802_v41  ;;  %v797_v31 = vld [vmem:[#allocation9 + $0x10] sm:$0xff]  ;;  %v795_v41 = vld [vmem:[#allocation9] sm:$0xff] }
 0x1db   : > { %1376 = vmatpush1.msra.mxu0 %v783_v39  ;;  %6090 = vmatprep.subr.mxu1 %v801_v42  ;;  %v796_v39 = vld [vmem:[#allocation9 + $0x8] sm:$0xff] }
 0x1dc   : > { %1377 = vmatprep.subr.mxu0 %v782_v46  ;;  %6091 = vmatpush3.msra.mxu1 %v801_v42 }
 0x1dd   : > { %1378 = vmatpush1.msra.mxu0 %v781_v33  ;;  %6092 = vmatprep.subr.mxu1 %v800_v49 }
 0x1de   : > { %1379 = vmatprep.subr.mxu0 %v780_v48  ;;  %6093 = vmatpush3.msra.mxu1 %v800_v49 }
 0x1df   : > { %1380 = vmatpush1.msra.mxu0 %v779_v47  ;;  %6094 = vmatprep.subr.mxu1 %v799_v24 }
 0x1e0   : > { %6107 = vmatprep.subr.mxu0 %v9402_v38  ;;  %6095 = vmatpush3.msra.mxu1 %v799_v24 }
 0x1e1   : > { %6096 = vmatprep.subr.mxu1 %v798_v28 }
 0x1e2   : > { %6097 = vmatpush3.msra.mxu1 %v798_v28 }
 0x1e3   : > { %6098 = vmatprep.subr.mxu1 %v797_v31 }
 0x1e4   : > { %6099 = vmatpush3.msra.mxu1 %v797_v31 }
 0x1e5   : > { %6100 = vmatprep.subr.mxu1 %v796_v39 }
 0x1e6   : > { %6101 = vmatpush3.msra.mxu1 %v796_v39 }
 0x1e7   : > { %6102 = vmatprep.subr.mxu1 %v795_v41 }
 0x1e8   : > { %6103 = vmatpush3.msra.mxu1 %v795_v41 }
 0x1e9   : > { %6121 = vmatprep.subr.mxu1 %v9402_v38 }
 0x228   : > { %v1311_v42 = vpop.xlane.xlu0 %1310 }
 0x229   : > { %v1321_v46 = vmul.f32 0.015625, %v1311_v42 }
 0x22b   : > { %v1325_v48 = vadd.f32 1e-05, %v1321_v46 }
 0x22c   : > { %v1317_v50 = vpop.xlane.xlu0 %1316  ;;  %v1314_v33 = vpop.xlane.xlu1 %1313 }
 0x22d   : > { %6712 = vrsqrt.f32 %v1325_v48  ;;  %v1323_v49 = vmul.f32 0.015625, %v1317_v50  ;;  %v1322_v47 = vmul.f32 0.015625, %v1314_v33 }
 0x22f   : > { %v1326_v24 = vadd.f32 1e-05, %v1322_v47  ;;  %v1327_v28 = vadd.f32 1e-05, %v1323_v49 }
 0x230   : > { %v1452_v29 = vpop.xlane.xlu0 %1451  ;;  %v1450_v16 = vpop.xlane.xlu1 %1449 }
 0x231   : > { %v1454_v31 = vmul.f32 0.0078125, %v1452_v29  ;;  %v1453_v32 = vmul.f32 0.0078125, %v1450_v16  ;;  %6714 = vrsqrt.f32 %v1326_v24 }
 0x232   : > { %6716 = vrsqrt.f32 %v1327_v28 }
 0x233   : > { %v1456_v39 = vadd.f32 1e-05, %v1454_v31  ;;  %v1455_v35 = vadd.f32 1e-05, %v1453_v32 }
 0x234   : > { %v1320_v41 = vpop.xlane.xlu1 %1319 }
 0x235   : > { %6718 = vrsqrt.f32 %v1456_v39  ;;  %v1324_v37 = vmul.f32 0.015625, %v1320_v41 }
 0x236   : > { %6720 = vrsqrt.f32 %v1455_v35 }
 0x237   : > { %v1328_v42 = vadd.f32 1e-05, %v1324_v37 }
 0x239   : > { %6722 = vrsqrt.f32 %v1328_v42 }
 0x23a   : > { %v6713_v46 = vpop.eup %6712 }
 0x23b   : > { %v1333_v48 = vmul.f32 %v6713_v46, %v7894_v17 }
 0x23d   : > { %5596 = vmatmul.mubr.msk.f32.vlgmr.msra.gmra.mxu0 %vm1283_vm0, %v1333_v48 }
 0x23e   : > { %1419 = vmatprep.mubr.f32.mxu0 %v9402_v38  ;;  %v6715_v50 = vpop.eup %6714 }
 0x23f   : > { %v1334_v16 = vmul.f32 %v6715_v50, %v7902_v25  ;;  %v6717_v29 = vpop.eup %6716 }
 0x240   : > { %v1335_v37 = vmul.f32 %v6717_v29, %v7896_v18 }
 0x241   : > { %5597 = vmatmul.mubr.msk.f32.gmra.mxu0 %vm1283_vm0, %v1334_v16 }
 0x242   : > { %v6719_v33 = vpop.eup %6718  ;;  %1425 = vmatprep.mubr.f32.mxu0 %v9402_v38 }
 0x243   : > { %v6721_v32 = vpop.eup %6720  ;;  %v1460_v35 = vmul.f32 %v6719_v33, %v7912_v34 }
 0x244   : > { %v1459_v17 = vmul.f32 %v6721_v32, %v7906_v27 }
 0x245   : > { %5598 = vmatmul.mubr.msk.f32.gmra.mxu0 %vm1283_vm0, %v1335_v37 }
 0x246   : > { %v6723_v49 = vpop.eup %6722  ;;  %6104 = vmatprep.mubr.f32.mxu1 %v1459_v17  ;;  %1431 = vmatprep.mubr.f32.mxu0 %v9402_v38 }
 0x247   : > { %6105 = vmatmul.mubr.f32.vlgmr.msra.gmra.mxu1 %v1460_v35  ;;  %v1336_v25 = vmul.f32 %v6723_v49, %v7915_v36 }
 0x248   : > { %6125 = vmatprep.mubr.msk.f32.mxu1 %vm7487_vm1, %v9402_v38 }
 0x249   : > { %5599 = vmatmul.mubr.msk.f32.gmra.mxu0 %vm1283_vm0, %v1336_v25 }
 0x24a   : > { %6111 = vmatprep.mubr.msk.f32.mxu0 %vm7487_vm1, %v9402_v38 }
 0x2fd   : > { %v8392_v18 = vpop.f32.mrf.mxu0 }
 0x2ff   : > { %v8394_v27 = vpop.f32.mrf.mxu0 }
 0x301   : > { %v8396_v34 = vpop.f32.mrf.mxu0 }
 0x302   : > { %6108 = vmatpush3.xpose.msra.mxu0 %v8396_v34 }
 0x303   : > { %v8399_v47 = vpop.f32.mrf.mxu0  ;;  %6109 = vmatprep.subr.mxu0 %v9402_v38 }
 0x304   : > { %6122 = vmatpush3.msra.mxu1 %v8399_v47 }
 0x305   : > { %v8403_v36 = vpop.f32.mrf.mxu0  ;;  %6123 = vmatprep.subr.mxu1 %v9402_v38 }
 0x306   : > { %6110 = vmatpush3.xpose.msra.mxu0 %v8392_v18  ;;  %6124 = vmatpush3.msra.mxu1 %v8394_v27 }
 0x307   : > { %v6106_v24 = vpop.f32.mrf.mxu1  ;;  %v8408_v28 = vpop.f32.mrf.mxu0  ;;  %6114 = vmatprep.subr.mxu0 %v9402_v38  ;;  %6128 = vmatprep.subr.mxu1 %v9402_v38 }
 0x309   : > { %v1527_v31 = vpop.f32.mrf.mxu1  ;;  %v8412_v39 = vpop.f32.mrf.mxu0 }
 0x30a   : > { %6112 = vmatmul.mubr.f32.vlgmr.msra.gmra.mxu0 %v1527_v31 }
 0x30b   : > { %6115 = vmatpush3.xpose.msra.mxu0 %v8412_v39  ;;  %6118 = vmatprep.mubr.msk.f32.mxu0 %vm7487_vm1, %v9402_v38  ;;  %v8420_v41 = vpop.f32.mrf.mxu0 }
 0x30c   : > { %6116 = vmatprep.subr.mxu0 %v9402_v38 }
 0x30f   : > { %6117 = vmatpush3.xpose.msra.mxu0 %v8403_v36 }
 0x312   : > { %6119 = vmatmul.mubr.f32.vlgmr.msra.gmra.mxu0 %v6106_v24 }
 0x313   : > { %1937 = vmatprep.mubr.f32.mxu0 %v7881_v7 }
 0x3ca   : > { %v1602_v42 = vpop.f32.mrf.mxu0 }
 0x3cb   : > { %v1677_v46 = vsel %vm1676_vm2, %v1602_v42, -inf }
 0x3cc   : > { %v1678_v48 = vrot.slane %v1677_v46, 4  ;;  %v6113_v50 = vpop.f32.mrf.mxu0 }
 0x3ce   : > { %v1679_v16 = vmax.f32 %v1677_v46, %v1678_v48 }
 0x3d0   : > { %v1680_v29 = vrot.slane %v1679_v16, 2 }
 0x3d2   : > { %v1681_v33 = vmax.f32 %v1679_v16, %v1680_v29  ;;  %v1672_v32 = vpop.f32.mrf.mxu0 }
 0x3d3   : > { %v1684_v35 = vsel %vm1676_vm2, %v1672_v32, -inf }
 0x3d4   : > { %v1682_v37 = vrot.slane %v1681_v33, 1  ;;  %v1685_v17 = vrot.slane %v1684_v35, 4  ;;  %v6120_v49 = vpop.f32.mrf.mxu0 }
 0x3d6   : > { %v1683_v25 = vmax.f32 %v1681_v33, %v1682_v37  ;;  %v1686_v24 = vmax.f32 %v1684_v35, %v1685_v17 }
 0x3d8   : > { %v1691_v31 = vsub.f32 %v1602_v42, %v1683_v25  ;;  %v1687_v45 = vrot.slane %v1686_v24, 2 }
 0x3da   : > { %v1693_v40 = vmul.f32 1.442695, %v1691_v31  ;;  %v1688_v26 = vmax.f32 %v1686_v24, %v1687_v45 }
 0x3dc   : > { %6724 = vpow2.f32 %v1693_v40  ;;  %v1689_v43 = vrot.slane %v1688_v26, 1 }
 0x3de   : > { %v1690_v44 = vmax.f32 %v1688_v26, %v1689_v43 }
 0x3e0   : > { %v1692_v30 = vsub.f32 %v1672_v32, %v1690_v44 }
 0x3e2   : > { %v1695_v50 = vmul.f32 1.442695, %v1692_v30 }
 0x3e4   : > { %6726 = vpow2.f32 %v1695_v50 }
 0x3e9   : > { %v6725_v46 = vpop.eup %6724 }
 0x3ea   : > { %v1697_v48 = vsel %vm1676_vm2, %v6725_v46, 0.0 }
 0x3eb   : > { %v1698_v16 = vrot.slane %v1697_v48, 4 }
 0x3ed   : > { %v1699_v29 = vadd.f32 %v1698_v16, %v1697_v48  ;;  %v857_v48 = vld [vmem:[#allocation11 + $0x170] sm:$0xff]  ;;  %v856_v16 = vld [vmem:[#allocation11 + $0x168] sm:$0xff] }
 0x3ee   : > { %1873 = vmatprep.subr.mxu0 %v857_v48  ;;  %v826_v48 = vld [vmem:[#allocation11 + $0x78] sm:$0xff] }
 0x3ef   : > { %v1700_v8 = vrot.slane %v1699_v29, 2  ;;  %1874 = vmatpush1.msra.mxu0 %v856_v16  ;;  %v824_v16 = vld [vmem:[#allocation11 + $0x68] sm:$0xff] }
 0x3f1   : > { %v6727_v3 = vpop.eup %6726  ;;  %v1701_v49 = vadd.f32 %v1700_v8, %v1699_v29  ;;  %v854_v29 = vld [vmem:[#allocation11 + $0x158] sm:$0xff] }
 0x3f2   : > { %v1704_v33 = vsel %vm1676_vm2, %v6727_v3, 0.0  ;;  %1875 = vmatprep.subr.mxu0 %v854_v29  ;;  %v823_v29 = vld [vmem:[#allocation11 + $0x60] sm:$0xff] }
 0x3f3   : > { %v1705_v42 = vrot.slane %v1704_v33, 4  ;;  %v1702_v35 = vrot.slane %v1701_v49, 1 }
 0x3f5   : > { %v1706_v37 = vadd.f32 %v1705_v42, %v1704_v33  ;;  %v1703_v45 = vadd.f32 %v1702_v35, %v1701_v49  ;;  %v853_v49 = vld [vmem:[#allocation11 + $0x150] sm:$0xff]  ;;  %v850_v33 = vld [vmem:[#allocation11 + $0x138] sm:$0xff]  ;;  %v848_v42 = vld [vmem:[#allocation11 + $0x128] sm:$0xff] }
 0x3f6   : > { %1876 = vmatpush1.msra.mxu0 %v853_v49  ;;  %v847_v35 = vld [vmem:[#allocation11 + $0x120] sm:$0xff]  ;;  %v821_v49 = vld [vmem:[#allocation11 + $0x50] sm:$0xff] }
 0x3f7   : > { %v1707_v40 = vrot.slane %v1706_v37, 2  ;;  %6728 = vrcp.f32 %v1703_v45  ;;  %v842_v45 = vld [vmem:[#allocation11 + $0xf8] sm:$0xff] }
 0x3f9   : > { %v1708_v26 = vadd.f32 %v1707_v40, %v1706_v37  ;;  %v844_v37 = vld [vmem:[#allocation11 + $0x108] sm:$0xff]  ;;  %v841_v40 = vld [vmem:[#allocation11 + $0xf0] sm:$0xff] }
 0x3fb   : > { %v1709_v43 = vrot.slane %v1708_v26, 1 }
 0x3fd   : > { %v1710_v30 = vadd.f32 %v1709_v43, %v1708_v26  ;;  %v839_v26 = vld [vmem:[#allocation11 + $0xe0] sm:$0xff]  ;;  %v838_v43 = vld [vmem:[#allocation11 + $0xd8] sm:$0xff] }
 0x3ff   : > { %6730 = vrcp.f32 %v1710_v30  ;;  %v836_v30 = vld [vmem:[#allocation11 + $0xc8] sm:$0xff] }
 0x404   : > { %v6729_v44 = vpop.eup %6728 }
 0x405   : > { %v1713_v32 = vmul.f32 %v6729_v44, %v6725_v46  ;;  %v851_v46 = vld [vmem:[#allocation11 + $0x140] sm:$0xff] }
 0x406   : > { %1877 = vmatprep.subr.mxu0 %v851_v46  ;;  %v835_v44 = vld [vmem:[#allocation11 + $0xc0] sm:$0xff]  ;;  %v820_v46 = vld [vmem:[#allocation11 + $0x48] sm:$0xff] }
 0x407   : > { %v8426_v17 = vadd.f32 1e-08, %v1713_v32  ;;  %1878 = vmatpush1.msra.mxu0 %v850_v33  ;;  %v833_v32 = vld [vmem:[#allocation11 + $0xb0] sm:$0xff]  ;;  %v818_v33 = vld [vmem:[#allocation11 + $0x38] sm:$0xff] }
 0x408   : > { %1879 = vmatprep.subr.mxu0 %v848_v42  ;;  %v817_v42 = vld [vmem:[#allocation11 + $0x30] sm:$0xff] }
 0x409   : > { %v1717_v25 = vsel %vm1676_vm2, %v8426_v17, 0.0  ;;  %1880 = vmatpush1.msra.mxu0 %v847_v35  ;;  %v815_v35 = vld [vmem:[#allocation11 + $0x20] sm:$0xff] }
 0x40a   : > { %1718 = vadd.xlane.f32.xlu0 %v1717_v25  ;;  %v832_v25 = vld [vmem:[#allocation11 + $0xa8] sm:$0xff] }
 0x40c   : > { %v6731_v8 = vpop.eup %6730 }
 0x40d   : > { %v1714_v24 = vmul.f32 %v6731_v8, %v6727_v3  ;;  %v845_v3 = vld [vmem:[#allocation11 + $0x110] sm:$0xff]  ;;  %v830_v8 = vld [vmem:[#allocation11 + $0x98] sm:$0xff] }
 0x40e   : > { %1881 = vmatprep.subr.mxu0 %v845_v3  ;;  %v814_v3 = vld [vmem:[#allocation11 + $0x18] sm:$0xff] }
 0x40f   : > { %v8430_v31 = vadd.f32 1e-08, %v1714_v24  ;;  %1882 = vmatpush1.msra.mxu0 %v844_v37  ;;  %v829_v24 = vld [vmem:[#allocation11 + $0x90] sm:$0xff]  ;;  %v812_v37 = vld [vmem:[#allocation11 + $0x8] sm:$0xff] }
 0x410   : > { %1883 = vmatprep.subr.mxu0 %v842_v45  ;;  %v811_v45 = vld [vmem:[#allocation11] sm:$0xff] }
 0x411   : > { %v1720_v50 = vsel %vm1676_vm2, %v8430_v31, 0.0  ;;  %1884 = vmatpush1.msra.mxu0 %v841_v40  ;;  %v905_v40 = vld [vmem:[#allocation11 + $0x2f0] sm:$0xff] }
 0x412   : > { %1721 = vadd.xlane.f32.xlu1 %v1720_v50  ;;  %1885 = vmatprep.subr.mxu0 %v839_v26  ;;  %v827_v50 = vld [vmem:[#allocation11 + $0x80] sm:$0xff]  ;;  %v904_v26 = vld [vmem:[#allocation11 + $0x2e8] sm:$0xff] }
 0x413   : > { %1886 = vmatpush1.msra.mxu0 %v838_v43  ;;  %v902_v43 = vld [vmem:[#allocation11 + $0x2d8] sm:$0xff] }
 0x414   : > { %1887 = vmatprep.subr.mxu0 %v836_v30  ;;  %v901_v30 = vld [vmem:[#allocation11 + $0x2d0] sm:$0xff] }
 0x415   : > { %1888 = vmatpush1.msra.mxu0 %v835_v44  ;;  %v899_v44 = vld [vmem:[#allocation11 + $0x2c0] sm:$0xff] }
 0x416   : > { %1889 = vmatprep.subr.mxu0 %v833_v32  ;;  %v898_v32 = vld [vmem:[#allocation11 + $0x2b8] sm:$0xff] }
 0x417   : > { %1890 = vmatpush1.msra.mxu0 %v832_v25  ;;  %v896_v25 = vld [vmem:[#allocation11 + $0x2a8] sm:$0xff] }
 0x418   : > { %1891 = vmatprep.subr.mxu0 %v830_v8  ;;  %v895_v8 = vld [vmem:[#allocation11 + $0x2a0] sm:$0xff] }
 0x419   : > { %1892 = vmatpush1.msra.mxu0 %v829_v24  ;;  %v893_v24 = vld [vmem:[#allocation11 + $0x290] sm:$0xff] }
 0x41a   : > { %1893 = vmatprep.subr.mxu0 %v827_v50  ;;  %v892_v50 = vld [vmem:[#allocation11 + $0x288] sm:$0xff] }
 0x41b   : > { %1894 = vmatpush1.msra.mxu0 %v826_v48  ;;  %v890_v48 = vld [vmem:[#allocation11 + $0x278] sm:$0xff] }
 0x41c   : > { %1895 = vmatprep.subr.mxu0 %v824_v16  ;;  %v889_v16 = vld [vmem:[#allocation11 + $0x270] sm:$0xff] }
 0x41d   : > { %1896 = vmatpush1.msra.mxu0 %v823_v29  ;;  %v887_v29 = vld [vmem:[#allocation11 + $0x260] sm:$0xff] }
 0x41e   : > { %1897 = vmatprep.subr.mxu0 %v821_v49  ;;  %v886_v49 = vld [vmem:[#allocation11 + $0x258] sm:$0xff] }
 0x41f   : > { %1898 = vmatpush1.msra.mxu0 %v820_v46  ;;  %v884_v46 = vld [vmem:[#allocation11 + $0x248] sm:$0xff] }
 0x420   : > { %1899 = vmatprep.subr.mxu0 %v818_v33  ;;  %v883_v33 = vld [vmem:[#allocation11 + $0x240] sm:$0xff] }
 0x421   : > { %1900 = vmatpush1.msra.mxu0 %v817_v42  ;;  %v881_v42 = vld [vmem:[#allocation11 + $0x230] sm:$0xff] }
 0x422   : > { %1901 = vmatprep.subr.mxu0 %v815_v35  ;;  %v880_v35 = vld [vmem:[#allocation11 + $0x228] sm:$0xff] }
 0x423   : > { %1902 = vmatpush1.msra.mxu0 %v814_v3  ;;  %v878_v3 = vld [vmem:[#allocation11 + $0x218] sm:$0xff] }
 0x424   : > { %1903 = vmatprep.subr.mxu0 %v812_v37  ;;  %v877_v37 = vld [vmem:[#allocation11 + $0x210] sm:$0xff] }
 0x425   : > { %1904 = vmatpush1.msra.mxu0 %v811_v45  ;;  %v875_v45 = vld [vmem:[#allocation11 + $0x200] sm:$0xff] }
 0x426   : > { %1905 = vmatprep.subr.mxu0 %v905_v40  ;;  %v874_v40 = vld [vmem:[#allocation11 + $0x1f8] sm:$0xff] }
 0x427   : > { %1906 = vmatpush2.msra.mxu0 %v904_v26  ;;  %v872_v26 = vld [vmem:[#allocation11 + $0x1e8] sm:$0xff] }
 0x428   : > { %1907 = vmatprep.subr.mxu0 %v902_v43  ;;  %v871_v43 = vld [vmem:[#allocation11 + $0x1e0] sm:$0xff] }
 0x429   : > { %1908 = vmatpush2.msra.mxu0 %v901_v30  ;;  %v869_v30 = vld [vmem:[#allocation11 + $0x1d0] sm:$0xff] }
 0x42a   : > { %1909 = vmatprep.subr.mxu0 %v899_v44  ;;  %v868_v44 = vld [vmem:[#allocation11 + $0x1c8] sm:$0xff] }
 0x42b   : > { %1910 = vmatpush2.msra.mxu0 %v898_v32  ;;  %v866_v32 = vld [vmem:[#allocation11 + $0x1b8] sm:$0xff] }
 0x42c   : > { %1911 = vmatprep.subr.mxu0 %v896_v25  ;;  %v865_v25 = vld [vmem:[#allocation11 + $0x1b0] sm:$0xff] }
 0x42d   : > { %1912 = vmatpush2.msra.mxu0 %v895_v8  ;;  %v863_v8 = vld [vmem:[#allocation11 + $0x1a0] sm:$0xff] }
 0x42e   : > { %1913 = vmatprep.subr.mxu0 %v893_v24  ;;  %v862_v24 = vld [vmem:[#allocation11 + $0x198] sm:$0xff] }
 0x42f   : > { %1914 = vmatpush2.msra.mxu0 %v892_v50  ;;  %v860_v50 = vld [vmem:[#allocation11 + $0x188] sm:$0xff] }
 0x430   : > { %1915 = vmatprep.subr.mxu0 %v890_v48 }
 0x431   : > { %1916 = vmatpush2.msra.mxu0 %v889_v16 }
 0x432   : > { %1917 = vmatprep.subr.mxu0 %v887_v29 }
 0x433   : > { %1918 = vmatpush2.msra.mxu0 %v886_v49 }
 0x434   : > { %1919 = vmatprep.subr.mxu0 %v884_v46  ;;  %v906_v46 = vld [vmem:[#allocation11 + $0x2f8] sm:$0xff] }
 0x435   : > { %1920 = vmatpush2.msra.mxu0 %v883_v33 }
 0x436   : > { %1921 = vmatprep.subr.mxu0 %v881_v42 }
 0x437   : > { %1922 = vmatpush2.msra.mxu0 %v880_v35  ;;  %v858_v35 = vld [vmem:[#allocation11 + $0x178] sm:$0xff] }
 0x438   : > { %1923 = vmatprep.subr.mxu0 %v878_v3  ;;  %v903_v3 = vld [vmem:[#allocation11 + $0x2e0] sm:$0xff] }
 0x439   : > { %1924 = vmatpush2.msra.mxu0 %v877_v37  ;;  %v900_v37 = vld [vmem:[#allocation11 + $0x2c8] sm:$0xff] }
 0x43a   : > { %1925 = vmatprep.subr.mxu0 %v875_v45  ;;  %v8444_v45 = vld [vmem:[%s7873_s25] sm:$0xff] }
 0x43b   : > { %1926 = vmatpush2.msra.mxu0 %v874_v40  ;;  %v852_v40 = vld [vmem:[#allocation11 + $0x148] sm:$0xff] }
 0x43c   : > { %1927 = vmatprep.subr.mxu0 %v872_v26  ;;  %v897_v26 = vld [vmem:[#allocation11 + $0x2b0] sm:$0xff] }
 0x43d   : > { %1928 = vmatpush2.msra.mxu0 %v871_v43  ;;  %v849_v43 = vld [vmem:[#allocation11 + $0x130] sm:$0xff] }
 0x43e   : > { %1929 = vmatprep.subr.mxu0 %v869_v30  ;;  %v894_v30 = vld [vmem:[#allocation11 + $0x298] sm:$0xff] }
 0x43f   : > { %1930 = vmatpush2.msra.mxu0 %v868_v44  ;;  %v891_v44 = vld [vmem:[#allocation11 + $0x280] sm:$0xff] }
 0x440   : > { %1931 = vmatprep.subr.mxu0 %v866_v32  ;;  %v843_v32 = vld [vmem:[#allocation11 + $0x100] sm:$0xff] }
 0x441   : > { %1932 = vmatpush2.msra.mxu0 %v865_v25  ;;  %v888_v25 = vld [vmem:[#allocation11 + $0x268] sm:$0xff] }
 0x442   : > { %1933 = vmatprep.subr.mxu0 %v863_v8  ;;  %v840_v8 = vld [vmem:[#allocation11 + $0xe8] sm:$0xff] }
 0x443   : > { %1934 = vmatpush2.msra.mxu0 %v862_v24  ;;  %v885_v24 = vld [vmem:[#allocation11 + $0x250] sm:$0xff] }
 0x444   : > { %1935 = vmatprep.subr.mxu0 %v860_v50  ;;  %v837_v50 = vld [vmem:[#allocation11 + $0xd0] sm:$0xff] }
 0x493   : > { %v1719_v48 = vpop.xlane.xlu0 %1718 }
 0x494   : > { %6732 = vrcp.f32 %v1719_v48  ;;  %v882_v48 = vld [vmem:[#allocation11 + $0x238] sm:$0xff] }
 0x49b   : > { %v1722_v16 = vpop.xlane.xlu1 %1721 }
 0x49c   : > { %6734 = vrcp.f32 %v1722_v16  ;;  %v834_v16 = vld [vmem:[#allocation11 + $0xb8] sm:$0xff] }
 0x4a1   : > { %v6733_v29 = vpop.eup %6732 }
 0x4a2   : > { %v1725_v49 = vmul.f32 %v6733_v29, %v8426_v17  ;;  %v855_v17 = vld [vmem:[#allocation11 + $0x160] sm:$0xff] }
 0x4a3   : > { %v879_v29 = vld [vmem:[#allocation11 + $0x220] sm:$0xff] }
 0x4a4   : > { %6126 = vmatmul.mubr.msk.f32.vlgmr.msra.gmra.mxu1 %vm1676_vm2, %v1725_v49  ;;  %v831_v49 = vld [vmem:[#allocation11 + $0xa0] sm:$0xff] }
 0x4a5   : > { %6129 = vmatpush3.msra.mxu1 %v8420_v41  ;;  %6132 = vmatprep.mubr.msk.f32.mxu1 %vm7487_vm1, %v9402_v38 }
 0x4a6   : > { %6130 = vmatprep.subr.mxu1 %v9402_v38 }
 0x4a7   : > { %6131 = vmatpush3.msra.mxu1 %v8408_v28 }
 0x4a8   : > { %5674 = vmatprep.subr.mxu1 %v906_v46  ;;  %v876_v46 = vld [vmem:[#allocation11 + $0x208] sm:$0xff] }
 0x4a9   : > { %v6735_v33 = vpop.eup %6734 }
 0x4aa   : > { %v1726_v42 = vmul.f32 %v6735_v33, %v8430_v31  ;;  %v846_v31 = vld [vmem:[#allocation11 + $0x118] sm:$0xff]  ;;  %v828_v33 = vld [vmem:[#allocation11 + $0x88] sm:$0xff] }
 0x4ac   : > { %6133 = vmatmul.mubr.msk.f32.vlgmr.msra.gmra.mxu1 %vm1676_vm2, %v1726_v42  ;;  %v873_v42 = vld [vmem:[#allocation11 + $0x1f0] sm:$0xff] }
 0x4ad   : > { %5675 = vmatpush3.msra.mxu1 %v858_v35  ;;  %2014 = vmatprep.mubr.f32.mxu1 %v8444_v45  ;;  %v825_v35 = vld [vmem:[#allocation11 + $0x70] sm:$0xff] }
 0x4ae   : > { %5676 = vmatprep.subr.mxu1 %v903_v3  ;;  %v870_v3 = vld [vmem:[#allocation11 + $0x1d8] sm:$0xff] }
 0x4af   : > { %5677 = vmatpush3.msra.mxu1 %v855_v17  ;;  %v822_v17 = vld [vmem:[#allocation11 + $0x58] sm:$0xff] }
 0x4b0   : > { %5678 = vmatprep.subr.mxu1 %v900_v37  ;;  %v867_v37 = vld [vmem:[#allocation11 + $0x1c0] sm:$0xff] }
 0x4b1   : > { %5679 = vmatpush3.msra.mxu1 %v852_v40  ;;  %v819_v40 = vld [vmem:[#allocation11 + $0x40] sm:$0xff] }
 0x4b2   : > { %5680 = vmatprep.subr.mxu1 %v897_v26  ;;  %v864_v26 = vld [vmem:[#allocation11 + $0x1a8] sm:$0xff] }
 0x4b3   : > { %5681 = vmatpush3.msra.mxu1 %v849_v43  ;;  %v816_v43 = vld [vmem:[#allocation11 + $0x28] sm:$0xff] }
 0x4b4   : > { %5682 = vmatprep.subr.mxu1 %v894_v30  ;;  %v861_v30 = vld [vmem:[#allocation11 + $0x190] sm:$0xff] }
 0x4b5   : > { %5683 = vmatpush3.msra.mxu1 %v846_v31  ;;  %v813_v31 = vld [vmem:[#allocation11 + $0x10] sm:$0xff] }
 0x4b6   : > { %5684 = vmatprep.subr.mxu1 %v891_v44  ;;  %v859_v44 = vld [vmem:[#allocation11 + $0x180] sm:$0xff] }
 0x4b7   : > { %5685 = vmatpush3.msra.mxu1 %v843_v32  ;;  %v922_v32 = vld [vmem:[#allocation12 + $0x78] sm:$0xff]  ;;  %1936 = vmatpush2.msra.mxu0 %v859_v44 }
 0x4b8   : > { %5686 = vmatprep.subr.mxu1 %v888_v25 }
 0x4b9   : > { %5687 = vmatpush3.msra.mxu1 %v840_v8  ;;  %v921_v8 = vld [vmem:[#allocation12 + $0x70] sm:$0xff] }
 0x4ba   : > { %5688 = vmatprep.subr.mxu1 %v885_v24 }
 0x4bb   : > { %5689 = vmatpush3.msra.mxu1 %v837_v50  ;;  %v920_v50 = vld [vmem:[#allocation12 + $0x68] sm:$0xff] }
 0x4bc   : > { %5690 = vmatprep.subr.mxu1 %v882_v48  ;;  %v8448_v48 = vld [vmem:[%s7873_s25 + $0x8] sm:$0xff] }
 0x4bd   : > { %5691 = vmatpush3.msra.mxu1 %v834_v16  ;;  %v919_v16 = vld [vmem:[#allocation12 + $0x60] sm:$0xff] }
 0x4be   : > { %5692 = vmatprep.subr.mxu1 %v879_v29  ;;  %v918_v29 = vld [vmem:[#allocation12 + $0x58] sm:$0xff] }
 0x4bf   : > { %5693 = vmatpush3.msra.mxu1 %v831_v49 }
 0x4c0   : > { %5694 = vmatprep.subr.mxu1 %v876_v46  ;;  %v917_v46 = vld [vmem:[#allocation12 + $0x50] sm:$0xff] }
 0x4c1   : > { %5695 = vmatpush3.msra.mxu1 %v828_v33 }
 0x4c2   : > { %5696 = vmatprep.subr.mxu1 %v873_v42  ;;  %v916_v42 = vld [vmem:[#allocation12 + $0x48] sm:$0xff] }
 0x4c3   : > { %5697 = vmatpush3.msra.mxu1 %v825_v35  ;;  %v915_v35 = vld [vmem:[#allocation12 + $0x40] sm:$0xff] }
 0x4c4   : > { %5698 = vmatprep.subr.mxu1 %v870_v3  ;;  %v914_v3 = vld [vmem:[#allocation12 + $0x38] sm:$0xff] }
 0x4c5   : > { %5699 = vmatpush3.msra.mxu1 %v822_v17  ;;  %v913_v17 = vld [vmem:[#allocation12 + $0x30] sm:$0xff] }
 0x4c6   : > { %5700 = vmatprep.subr.mxu1 %v867_v37  ;;  %v912_v37 = vld [vmem:[#allocation12 + $0x28] sm:$0xff] }
 0x4c7   : > { %5701 = vmatpush3.msra.mxu1 %v819_v40  ;;  %v911_v40 = vld [vmem:[#allocation12 + $0x20] sm:$0xff] }
 0x4c8   : > { %5702 = vmatprep.subr.mxu1 %v864_v26  ;;  %v910_v26 = vld [vmem:[#allocation12 + $0x18] sm:$0xff] }
 0x4c9   : > { %5703 = vmatpush3.msra.mxu1 %v816_v43  ;;  %v909_v43 = vld [vmem:[#allocation12 + $0x10] sm:$0xff] }
 0x4ca   : > { %5704 = vmatprep.subr.mxu1 %v861_v30  ;;  %v908_v30 = vld [vmem:[#allocation12 + $0x8] sm:$0xff] }
 0x4cb   : > { %5705 = vmatpush3.msra.mxu1 %v813_v31  ;;  %v907_v31 = vld [vmem:[#allocation12] sm:$0xff] }
 0x4cc   : > { %6135 = vmatprep.subr.mxu1 %v922_v32 }
 0x564   : > { %v1796_v25 = vpop.f32.mrf.mxu1 }
 0x565   : > { %1938 = vmatmul.mubr.f32.vlgmr.msra.gmra.mxu0 %v1796_v25  ;;  %2015 = vmatmul.mubr.f32.vlgmr.msra.gmra.mxu1 %v1796_v25 }
 0x566   : > { %6136 = vmatpush3.msra.mxu1 %v922_v32  ;;  %v6127_v24 = vpop.f32.mrf.mxu1  ;;  %1943 = vmatprep.mubr.f32.mxu0 %v8448_v48 }
 0x567   : > { %6137 = vmatprep.subr.mxu1 %v921_v8  ;;  %2019 = vmatprep.mubr.f32.mxu1 %v8448_v48 }
 0x568   : > { %6138 = vmatpush3.msra.mxu1 %v921_v8 }
 0x569   : > { %6139 = vmatprep.subr.mxu1 %v920_v50 }
 0x56a   : > { %6140 = vmatpush3.msra.mxu1 %v920_v50 }
 0x56b   : > { %6141 = vmatprep.subr.mxu1 %v919_v16 }
 0x56c   : > { %6142 = vmatpush3.msra.mxu1 %v919_v16  ;;  %v1869_v49 = vpop.f32.mrf.mxu1 }
 0x56d   : > { %6143 = vmatprep.subr.mxu1 %v918_v29  ;;  %1944 = vmatmul.mubr.f32.gmra.mxu0 %v1869_v49 }
 0x56e   : > { %2020 = vmatmul.mubr.f32.gmra.mxu1 %v1869_v49  ;;  %v6134_v33 = vpop.f32.mrf.mxu1  ;;  %2224 = vmatprep.mubr.f32.mxu0 %v9402_v38 }
 0x56f   : > { %6144 = vmatpush3.msra.mxu1 %v918_v29  ;;  %6167 = vmatprep.mubr.f32.mxu1 %v8444_v45 }
 0x570   : > { %6145 = vmatprep.subr.mxu1 %v917_v46 }
 0x571   : > { %6146 = vmatpush3.msra.mxu1 %v917_v46 }
 0x572   : > { %6147 = vmatprep.subr.mxu1 %v916_v42 }
 0x573   : > { %6148 = vmatpush3.msra.mxu1 %v916_v42 }
 0x574   : > { %6149 = vmatprep.subr.mxu1 %v915_v35 }
 0x575   : > { %6150 = vmatpush3.msra.mxu1 %v915_v35 }
 0x576   : > { %6151 = vmatprep.subr.mxu1 %v914_v3 }
 0x577   : > { %6152 = vmatpush3.msra.mxu1 %v914_v3 }
 0x578   : > { %6153 = vmatprep.subr.mxu1 %v913_v17 }
 0x579   : > { %6154 = vmatpush3.msra.mxu1 %v913_v17 }
 0x57a   : > { %6155 = vmatprep.subr.mxu1 %v912_v37 }
 0x57b   : > { %6156 = vmatpush3.msra.mxu1 %v912_v37 }
 0x57c   : > { %6157 = vmatprep.subr.mxu1 %v911_v40 }
 0x57d   : > { %6158 = vmatpush3.msra.mxu1 %v911_v40 }
 0x57e   : > { %6159 = vmatprep.subr.mxu1 %v910_v26 }
 0x57f   : > { %6160 = vmatpush3.msra.mxu1 %v910_v26 }
 0x580   : > { %6161 = vmatprep.subr.mxu1 %v909_v43 }
 0x581   : > { %6162 = vmatpush3.msra.mxu1 %v909_v43 }
 0x582   : > { %6163 = vmatprep.subr.mxu1 %v908_v30 }
 0x583   : > { %6164 = vmatpush3.msra.mxu1 %v908_v30 }
 0x584   : > { %6165 = vmatprep.subr.mxu1 %v907_v31 }
 0x585   : > { %6166 = vmatpush3.msra.mxu1 %v907_v31 }
 0x586   : > { %6168 = vmatmul.mubr.f32.vlgmr.msra.gmra.mxu1 %v8448_v48 }
 0x587   : > { %2301 = vmatprep.mubr.f32.mxu1 %v9402_v38 }
 0x625   : > { %v1939_v44 = vpop.f32.mrf.mxu0  ;;  %v5706_v33 = vpop.f32.mrf.mxu1 }
 0x626   : > { %v5602_v32 = vmul.f32 -1.442695, %v1939_v44 }
 0x627   : > { %v1941_v25 = vpop.f32.mrf.mxu0  ;;  %v5707_v35 = vpop.f32.mrf.mxu1 }
 0x628   : > { %6736 = vpow2.f32 %v5602_v32  ;;  %v5604_v50 = vmul.f32 -1.442695, %v1941_v25  ;;  %v5708_v32 = vadd.f32 %v5707_v35, %v5706_v33 }
 0x62d   : > { %v1945_v8 = vpop.f32.mrf.mxu0 }
 0x62e   : > { %v5603_v24 = vmul.f32 -1.442695, %v1945_v8  ;;  %v5709_v17 = vpop.f32.mrf.mxu1 }
 0x62f   : > { %v1947_v16 = vpop.f32.mrf.mxu0 }
 0x630   : > { %6738 = vpow2.f32 %v5603_v24  ;;  %v5605_v46 = vmul.f32 -1.442695, %v1947_v16  ;;  %v5710_v40 = vpop.f32.mrf.mxu1 }
 0x631   : > { %6740 = vpow2.f32 %v5604_v50  ;;  %v5711_v16 = vadd.f32 %v5710_v40, %v5709_v17  ;;  %v984_v40 = vld [vmem:[#allocation14 + $0x1e8] sm:$0xff] }
 0x632   : > { %2160 = vmatprep.subr.mxu0 %v984_v40 }
 0x635   : > { %v6737_v29 = vpop.eup %6736 }
 0x636   : > { %v2106_v49 = vadd.f32 1.0, %v6737_v29 }
 0x638   : > { %6742 = vrcp.f32 %v2106_v49 }
 0x639   : > { %6744 = vpow2.f32 %v5605_v46 }
 0x63d   : > { %v6739_v42 = vpop.eup %6738 }
 0x63e   : > { %v2107_v3 = vadd.f32 1.0, %v6739_v42  ;;  %v6741_v37 = vpop.eup %6740 }
 0x63f   : > { %v2118_v26 = vadd.f32 1.0, %v6741_v37 }
 0x640   : > { %6746 = vrcp.f32 %v2107_v3 }
 0x641   : > { %6748 = vrcp.f32 %v2118_v26 }
 0x645   : > { %v6743_v43 = vpop.eup %6742 }
 0x646   : > { %v6169_v30 = vpop.f32.mrf.mxu1  ;;  %v6745_v31 = vpop.eup %6744 }
 0x647   : > { %v2119_v8 = vadd.f32 1.0, %v6745_v31  ;;  %v983_v31 = vld [vmem:[#allocation14 + $0x1e0] sm:$0xff] }
 0x648   : > { %v2091_v44 = vpop.f32.mrf.mxu1  ;;  %2161 = vmatpush1.msra.mxu0 %v983_v31 }
 0x649   : > { %v2124_v25 = vmul.f32 %v6743_v43, %v2091_v44  ;;  %v985_v44 = vld [vmem:[#allocation14 + $0x1f0] sm:$0xff] }
 0x64b   : > { %v2126_v24 = vadd.f32 %v5708_v32, %v2124_v25  ;;  %v981_v32 = vld [vmem:[#allocation14 + $0x1d0] sm:$0xff]  ;;  %v976_v25 = vld [vmem:[#allocation14 + $0x1a8] sm:$0xff] }
 0x64d   : > { %v6747_v50 = vpop.eup %6746  ;;  %6750 = vtanh.f32 %v2126_v24  ;;  %v977_v24 = vld [vmem:[#allocation14 + $0x1b0] sm:$0xff] }
 0x64e   : > { %6752 = vrcp.f32 %v2119_v8  ;;  %v2125_v29 = vmul.f32 %v6747_v50, %v6169_v30  ;;  %v6749_v46 = vpop.eup %6748  ;;  %v986_v30 = vld [vmem:[#allocation14 + $0x1f8] sm:$0xff]  ;;  %v975_v8 = vld [vmem:[#allocation14 + $0x1a0] sm:$0xff]  ;;  %v972_v50 = vld [vmem:[#allocation14 + $0x188] sm:$0xff] }
 0x64f   : > { %v2130_v42 = vsub.f32 1.0, %v6749_v46  ;;  %v2134_v4 = vmul.f32 %v8444_v45, %v6749_v46  ;;  %2237 = vmatprep.subr.mxu1 %v986_v30  ;;  %v980_v45 = vld [vmem:[#allocation14 + $0x1c8] sm:$0xff] }
 0x650   : > { %v2127_v49 = vadd.f32 %v5711_v16, %v2125_v29  ;;  %2238 = vmatpush1.msra.mxu1 %v985_v44  ;;  %2162 = vmatprep.subr.mxu0 %v980_v45  ;;  %v974_v16 = vld [vmem:[#allocation14 + $0x198] sm:$0xff]  ;;  %v971_v29 = vld [vmem:[#allocation14 + $0x180] sm:$0xff]  ;;  %v968_v46 = vld [vmem:[#allocation14 + $0x168] sm:$0xff] }
 0x652   : > { %6754 = vtanh.f32 %v2127_v49  ;;  %v973_v49 = vld [vmem:[#allocation14 + $0x190] sm:$0xff] }
 0x65a   : > { %v6751_v3 = vpop.eup %6750 }
 0x65b   : > { %v6753_v37 = vpop.eup %6752  ;;  %v2132_v51 = vmul.f32 %v6751_v3, %v2130_v42  ;;  %v970_v42 = vld [vmem:[#allocation14 + $0x178] sm:$0xff]  ;;  %v967_v3 = vld [vmem:[#allocation14 + $0x160] sm:$0xff] }
 0x65c   : > { %v2131_v33 = vsub.f32 1.0, %v6753_v37  ;;  %v2135_v43 = vmul.f32 %v8448_v48, %v6753_v37  ;;  %v978_v48 = vld [vmem:[#allocation14 + $0x1b8] sm:$0xff]  ;;  %v969_v37 = vld [vmem:[#allocation14 + $0x170] sm:$0xff] }
 0x65d   : > { %v8457_v52 = vadd.f32 %v2134_v4, %v2132_v51  ;;  %v982_v51 = vld [vmem:[#allocation14 + $0x1d8] sm:$0xff]  ;;  %v979_v4 = vld [vmem:[#allocation14 + $0x1c0] sm:$0xff] }
 0x65e   : > { %2239 = vmatprep.subr.mxu1 %v982_v51  ;;  %2163 = vmatpush1.msra.mxu0 %v979_v4 }
 0x65f   : > { %v6755_v35 = vpop.eup %6754  ;;  %2138 = vadd.xlane.f32.xlu0 %v8457_v52  ;;  %2240 = vmatpush1.msra.mxu1 %v981_v32 }
 0x660   : > { %v2133_v26 = vmul.f32 %v6755_v35, %v2131_v33  ;;  %2164 = vmatprep.subr.mxu0 %v976_v25  ;;  %2241 = vmatprep.subr.mxu1 %v978_v48  ;;  %v964_v33 = vld [vmem:[#allocation14 + $0x148] sm:$0xff]  ;;  %v966_v35 = vld [vmem:[#allocation14 + $0x158] sm:$0xff] }
 0x661   : > { %2165 = vmatpush1.msra.mxu0 %v975_v8  ;;  %2242 = vmatpush1.msra.mxu1 %v977_v24  ;;  %v960_v25 = vld [vmem:[#allocation14 + $0x128] sm:$0xff]  ;;  %v962_v48 = vld [vmem:[#allocation14 + $0x138] sm:$0xff]  ;;  %v959_v8 = vld [vmem:[#allocation14 + $0x120] sm:$0xff] }
 0x662   : > { %v8461_v17 = vadd.f32 %v2135_v43, %v2133_v26  ;;  %2166 = vmatprep.subr.mxu0 %v972_v50  ;;  %2243 = vmatprep.subr.mxu1 %v974_v16  ;;  %v963_v26 = vld [vmem:[#allocation14 + $0x140] sm:$0xff]  ;;  %v965_v43 = vld [vmem:[#allocation14 + $0x150] sm:$0xff]  ;;  %v956_v50 = vld [vmem:[#allocation14 + $0x108] sm:$0xff] }
 0x663   : > { %2167 = vmatpush1.msra.mxu0 %v971_v29  ;;  %2244 = vmatpush1.msra.mxu1 %v973_v49  ;;  %v961_v24 = vld [vmem:[#allocation14 + $0x130] sm:$0xff]  ;;  %v958_v16 = vld [vmem:[#allocation14 + $0x118] sm:$0xff]  ;;  %v955_v29 = vld [vmem:[#allocation14 + $0x100] sm:$0xff] }
 0x664   : > { %2140 = vadd.xlane.f32.xlu1 %v8461_v17  ;;  %2168 = vmatprep.subr.mxu0 %v968_v46  ;;  %v957_v49 = vld [vmem:[#allocation14 + $0x110] sm:$0xff]  ;;  %v952_v46 = vld [vmem:[#allocation14 + $0xe8] sm:$0xff] }
 0x665   : > { %2245 = vmatprep.subr.mxu1 %v970_v42  ;;  %2169 = vmatpush1.msra.mxu0 %v967_v3  ;;  %v954_v42 = vld [vmem:[#allocation14 + $0xf8] sm:$0xff]  ;;  %v951_v3 = vld [vmem:[#allocation14 + $0xe0] sm:$0xff] }
 0x666   : > { %2246 = vmatpush1.msra.mxu1 %v969_v37  ;;  %2170 = vmatprep.subr.mxu0 %v964_v33  ;;  %v953_v37 = vld [vmem:[#allocation14 + $0xf0] sm:$0xff]  ;;  %v948_v33 = vld [vmem:[#allocation14 + $0xc8] sm:$0xff] }
 0x667   : > { %2247 = vmatprep.subr.mxu1 %v966_v35  ;;  %2171 = vmatpush1.msra.mxu0 %v963_v26  ;;  %v950_v35 = vld [vmem:[#allocation14 + $0xd8] sm:$0xff]  ;;  %v947_v26 = vld [vmem:[#allocation14 + $0xc0] sm:$0xff] }
 0x668   : > { %2248 = vmatpush1.msra.mxu1 %v965_v43  ;;  %2172 = vmatprep.subr.mxu0 %v960_v25  ;;  %v949_v43 = vld [vmem:[#allocation14 + $0xd0] sm:$0xff]  ;;  %v939_v25 = vld [vmem:[#allocation14 + $0x80] sm:$0xff] }
 0x669   : > { %2249 = vmatprep.subr.mxu1 %v962_v48  ;;  %2173 = vmatpush1.msra.mxu0 %v959_v8  ;;  %v941_v48 = vld [vmem:[#allocation14 + $0x90] sm:$0xff]  ;;  %v936_v8 = vld [vmem:[#allocation14 + $0x68] sm:$0xff] }
 0x66a   : > { %2250 = vmatpush1.msra.mxu1 %v961_v24  ;;  %2174 = vmatprep.subr.mxu0 %v956_v50  ;;  %v938_v24 = vld [vmem:[#allocation14 + $0x78] sm:$0xff]  ;;  %v935_v50 = vld [vmem:[#allocation14 + $0x60] sm:$0xff] }
 0x66b   : > { %2251 = vmatprep.subr.mxu1 %v958_v16  ;;  %2175 = vmatpush1.msra.mxu0 %v955_v29  ;;  %v937_v16 = vld [vmem:[#allocation14 + $0x70] sm:$0xff]  ;;  %v932_v29 = vld [vmem:[#allocation14 + $0x48] sm:$0xff] }
 0x66c   : > { %2252 = vmatpush1.msra.mxu1 %v957_v49  ;;  %2176 = vmatprep.subr.mxu0 %v952_v46  ;;  %v934_v49 = vld [vmem:[#allocation14 + $0x58] sm:$0xff]  ;;  %v931_v46 = vld [vmem:[#allocation14 + $0x40] sm:$0xff] }
 0x66d   : > { %2253 = vmatprep.subr.mxu1 %v954_v42  ;;  %2177 = vmatpush1.msra.mxu0 %v951_v3  ;;  %v933_v42 = vld [vmem:[#allocation14 + $0x50] sm:$0xff]  ;;  %v928_v3 = vld [vmem:[#allocation14 + $0x28] sm:$0xff] }
 0x66e   : > { %2254 = vmatpush1.msra.mxu1 %v953_v37  ;;  %2178 = vmatprep.subr.mxu0 %v948_v33  ;;  %v930_v37 = vld [vmem:[#allocation14 + $0x38] sm:$0xff]  ;;  %v927_v33 = vld [vmem:[#allocation14 + $0x20] sm:$0xff] }
 0x66f   : > { %2255 = vmatprep.subr.mxu1 %v950_v35  ;;  %2179 = vmatpush1.msra.mxu0 %v947_v26  ;;  %v929_v35 = vld [vmem:[#allocation14 + $0x30] sm:$0xff]  ;;  %v924_v26 = vld [vmem:[#allocation14 + $0x8] sm:$0xff] }
 0x670   : > { %2256 = vmatpush1.msra.mxu1 %v949_v43  ;;  %v926_v43 = vld [vmem:[#allocation14 + $0x18] sm:$0xff] }
 0x6e8   : > { %v2139_v40 = vpop.xlane.xlu0 %2138 }
 0x6e9   : > { %v2142_v30 = vmul.f32 0.0078125, %v2139_v40  ;;  %v944_v40 = vld [vmem:[#allocation14 + $0xa8] sm:$0xff] }
 0x6ea   : > { %2180 = vmatprep.subr.mxu0 %v944_v40  ;;  %v923_v40 = vld [vmem:[#allocation14] sm:$0xff] }
 0x6eb   : > { %v8465_v31 = vsub.f32 %v8457_v52, %v2142_v30  ;;  %v946_v30 = vld [vmem:[#allocation14 + $0xb8] sm:$0xff] }
 0x6ec   : > { %2257 = vmatprep.subr.mxu1 %v946_v30  ;;  %v925_v30 = vld [vmem:[#allocation14 + $0x10] sm:$0xff] }
 0x6ed   : > { %v2146_v44 = vmul.f32 %v8465_v31, %v8465_v31  ;;  %v2141_v45 = vpop.xlane.xlu1 %2140 }
 0x6ee   : > { %v2143_v51 = vmul.f32 0.0078125, %v2141_v45  ;;  %v945_v45 = vld [vmem:[#allocation14 + $0xb0] sm:$0xff] }
 0x6ef   : > { %2148 = vadd.xlane.f32.xlu0 %v2146_v44  ;;  %v943_v44 = vld [vmem:[#allocation14 + $0xa0] sm:$0xff]  ;;  %2258 = vmatpush1.msra.mxu1 %v945_v45  ;;  %v1018_v45 = vld [vmem:[#allocation15 + $0xf8] sm:$0xff] }
 0x6f0   : > { %v8470_v4 = vsub.f32 %v8461_v17, %v2143_v51  ;;  %2181 = vmatpush1.msra.mxu0 %v943_v44  ;;  %v940_v51 = vld [vmem:[#allocation14 + $0x88] sm:$0xff]  ;;  %v1050_v44 = vld [vmem:[#allocation15 + $0x1f8] sm:$0xff] }
 0x6f1   : > { %2182 = vmatprep.subr.mxu0 %v940_v51 }
 0x6f2   : > { %v2147_v32 = vmul.f32 %v8470_v4, %v8470_v4  ;;  %2183 = vmatpush1.msra.mxu0 %v939_v25 }
 0x6f3   : > { %2184 = vmatprep.subr.mxu0 %v936_v8 }
 0x6f4   : > { %2150 = vadd.xlane.f32.xlu1 %v2147_v32  ;;  %v942_v32 = vld [vmem:[#allocation14 + $0x98] sm:$0xff]  ;;  %2185 = vmatpush1.msra.mxu0 %v935_v50 }
 0x6f5   : > { %2259 = vmatprep.subr.mxu1 %v942_v32  ;;  %2186 = vmatprep.subr.mxu0 %v932_v29  ;;  %v1034_v29 = vld [vmem:[#allocation15 + $0x178] sm:$0xff] }
 0x6f6   : > { %2260 = vmatpush1.msra.mxu1 %v941_v48  ;;  %2187 = vmatpush1.msra.mxu0 %v931_v46  ;;  %v1049_v46 = vld [vmem:[#allocation15 + $0x1f0] sm:$0xff] }
 0x6f7   : > { %2261 = vmatprep.subr.mxu1 %v938_v24  ;;  %2188 = vmatprep.subr.mxu0 %v928_v3  ;;  %v1033_v3 = vld [vmem:[#allocation15 + $0x170] sm:$0xff] }
 0x6f8   : > { %2262 = vmatpush1.msra.mxu1 %v937_v16  ;;  %2189 = vmatpush1.msra.mxu0 %v927_v33 }
 0x6f9   : > { %2263 = vmatprep.subr.mxu1 %v934_v49  ;;  %2190 = vmatprep.subr.mxu0 %v924_v26  ;;  %v1002_v49 = vld [vmem:[#allocation15 + $0x78] sm:$0xff]  ;;  %v1016_v26 = vld [vmem:[#allocation15 + $0xe8] sm:$0xff] }
 0x6fa   : > { %2264 = vmatpush1.msra.mxu1 %v933_v42  ;;  %2191 = vmatpush1.msra.mxu0 %v923_v40  ;;  %v1017_v42 = vld [vmem:[#allocation15 + $0xf0] sm:$0xff]  ;;  %v1000_v40 = vld [vmem:[#allocation15 + $0x68] sm:$0xff] }
 0x6fb   : > { %2265 = vmatprep.subr.mxu1 %v930_v37  ;;  %5730 = vmatprep.subr.mxu0 %v1018_v45  ;;  %v1001_v37 = vld [vmem:[#allocation15 + $0x70] sm:$0xff]  ;;  %v1031_v45 = vld [vmem:[#allocation15 + $0x160] sm:$0xff] }
 0x6fc   : > { %2266 = vmatpush1.msra.mxu1 %v929_v35 }
 0x6fd   : > { %2267 = vmatprep.subr.mxu1 %v926_v43  ;;  %v1032_v43 = vld [vmem:[#allocation15 + $0x168] sm:$0xff] }
 0x6fe   : > { %2268 = vmatpush1.msra.mxu1 %v925_v30  ;;  %v1047_v30 = vld [vmem:[#allocation15 + $0x1e0] sm:$0xff] }
 0x6ff   : > { %5768 = vmatprep.subr.mxu1 %v1050_v44  ;;  %v1015_v44 = vld [vmem:[#allocation15 + $0xe0] sm:$0xff] }
 0x778   : > { %v2149_v51 = vpop.xlane.xlu0 %2148 }
 0x779   : > { %v2152_v32 = vmul.f32 0.0078125, %v2149_v51  ;;  %v999_v51 = vld [vmem:[#allocation15 + $0x60] sm:$0xff] }
 0x77b   : > { %v2154_v25 = vadd.f32 1e-05, %v2152_v32  ;;  %v1046_v32 = vld [vmem:[#allocation15 + $0x1d8] sm:$0xff] }
 0x77d   : > { %6756 = vrsqrt.f32 %v2154_v25  ;;  %v2151_v48 = vpop.xlane.xlu1 %2150  ;;  %v1030_v25 = vld [vmem:[#allocation15 + $0x158] sm:$0xff] }
 0x77e   : > { %v2153_v8 = vmul.f32 0.0078125, %v2151_v48  ;;  %v998_v48 = vld [vmem:[#allocation15 + $0x58] sm:$0xff] }
 0x780   : > { %v2155_v24 = vadd.f32 1e-05, %v2153_v8  ;;  %v1045_v8 = vld [vmem:[#allocation15 + $0x1d0] sm:$0xff] }
 0x782   : > { %6758 = vrsqrt.f32 %v2155_v24  ;;  %v1013_v24 = vld [vmem:[#allocation15 + $0xd0] sm:$0xff] }
 0x78a   : > { %v6757_v50 = vpop.eup %6756 }
 0x78b   : > { %v2158_v16 = vmul.f32 %v6757_v50, %v8465_v31  ;;  %v1048_v31 = vld [vmem:[#allocation15 + $0x1e8] sm:$0xff]  ;;  %v1029_v50 = vld [vmem:[#allocation15 + $0x150] sm:$0xff] }
 0x78d   : > { %2225 = vmatmul.mubr.f32.vlgmr.msra.gmra.mxu0 %v2158_v16  ;;  %2302 = vmatmul.mubr.f32.vlgmr.msra.gmra.mxu1 %v2158_v16  ;;  %v997_v16 = vld [vmem:[#allocation15 + $0x50] sm:$0xff] }
 0x78e   : > { %2230 = vmatprep.mubr.f32.mxu0 %v9402_v38  ;;  %2307 = vmatprep.mubr.f32.mxu1 %v9402_v38 }
 0x78f   : > { %v6759_v33 = vpop.eup %6758  ;;  %5769 = vmatpush3.msra.mxu1 %v1034_v29  ;;  %5731 = vmatpush3.msra.mxu0 %v1002_v49  ;;  %v1044_v29 = vld [vmem:[#allocation15 + $0x1c8] sm:$0xff] }
 0x790   : > { %v2159_v35 = vmul.f32 %v6759_v33, %v8470_v4  ;;  %5770 = vmatprep.subr.mxu1 %v1049_v46  ;;  %5732 = vmatprep.subr.mxu0 %v1017_v42  ;;  %v1014_v4 = vld [vmem:[#allocation15 + $0xd8] sm:$0xff]  ;;  %v1012_v49 = vld [vmem:[#allocation15 + $0xc8] sm:$0xff]  ;;  %v1027_v33 = vld [vmem:[#allocation15 + $0x140] sm:$0xff] }
 0x791   : > { %5771 = vmatpush3.msra.mxu1 %v1033_v3  ;;  %5733 = vmatpush3.msra.mxu0 %v1001_v37  ;;  %v1028_v46 = vld [vmem:[#allocation15 + $0x148] sm:$0xff]  ;;  %v1043_v3 = vld [vmem:[#allocation15 + $0x1c0] sm:$0xff] }
 0x792   : > { %2231 = vmatmul.mubr.f32.gmra.mxu0 %v2159_v35  ;;  %2308 = vmatmul.mubr.f32.gmra.mxu1 %v2159_v35  ;;  %v996_v42 = vld [vmem:[#allocation15 + $0x48] sm:$0xff]  ;;  %v1011_v37 = vld [vmem:[#allocation15 + $0xc0] sm:$0xff] }
 0x793   : > { %5772 = vmatprep.subr.mxu1 %v1048_v31  ;;  %5734 = vmatprep.subr.mxu0 %v1016_v26  ;;  %v995_v35 = vld [vmem:[#allocation15 + $0x40] sm:$0xff]  ;;  %v1042_v31 = vld [vmem:[#allocation15 + $0x1b8] sm:$0xff] }
 0x794   : > { %5773 = vmatpush3.msra.mxu1 %v1032_v43  ;;  %5735 = vmatpush3.msra.mxu0 %v1000_v40  ;;  %v1010_v26 = vld [vmem:[#allocation15 + $0xb8] sm:$0xff] }
 0x795   : > { %5774 = vmatprep.subr.mxu1 %v1047_v30  ;;  %5736 = vmatprep.subr.mxu0 %v1015_v44  ;;  %v1026_v43 = vld [vmem:[#allocation15 + $0x138] sm:$0xff]  ;;  %v1041_v30 = vld [vmem:[#allocation15 + $0x1b0] sm:$0xff] }
 0x796   : > { %5775 = vmatpush3.msra.mxu1 %v1031_v45  ;;  %5737 = vmatpush3.msra.mxu0 %v999_v51  ;;  %v994_v40 = vld [vmem:[#allocation15 + $0x38] sm:$0xff]  ;;  %v1009_v44 = vld [vmem:[#allocation15 + $0xb0] sm:$0xff] }
 0x797   : > { %5776 = vmatprep.subr.mxu1 %v1046_v32  ;;  %5738 = vmatprep.subr.mxu0 %v1014_v4  ;;  %v1025_v45 = vld [vmem:[#allocation15 + $0x130] sm:$0xff]  ;;  %v1040_v32 = vld [vmem:[#allocation15 + $0x1a8] sm:$0xff] }
 0x798   : > { %5777 = vmatpush3.msra.mxu1 %v1030_v25  ;;  %5739 = vmatpush3.msra.mxu0 %v998_v48  ;;  %v993_v51 = vld [vmem:[#allocation15 + $0x30] sm:$0xff]  ;;  %v1008_v4 = vld [vmem:[#allocation15 + $0xa8] sm:$0xff] }
 0x799   : > { %5778 = vmatprep.subr.mxu1 %v1045_v8  ;;  %5740 = vmatprep.subr.mxu0 %v1013_v24  ;;  %v1024_v25 = vld [vmem:[#allocation15 + $0x128] sm:$0xff]  ;;  %v1039_v8 = vld [vmem:[#allocation15 + $0x1a0] sm:$0xff] }
 0x79a   : > { %5779 = vmatpush3.msra.mxu1 %v1029_v50  ;;  %5741 = vmatpush3.msra.mxu0 %v997_v16  ;;  %v992_v48 = vld [vmem:[#allocation15 + $0x28] sm:$0xff]  ;;  %v1007_v24 = vld [vmem:[#allocation15 + $0xa0] sm:$0xff] }
 0x79b   : > { %5780 = vmatprep.subr.mxu1 %v1044_v29  ;;  %5742 = vmatprep.subr.mxu0 %v1012_v49  ;;  %v1023_v50 = vld [vmem:[#allocation15 + $0x120] sm:$0xff]  ;;  %v1038_v29 = vld [vmem:[#allocation15 + $0x198] sm:$0xff] }
 0x79c   : > { %5781 = vmatpush3.msra.mxu1 %v1028_v46  ;;  %5743 = vmatpush3.msra.mxu0 %v996_v42  ;;  %v991_v16 = vld [vmem:[#allocation15 + $0x20] sm:$0xff]  ;;  %v1006_v49 = vld [vmem:[#allocation15 + $0x98] sm:$0xff] }
 0x79d   : > { %5782 = vmatprep.subr.mxu1 %v1043_v3  ;;  %5744 = vmatprep.subr.mxu0 %v1011_v37  ;;  %v1022_v46 = vld [vmem:[#allocation15 + $0x118] sm:$0xff]  ;;  %v1037_v3 = vld [vmem:[#allocation15 + $0x190] sm:$0xff] }
 0x79e   : > { %5783 = vmatpush3.msra.mxu1 %v1027_v33  ;;  %5745 = vmatpush3.msra.mxu0 %v995_v35  ;;  %v990_v42 = vld [vmem:[#allocation15 + $0x18] sm:$0xff]  ;;  %v1005_v37 = vld [vmem:[#allocation15 + $0x90] sm:$0xff] }
 0x79f   : > { %5784 = vmatprep.subr.mxu1 %v1042_v31  ;;  %5746 = vmatprep.subr.mxu0 %v1010_v26  ;;  %v1021_v33 = vld [vmem:[#allocation15 + $0x110] sm:$0xff]  ;;  %v1036_v31 = vld [vmem:[#allocation15 + $0x188] sm:$0xff] }
 0x7a0   : > { %5785 = vmatpush3.msra.mxu1 %v1026_v43  ;;  %5747 = vmatpush3.msra.mxu0 %v994_v40  ;;  %v989_v35 = vld [vmem:[#allocation15 + $0x10] sm:$0xff]  ;;  %v1004_v26 = vld [vmem:[#allocation15 + $0x88] sm:$0xff] }
 0x7a1   : > { %5786 = vmatprep.subr.mxu1 %v1041_v30  ;;  %5748 = vmatprep.subr.mxu0 %v1009_v44  ;;  %v1020_v43 = vld [vmem:[#allocation15 + $0x108] sm:$0xff]  ;;  %v1035_v30 = vld [vmem:[#allocation15 + $0x180] sm:$0xff] }
 0x7a2   : > { %5787 = vmatpush3.msra.mxu1 %v1025_v45  ;;  %5749 = vmatpush3.msra.mxu0 %v993_v51  ;;  %v988_v40 = vld [vmem:[#allocation15 + $0x8] sm:$0xff]  ;;  %v1003_v44 = vld [vmem:[#allocation15 + $0x80] sm:$0xff] }
 0x7a3   : > { %5788 = vmatprep.subr.mxu1 %v1040_v32  ;;  %5750 = vmatprep.subr.mxu0 %v1008_v4  ;;  %v1019_v45 = vld [vmem:[#allocation15 + $0x100] sm:$0xff]  ;;  %v6798_v32 = vld [vmem:[#allocation9 + $0x78] sm:$0xff] }
 0x7a4   : > { %5789 = vmatpush3.msra.mxu1 %v1024_v25  ;;  %5751 = vmatpush3.msra.mxu0 %v992_v48  ;;  %v987_v51 = vld [vmem:[#allocation15] sm:$0xff] }
 0x7a5   : > { %5790 = vmatprep.subr.mxu1 %v1039_v8  ;;  %5752 = vmatprep.subr.mxu0 %v1007_v24 }
 0x7a6   : > { %5791 = vmatpush3.msra.mxu1 %v1023_v50  ;;  %5753 = vmatpush3.msra.mxu0 %v991_v16 }
 0x7a7   : > { %5792 = vmatprep.subr.mxu1 %v1038_v29  ;;  %5754 = vmatprep.subr.mxu0 %v1006_v49 }
 0x7a8   : > { %5793 = vmatpush3.msra.mxu1 %v1022_v46  ;;  %5755 = vmatpush3.msra.mxu0 %v990_v42 }
 0x7a9   : > { %5794 = vmatprep.subr.mxu1 %v1037_v3  ;;  %5756 = vmatprep.subr.mxu0 %v1005_v37 }
 0x7aa   : > { %5795 = vmatpush3.msra.mxu1 %v1021_v33  ;;  %5757 = vmatpush3.msra.mxu0 %v989_v35  ;;  %v6799_v35 = vld [vmem:[#allocation9 + $0x70] sm:$0xff] }
 0x7ab   : > { %5796 = vmatprep.subr.mxu1 %v1036_v31  ;;  %5758 = vmatprep.subr.mxu0 %v1004_v26 }
 0x7ac   : > { %5797 = vmatpush3.msra.mxu1 %v1020_v43  ;;  %5759 = vmatpush3.msra.mxu0 %v988_v40  ;;  %v6800_v43 = vld [vmem:[#allocation9 + $0x68] sm:$0xff]  ;;  %v6802_v40 = vld [vmem:[#allocation9 + $0x58] sm:$0xff] }
 0x7ad   : > { %5798 = vmatprep.subr.mxu1 %v1035_v30  ;;  %5760 = vmatprep.subr.mxu0 %v1003_v44  ;;  %v6803_v30 = vld [vmem:[#allocation9 + $0x50] sm:$0xff]  ;;  %v6805_v44 = vld [vmem:[#allocation9 + $0x40] sm:$0xff] }
 0x7ae   : > { %5799 = vmatpush3.msra.mxu1 %v1019_v45  ;;  %5761 = vmatpush3.msra.mxu0 %v987_v51  ;;  %v6806_v45 = vld [vmem:[#allocation9 + $0x38] sm:$0xff]  ;;  %v6807_v51 = vld [vmem:[#allocation9 + $0x30] sm:$0xff] }
 0x7af   : > { %6205 = vmatprep.subr.mxu1 %v9402_v38  ;;  %6170 = vmatprep.subr.mxu0 %v6798_v32 }
 0x84d   : > { %v2226_v4 = vpop.f32.mrf.mxu0  ;;  %v2303_v25 = vpop.f32.mrf.mxu1 }
 0x84e   : > { %v2314_v16 = vmax.f32 %v2226_v4, 0.0  ;;  %v2316_v29 = vmax.f32 %v2303_v25, 0.0  ;;  %v6809_v4 = vld [vmem:[#allocation9 + $0x20] sm:$0xff]  ;;  %v6810_v25 = vld [vmem:[#allocation9 + $0x18] sm:$0xff] }
 0x84f   : > { %v2228_v48 = vpop.f32.mrf.mxu0  ;;  %v2305_v8 = vpop.f32.mrf.mxu1 }
 0x850   : > { %v2315_v24 = vmax.f32 %v2228_v48, 0.0  ;;  %v2317_v50 = vmax.f32 %v2305_v8, 0.0  ;;  %v6811_v48 = vld [vmem:[#allocation9 + $0x10] sm:$0xff]  ;;  %v6812_v8 = vld [vmem:[#allocation9 + $0x8] sm:$0xff] }
 0x852   : > { %2386 = vmatprep.mubr.f32.mxu0 %v2315_v24  ;;  %2461 = vmatprep.mubr.f32.mxu1 %v2317_v50  ;;  %v2232_v49 = vpop.f32.mrf.mxu0  ;;  %v2309_v46 = vpop.f32.mrf.mxu1  ;;  %v6813_v24 = vld [vmem:[#allocation9] sm:$0xff]  ;;  %v6814_v50 = vld [vmem:[#allocation11 + $0x2f8] sm:$0xff] }
 0x853   : > { %2387 = vmatmul.mubr.f32.vlgmr.msra.gmra.mxu0 %v2314_v16  ;;  %2462 = vmatmul.mubr.f32.vlgmr.msra.gmra.mxu1 %v2316_v29  ;;  %v2318_v31 = vmax.f32 %v2232_v49, 0.0  ;;  %v2320_v26 = vmax.f32 %v2309_v46, 0.0 }
 0x854   : > { %6206 = vmatpush3.xpose.msra.mxu1 %v8396_v34  ;;  %v2234_v42 = vpop.f32.mrf.mxu0  ;;  %v2311_v3 = vpop.f32.mrf.mxu1  ;;  %6171 = vmatpush3.msra.mxu0 %v6798_v32  ;;  %v6801_v34 = vld [vmem:[#allocation9 + $0x60] sm:$0xff]  ;;  %v6808_v32 = vld [vmem:[#allocation9 + $0x28] sm:$0xff] }
 0x855   : > { %v2319_v37 = vmax.f32 %v2234_v42, 0.0  ;;  %v2321_v33 = vmax.f32 %v2311_v3, 0.0  ;;  %6207 = vmatprep.subr.mxu1 %v9402_v38  ;;  %6172 = vmatprep.subr.mxu0 %v6799_v35 }
 0x856   : > { %6173 = vmatpush3.msra.mxu0 %v6799_v35 }
 0x857   : > { %2391 = vmatprep.mubr.f32.mxu0 %v2319_v37  ;;  %2466 = vmatprep.mubr.f32.mxu1 %v2321_v33 }
 0x858   : > { %6208 = vmatpush3.xpose.msra.mxu1 %v8392_v18  ;;  %2392 = vmatmul.mubr.f32.gmra.mxu0 %v2318_v31  ;;  %v6804_v18 = vld [vmem:[#allocation9 + $0x48] sm:$0xff] }
 0x859   : > { %2467 = vmatmul.mubr.f32.gmra.mxu1 %v2320_v26  ;;  %6174 = vmatprep.subr.mxu0 %v6800_v43 }
 0x85a   : > { %6175 = vmatpush3.msra.mxu0 %v6800_v43  ;;  %6209 = vmatprep.mubr.msk.f32.mxu1 %vm7487_vm1, %v9402_v38 }
 0x85b   : > { %6176 = vmatprep.subr.mxu0 %v6801_v34  ;;  %6212 = vmatprep.subr.mxu1 %v9402_v38 }
 0x85c   : > { %6177 = vmatpush3.msra.mxu0 %v6801_v34 }
 0x85d   : > { %6178 = vmatprep.subr.mxu0 %v6802_v40 }
 0x85e   : > { %6179 = vmatpush3.msra.mxu0 %v6802_v40 }
 0x85f   : > { %6180 = vmatprep.subr.mxu0 %v6803_v30 }
 0x860   : > { %6181 = vmatpush3.msra.mxu0 %v6803_v30 }
 0x861   : > { %6182 = vmatprep.subr.mxu0 %v6804_v18 }
 0x862   : > { %6183 = vmatpush3.msra.mxu0 %v6804_v18 }
 0x863   : > { %6184 = vmatprep.subr.mxu0 %v6805_v44 }
 0x864   : > { %6185 = vmatpush3.msra.mxu0 %v6805_v44 }
 0x865   : > { %6186 = vmatprep.subr.mxu0 %v6806_v45 }
 0x866   : > { %6187 = vmatpush3.msra.mxu0 %v6806_v45 }
 0x867   : > { %6188 = vmatprep.subr.mxu0 %v6807_v51 }
 0x868   : > { %6189 = vmatpush3.msra.mxu0 %v6807_v51 }
 0x869   : > { %6190 = vmatprep.subr.mxu0 %v6808_v32 }
 0x86a   : > { %6191 = vmatpush3.msra.mxu0 %v6808_v32 }
 0x86b   : > { %6192 = vmatprep.subr.mxu0 %v6809_v4 }
 0x86c   : > { %6193 = vmatpush3.msra.mxu0 %v6809_v4 }
 0x86d   : > { %6194 = vmatprep.subr.mxu0 %v6810_v25 }
 0x86e   : > { %6195 = vmatpush3.msra.mxu0 %v6810_v25 }
 0x86f   : > { %6196 = vmatprep.subr.mxu0 %v6811_v48 }
 0x870   : > { %6197 = vmatpush3.msra.mxu0 %v6811_v48 }
 0x871   : > { %6198 = vmatprep.subr.mxu0 %v6812_v8 }
 0x872   : > { %6199 = vmatpush3.msra.mxu0 %v6812_v8 }
 0x873   : > { %6200 = vmatprep.subr.mxu0 %v6813_v24 }
 0x874   : > { %6201 = vmatpush3.msra.mxu0 %v6813_v24 }
 0x875   : > { %5836 = vmatprep.subr.mxu0 %v6814_v50 }
 0x913   : > { %v5762_v16 = vpop.f32.mrf.mxu0  ;;  %v5800_v29 = vpop.f32.mrf.mxu1 }
 0x915   : > { %v5763_v49 = vpop.f32.mrf.mxu0  ;;  %v5801_v46 = vpop.f32.mrf.mxu1 }
 0x916   : > { %v5764_v42 = vadd.f32 %v5763_v49, %v5762_v16  ;;  %v5802_v3 = vadd.f32 %v5801_v46, %v5800_v29 }
 0x918   : > { %v2464_v37 = vadd.f32 %v5802_v3, %v5764_v42  ;;  %v5765_v33 = vpop.f32.mrf.mxu0 }
 0x919   : > { %v5803_v35 = vpop.f32.mrf.mxu1 }
 0x91a   : > { %v8486_v31 = vadd.f32 %v2464_v37, %v8457_v52  ;;  %v5766_v26 = vpop.f32.mrf.mxu0  ;;  %v6815_v37 = vld [vmem:[#allocation11 + $0x178] sm:$0xff] }
 0x91b   : > { %v5804_v43 = vpop.f32.mrf.mxu1  ;;  %v5767_v34 = vadd.f32 %v5766_v26, %v5765_v33  ;;  %v6816_v33 = vld [vmem:[#allocation11 + $0x2e0] sm:$0xff]  ;;  %v6818_v26 = vld [vmem:[#allocation11 + $0x2c8] sm:$0xff] }
 0x91c   : > { %v5805_v40 = vadd.f32 %v5804_v43, %v5803_v35  ;;  %2474 = vadd.xlane.f32.xlu0 %v8486_v31  ;;  %v6817_v35 = vld [vmem:[#allocation11 + $0x160] sm:$0xff]  ;;  %v6819_v43 = vld [vmem:[#allocation11 + $0x148] sm:$0xff] }
 0x91e   : > { %v2469_v30 = vadd.f32 %v5805_v40, %v5767_v34  ;;  %v6820_v34 = vld [vmem:[#allocation11 + $0x2b0] sm:$0xff] }
 0x91f   : > { %v6821_v40 = vld [vmem:[#allocation11 + $0x130] sm:$0xff] }
 0x920   : > { %v8490_v18 = vadd.f32 %v2469_v30, %v8461_v17  ;;  %v6822_v30 = vld [vmem:[#allocation11 + $0x298] sm:$0xff] }
 0x922   : > { %2476 = vadd.xlane.f32.xlu1 %v8490_v18 }
 0x9a5   : > { %v2475_v44 = vpop.xlane.xlu0 %2474 }
 0x9a6   : > { %v2478_v45 = vmul.f32 0.0078125, %v2475_v44  ;;  %v6823_v44 = vld [vmem:[#allocation11 + $0x118] sm:$0xff] }
 0x9a8   : > { %v2480_v51 = vsub.f32 %v8486_v31, %v2478_v45  ;;  %v6824_v45 = vld [vmem:[#allocation11 + $0x280] sm:$0xff] }
 0x9aa   : > { %v2482_v32 = vmul.f32 %v2480_v51, %v2480_v51 }
 0x9ab   : > { %v2477_v4 = vpop.xlane.xlu1 %2476 }
 0x9ac   : > { %2484 = vadd.xlane.f32.xlu0 %v2482_v32  ;;  %v2479_v52 = vmul.f32 0.0078125, %v2477_v4  ;;  %v6826_v32 = vld [vmem:[#allocation11 + $0x268] sm:$0xff] }
 0x9ad   : > { %v6827_v4 = vld [vmem:[#allocation11 + $0xe8] sm:$0xff] }
 0x9ae   : > { %v2481_v25 = vsub.f32 %v8490_v18, %v2479_v52  ;;  %v6828_v52 = vld [vmem:[#allocation11 + $0x250] sm:$0xff] }
 0x9b0   : > { %v2483_v48 = vmul.f32 %v2481_v25, %v2481_v25 }
 0x9b2   : > { %2486 = vadd.xlane.f32.xlu1 %v2483_v48  ;;  %v6830_v48 = vld [vmem:[#allocation11 + $0x238] sm:$0xff] }
 0xa35   : > { %v2485_v8 = vpop.xlane.xlu0 %2484 }
 0xa36   : > { %v2488_v24 = vmul.f32 0.0078125, %v2485_v8  ;;  %v6831_v8 = vld [vmem:[#allocation11 + $0xb8] sm:$0xff] }
 0xa38   : > { %v2490_v50 = vadd.f32 1e-05, %v2488_v24  ;;  %v6832_v24 = vld [vmem:[#allocation11 + $0x220] sm:$0xff] }
 0xa3a   : > { %6760 = vrsqrt.f32 %v2490_v50  ;;  %v6833_v50 = vld [vmem:[#allocation11 + $0xa0] sm:$0xff] }
 0xa3b   : > { %v2487_v17 = vpop.xlane.xlu1 %2486 }
 0xa3c   : > { %v2489_v16 = vmul.f32 0.0078125, %v2487_v17  ;;  %v6834_v17 = vld [vmem:[#allocation11 + $0x208] sm:$0xff] }
 0xa3e   : > { %v2491_v29 = vadd.f32 1e-05, %v2489_v16  ;;  %v6835_v16 = vld [vmem:[#allocation11 + $0x88] sm:$0xff] }
 0xa40   : > { %6762 = vrsqrt.f32 %v2491_v29  ;;  %v6836_v29 = vld [vmem:[#allocation11 + $0x1f0] sm:$0xff] }
 0xa47   : > { %v6761_v49 = vpop.eup %6760 }
 0xa48   : > { %v2494_v46 = vmul.f32 %v6761_v49, %v2480_v51  ;;  %v6825_v51 = vld [vmem:[#allocation11 + $0x100] sm:$0xff]  ;;  %v6837_v49 = vld [vmem:[#allocation11 + $0x70] sm:$0xff] }
 0xa4a   : > { %6202 = vmatprep.mubr.f32.mxu0 %v2494_v46  ;;  %v6838_v46 = vld [vmem:[#allocation11 + $0x1d8] sm:$0xff] }
 0xa4d   : > { %v6763_v42 = vpop.eup %6762 }
 0xa4e   : > { %v2495_v3 = vmul.f32 %v6763_v42, %v2481_v25  ;;  %v6829_v25 = vld [vmem:[#allocation11 + $0xd0] sm:$0xff]  ;;  %v6839_v42 = vld [vmem:[#allocation11 + $0x58] sm:$0xff] }
 0xa50   : > { %6203 = vmatmul.mubr.f32.vlgmr.msra.gmra.mxu0 %v2495_v3  ;;  %v6840_v3 = vld [vmem:[#allocation11 + $0x1c0] sm:$0xff] }
 0xa51   : > { %3048 = vmatprep.mubr.f32.mxu0 %v8486_v31  ;;  %5837 = vmatpush3.msra.mxu0 %v6815_v37  ;;  %v6841_v37 = vld [vmem:[#allocation11 + $0x40] sm:$0xff] }
 0xa52   : > { %5838 = vmatprep.subr.mxu0 %v6816_v33  ;;  %v6842_v33 = vld [vmem:[#allocation11 + $0x1a8] sm:$0xff] }
 0xa53   : > { %5839 = vmatpush3.msra.mxu0 %v6817_v35  ;;  %v6843_v35 = vld [vmem:[#allocation11 + $0x28] sm:$0xff] }
 0xa54   : > { %5840 = vmatprep.subr.mxu0 %v6818_v26  ;;  %v6844_v26 = vld [vmem:[#allocation11 + $0x190] sm:$0xff] }
 0xa55   : > { %5841 = vmatpush3.msra.mxu0 %v6819_v43  ;;  %v6845_v43 = vld [vmem:[#allocation11 + $0x10] sm:$0xff] }
 0xa56   : > { %5842 = vmatprep.subr.mxu0 %v6820_v34  ;;  %v8496_v34 = vld [vmem:[#allocation12 + $0x78] sm:$0xff] }
 0xa57   : > { %5843 = vmatpush3.msra.mxu0 %v6821_v40 }
 0xa58   : > { %5844 = vmatprep.subr.mxu0 %v6822_v30 }
 0xa59   : > { %5845 = vmatpush3.msra.mxu0 %v6823_v44 }
 0xa5a   : > { %5846 = vmatprep.subr.mxu0 %v6824_v45 }
 0xa5b   : > { %5847 = vmatpush3.msra.mxu0 %v6825_v51 }
 0xa5c   : > { %5848 = vmatprep.subr.mxu0 %v6826_v32 }
 0xa5d   : > { %5849 = vmatpush3.msra.mxu0 %v6827_v4 }
 0xa5e   : > { %5850 = vmatprep.subr.mxu0 %v6828_v52 }
 0xa5f   : > { %5851 = vmatpush3.msra.mxu0 %v6829_v25 }
 0xa60   : > { %5852 = vmatprep.subr.mxu0 %v6830_v48 }
 0xa61   : > { %5853 = vmatpush3.msra.mxu0 %v6831_v8 }
 0xa62   : > { %5854 = vmatprep.subr.mxu0 %v6832_v24 }
 0xa63   : > { %5855 = vmatpush3.msra.mxu0 %v6833_v50 }
 0xa64   : > { %5856 = vmatprep.subr.mxu0 %v6834_v17 }
 0xa65   : > { %5857 = vmatpush3.msra.mxu0 %v6835_v16 }
 0xa66   : > { %5858 = vmatprep.subr.mxu0 %v6836_v29 }
 0xa67   : > { %5859 = vmatpush3.msra.mxu0 %v6837_v49 }
 0xa68   : > { %5860 = vmatprep.subr.mxu0 %v6838_v46 }
 0xa69   : > { %5861 = vmatpush3.msra.mxu0 %v6839_v42 }
 0xa6a   : > { %5862 = vmatprep.subr.mxu0 %v6840_v3 }
 0xa6b   : > { %5863 = vmatpush3.msra.mxu0 %v6841_v37 }
 0xa6c   : > { %5864 = vmatprep.subr.mxu0 %v6842_v33 }
 0xa6d   : > { %5865 = vmatpush3.msra.mxu0 %v6843_v35 }
 0xa6e   : > { %5866 = vmatprep.subr.mxu0 %v6844_v26 }
 0xa6f   : > { %5867 = vmatpush3.msra.mxu0 %v6845_v43 }
 0xa70   : > { %6233 = vmatprep.subr.mxu0 %v8496_v34 }
 0xb10   : > { %v6204_v40 = vpop.f32.mrf.mxu0 }
 0xb12   : > { %v2562_v30 = vpop.f32.mrf.mxu0 }
 0xb13   : > { %6210 = vmatmul.mubr.f32.vlgmr.msra.gmra.mxu1 %v2562_v30 }
 0xb14   : > { %6213 = vmatpush3.xpose.msra.mxu1 %v8412_v39  ;;  %6216 = vmatprep.mubr.msk.f32.mxu1 %vm7487_vm1, %v9402_v38 }
 0xb15   : > { %6214 = vmatprep.subr.mxu1 %v9402_v38 }
 0xb18   : > { %6215 = vmatpush3.xpose.msra.mxu1 %v8403_v36 }
 0xb19   : > { %6219 = vmatprep.subr.mxu1 %v9402_v38 }
 0xb1b   : > { %6217 = vmatmul.mubr.f32.vlgmr.msra.gmra.mxu1 %v6204_v40 }
 0xb1c   : > { %6220 = vmatpush3.msra.mxu1 %v8399_v47  ;;  %6223 = vmatprep.mubr.msk.f32.mxu1 %vm7487_vm1, %v9402_v38 }
 0xb1d   : > { %6221 = vmatprep.subr.mxu1 %v9402_v38 }
 0xb1e   : > { %6222 = vmatpush3.msra.mxu1 %v8394_v27 }
 0xb1f   : > { %6226 = vmatprep.subr.mxu1 %v9402_v38 }
 0xbd3   : > { %v2637_v39 = vpop.f32.mrf.mxu1 }
 0xbd4   : > { %v2711_v44 = vsel %vm1676_vm2, %v2637_v39, -inf }
 0xbd5   : > { %v2712_v45 = vrot.slane %v2711_v44, 4  ;;  %v6211_v51 = vpop.f32.mrf.mxu1 }
 0xbd7   : > { %v2713_v36 = vmax.f32 %v2711_v44, %v2712_v45 }
 0xbd9   : > { %v2714_v32 = vrot.slane %v2713_v36, 2 }
 0xbdb   : > { %v2715_v4 = vmax.f32 %v2713_v36, %v2714_v32  ;;  %v2707_v52 = vpop.f32.mrf.mxu1 }
 0xbdc   : > { %v2718_v47 = vsel %vm1676_vm2, %v2707_v52, -inf }
 0xbdd   : > { %v2716_v25 = vrot.slane %v2715_v4, 1  ;;  %v2719_v48 = vrot.slane %v2718_v47, 4  ;;  %v6218_v8 = vpop.f32.mrf.mxu1 }
 0xbdf   : > { %v2717_v24 = vmax.f32 %v2715_v4, %v2716_v25  ;;  %v2720_v50 = vmax.f32 %v2718_v47, %v2719_v48 }
 0xbe1   : > { %v2725_v17 = vsub.f32 %v2637_v39, %v2717_v24  ;;  %v2721_v27 = vrot.slane %v2720_v50, 2 }
 0xbe3   : > { %v2727_v16 = vmul.f32 1.442695, %v2725_v17  ;;  %v2722_v29 = vmax.f32 %v2720_v50, %v2721_v27 }
 0xbe5   : > { %6764 = vpow2.f32 %v2727_v16  ;;  %v2723_v49 = vrot.slane %v2722_v29, 1 }
 0xbe7   : > { %v2724_v46 = vmax.f32 %v2722_v29, %v2723_v49 }
 0xbe9   : > { %v2726_v42 = vsub.f32 %v2707_v52, %v2724_v46 }
 0xbeb   : > { %v2729_v3 = vmul.f32 1.442695, %v2726_v42 }
 0xbed   : > { %6766 = vpow2.f32 %v2729_v3  ;;  %v6847_v3 = vld [vmem:[#allocation11 + $0x170] sm:$0xff] }
 0xbf2   : > { %v6765_v37 = vpop.eup %6764 }
 0xbf3   : > { %v2731_v33 = vsel %vm1676_vm2, %v6765_v37, 0.0 }
 0xbf4   : > { %v2732_v35 = vrot.slane %v2731_v33, 4 }
 0xbf6   : > { %v2733_v26 = vadd.f32 %v2732_v35, %v2731_v33  ;;  %v6848_v35 = vld [vmem:[#allocation11 + $0x168] sm:$0xff] }
 0xbf8   : > { %v2734_v43 = vrot.slane %v2733_v26, 2 }
 0xbfa   : > { %v6767_v40 = vpop.eup %6766  ;;  %v2735_v30 = vadd.f32 %v2734_v43, %v2733_v26  ;;  %v6849_v26 = vld [vmem:[#allocation11 + $0x158] sm:$0xff]  ;;  %v6851_v43 = vld [vmem:[#allocation11 + $0x140] sm:$0xff] }
 0xbfb   : > { %v2738_v44 = vsel %vm1676_vm2, %v6767_v40, 0.0 }
 0xbfc   : > { %v2739_v39 = vrot.slane %v2738_v44, 4  ;;  %v2736_v45 = vrot.slane %v2735_v30, 1 }
 0xbfe   : > { %v2740_v51 = vadd.f32 %v2739_v39, %v2738_v44  ;;  %v2737_v36 = vadd.f32 %v2736_v45, %v2735_v30  ;;  %v6855_v30 = vld [vmem:[#allocation11 + $0x110] sm:$0xff]  ;;  %v6856_v44 = vld [vmem:[#allocation11 + $0x108] sm:$0xff]  ;;  %v6857_v39 = vld [vmem:[#allocation11 + $0xf8] sm:$0xff] }
 0xbff   : > { %v6858_v45 = vld [vmem:[#allocation11 + $0xf0] sm:$0xff] }
 0xc00   : > { %v2741_v32 = vrot.slane %v2740_v51, 2  ;;  %6768 = vrcp.f32 %v2737_v36  ;;  %v6860_v36 = vld [vmem:[#allocation11 + $0xd8] sm:$0xff] }
 0xc02   : > { %v2742_v4 = vadd.f32 %v2741_v32, %v2740_v51  ;;  %v6859_v51 = vld [vmem:[#allocation11 + $0xe0] sm:$0xff]  ;;  %v6861_v32 = vld [vmem:[#allocation11 + $0xc8] sm:$0xff] }
 0xc04   : > { %v2743_v52 = vrot.slane %v2742_v4, 1 }
 0xc06   : > { %v2744_v47 = vadd.f32 %v2743_v52, %v2742_v4  ;;  %v6862_v4 = vld [vmem:[#allocation11 + $0xc0] sm:$0xff]  ;;  %v6863_v52 = vld [vmem:[#allocation11 + $0xb0] sm:$0xff] }
 0xc08   : > { %6770 = vrcp.f32 %v2744_v47  ;;  %v6864_v47 = vld [vmem:[#allocation11 + $0xa8] sm:$0xff] }
 0xc0d   : > { %v6769_v25 = vpop.eup %6768 }
 0xc0e   : > { %v2747_v48 = vmul.f32 %v6769_v25, %v6765_v37  ;;  %v6865_v25 = vld [vmem:[#allocation11 + $0x98] sm:$0xff] }
 0xc10   : > { %v2749_v8 = vadd.f32 1e-08, %v2747_v48  ;;  %v6866_v48 = vld [vmem:[#allocation11 + $0x90] sm:$0xff] }
 0xc12   : > { %v2751_v24 = vsel %vm1676_vm2, %v2749_v8, 0.0 }
 0xc13   : > { %2752 = vadd.xlane.f32.xlu0 %v2751_v24  ;;  %v6868_v24 = vld [vmem:[#allocation11 + $0x78] sm:$0xff] }
 0xc15   : > { %v6771_v50 = vpop.eup %6770 }
 0xc16   : > { %v2748_v17 = vmul.f32 %v6771_v50, %v6767_v40  ;;  %v6852_v40 = vld [vmem:[#allocation11 + $0x138] sm:$0xff]  ;;  %v6869_v50 = vld [vmem:[#allocation11 + $0x68] sm:$0xff] }
 0xc18   : > { %v2750_v27 = vadd.f32 1e-08, %v2748_v17  ;;  %v6870_v17 = vld [vmem:[#allocation11 + $0x60] sm:$0xff] }
 0xc1a   : > { %v2754_v16 = vsel %vm1676_vm2, %v2750_v27, 0.0 }
 0xc1b   : > { %2755 = vadd.xlane.f32.xlu1 %v2754_v16  ;;  %v6872_v16 = vld [vmem:[#allocation11 + $0x48] sm:$0xff] }
 0xc9c   : > { %v2753_v29 = vpop.xlane.xlu0 %2752 }
 0xc9d   : > { %6772 = vrcp.f32 %v2753_v29  ;;  %v6873_v29 = vld [vmem:[#allocation11 + $0x38] sm:$0xff] }
 0xca4   : > { %v2756_v49 = vpop.xlane.xlu1 %2755 }
 0xca5   : > { %6774 = vrcp.f32 %v2756_v49  ;;  %v6874_v49 = vld [vmem:[#allocation11 + $0x30] sm:$0xff] }
 0xcaa   : > { %v6773_v46 = vpop.eup %6772 }
 0xcab   : > { %v2759_v42 = vmul.f32 %v6773_v46, %v2749_v8  ;;  %v6867_v8 = vld [vmem:[#allocation11 + $0x80] sm:$0xff] }
 0xcac   : > { %v6875_v46 = vld [vmem:[#allocation11 + $0x20] sm:$0xff] }
 0xcad   : > { %6224 = vmatmul.mubr.msk.f32.vlgmr.msra.gmra.mxu1 %vm1676_vm2, %v2759_v42  ;;  %v6876_v42 = vld [vmem:[#allocation11 + $0x18] sm:$0xff] }
 0xcae   : > { %6227 = vmatpush3.msra.mxu1 %v8420_v41  ;;  %6230 = vmatprep.mubr.msk.f32.mxu1 %vm7487_vm1, %v9402_v38  ;;  %v6850_v41 = vld [vmem:[#allocation11 + $0x150] sm:$0xff] }
 0xcaf   : > { %6228 = vmatprep.subr.mxu1 %v9402_v38  ;;  %v6853_v38 = vld [vmem:[#allocation11 + $0x128] sm:$0xff] }
 0xcb0   : > { %6229 = vmatpush3.msra.mxu1 %v8408_v28  ;;  %v6854_v28 = vld [vmem:[#allocation11 + $0x120] sm:$0xff] }
 0xcb1   : > { %2907 = vmatprep.subr.mxu1 %v6847_v3  ;;  %v6877_v3 = vld [vmem:[#allocation11 + $0x8] sm:$0xff] }
 0xcb2   : > { %v6775_v37 = vpop.eup %6774 }
 0xcb3   : > { %v2760_v33 = vmul.f32 %v6775_v37, %v2750_v27  ;;  %v6871_v27 = vld [vmem:[#allocation11 + $0x50] sm:$0xff]  ;;  %v6878_v37 = vld [vmem:[#allocation11] sm:$0xff] }
 0xcb5   : > { %6231 = vmatmul.mubr.msk.f32.vlgmr.msra.gmra.mxu1 %vm1676_vm2, %v2760_v33  ;;  %v6879_v33 = vld [vmem:[#allocation11 + $0x2f0] sm:$0xff] }
 0xcb6   : > { %2971 = vmatprep.mubr.f32.mxu1 %v8486_v31  ;;  %2908 = vmatpush1.msra.mxu1 %v6848_v35  ;;  %v6880_v35 = vld [vmem:[#allocation11 + $0x2e8] sm:$0xff] }
 0xcb7   : > { %2909 = vmatprep.subr.mxu1 %v6849_v26  ;;  %v6881_v26 = vld [vmem:[#allocation11 + $0x2d8] sm:$0xff] }
 0xcb8   : > { %2910 = vmatpush1.msra.mxu1 %v6850_v41  ;;  %v6882_v41 = vld [vmem:[#allocation11 + $0x2d0] sm:$0xff] }
 0xcb9   : > { %2911 = vmatprep.subr.mxu1 %v6851_v43  ;;  %v6883_v43 = vld [vmem:[#allocation11 + $0x2c0] sm:$0xff] }
 0xcba   : > { %2912 = vmatpush1.msra.mxu1 %v6852_v40  ;;  %v6884_v40 = vld [vmem:[#allocation11 + $0x2b8] sm:$0xff] }
 0xcbb   : > { %2913 = vmatprep.subr.mxu1 %v6853_v38  ;;  %v6885_v38 = vld [vmem:[#allocation11 + $0x2a8] sm:$0xff] }
 0xcbc   : > { %2914 = vmatpush1.msra.mxu1 %v6854_v28  ;;  %v6886_v28 = vld [vmem:[#allocation11 + $0x2a0] sm:$0xff] }
 0xcbd   : > { %2915 = vmatprep.subr.mxu1 %v6855_v30  ;;  %v6887_v30 = vld [vmem:[#allocation11 + $0x290] sm:$0xff] }
 0xcbe   : > { %2916 = vmatpush1.msra.mxu1 %v6856_v44  ;;  %v6888_v44 = vld [vmem:[#allocation11 + $0x288] sm:$0xff] }
 0xcbf   : > { %2917 = vmatprep.subr.mxu1 %v6857_v39  ;;  %v6889_v39 = vld [vmem:[#allocation11 + $0x278] sm:$0xff] }
 0xcc0   : > { %2918 = vmatpush1.msra.mxu1 %v6858_v45  ;;  %v6890_v45 = vld [vmem:[#allocation11 + $0x270] sm:$0xff] }
 0xcc1   : > { %2919 = vmatprep.subr.mxu1 %v6859_v51  ;;  %v6891_v51 = vld [vmem:[#allocation11 + $0x260] sm:$0xff] }
 0xcc2   : > { %2920 = vmatpush1.msra.mxu1 %v6860_v36  ;;  %v6892_v36 = vld [vmem:[#allocation11 + $0x258] sm:$0xff] }
 0xcc3   : > { %2921 = vmatprep.subr.mxu1 %v6861_v32  ;;  %v6893_v32 = vld [vmem:[#allocation11 + $0x248] sm:$0xff] }
 0xcc4   : > { %2922 = vmatpush1.msra.mxu1 %v6862_v4  ;;  %v6894_v4 = vld [vmem:[#allocation11 + $0x240] sm:$0xff] }
 0xcc5   : > { %2923 = vmatprep.subr.mxu1 %v6863_v52  ;;  %v6895_v52 = vld [vmem:[#allocation11 + $0x230] sm:$0xff] }
 0xcc6   : > { %2924 = vmatpush1.msra.mxu1 %v6864_v47  ;;  %v6896_v47 = vld [vmem:[#allocation11 + $0x228] sm:$0xff] }
 0xcc7   : > { %2925 = vmatprep.subr.mxu1 %v6865_v25  ;;  %v6897_v25 = vld [vmem:[#allocation11 + $0x218] sm:$0xff] }
 0xcc8   : > { %2926 = vmatpush1.msra.mxu1 %v6866_v48  ;;  %v6898_v48 = vld [vmem:[#allocation11 + $0x210] sm:$0xff] }
 0xcc9   : > { %2927 = vmatprep.subr.mxu1 %v6867_v8  ;;  %v6899_v8 = vld [vmem:[#allocation11 + $0x200] sm:$0xff] }
 0xcca   : > { %2928 = vmatpush1.msra.mxu1 %v6868_v24  ;;  %v6900_v24 = vld [vmem:[#allocation11 + $0x1f8] sm:$0xff] }
 0xccb   : > { %2929 = vmatprep.subr.mxu1 %v6869_v50  ;;  %v6901_v50 = vld [vmem:[#allocation11 + $0x1e8] sm:$0xff] }
 0xccc   : > { %2930 = vmatpush1.msra.mxu1 %v6870_v17  ;;  %v6902_v17 = vld [vmem:[#allocation11 + $0x1e0] sm:$0xff] }
 0xccd   : > { %2931 = vmatprep.subr.mxu1 %v6871_v27  ;;  %v6903_v27 = vld [vmem:[#allocation11 + $0x1d0] sm:$0xff] }
 0xcce   : > { %2932 = vmatpush1.msra.mxu1 %v6872_v16  ;;  %v6904_v16 = vld [vmem:[#allocation11 + $0x1c8] sm:$0xff] }
 0xccf   : > { %2933 = vmatprep.subr.mxu1 %v6873_v29  ;;  %v6905_v29 = vld [vmem:[#allocation11 + $0x1b8] sm:$0xff] }
 0xcd0   : > { %2934 = vmatpush1.msra.mxu1 %v6874_v49  ;;  %v6906_v49 = vld [vmem:[#allocation11 + $0x1b0] sm:$0xff] }
 0xcd1   : > { %2935 = vmatprep.subr.mxu1 %v6875_v46  ;;  %v6907_v46 = vld [vmem:[#allocation11 + $0x1a0] sm:$0xff] }
 0xcd2   : > { %2936 = vmatpush1.msra.mxu1 %v6876_v42  ;;  %v6908_v42 = vld [vmem:[#allocation11 + $0x198] sm:$0xff] }
 0xcd3   : > { %2937 = vmatprep.subr.mxu1 %v6877_v3  ;;  %v6909_v3 = vld [vmem:[#allocation11 + $0x188] sm:$0xff] }
 0xcd4   : > { %2938 = vmatpush1.msra.mxu1 %v6878_v37  ;;  %v6910_v37 = vld [vmem:[#allocation11 + $0x180] sm:$0xff] }
 0xcd5   : > { %2939 = vmatprep.subr.mxu1 %v6879_v33 }
 0xcd6   : > { %2940 = vmatpush2.msra.mxu1 %v6880_v35 }
 0xcd7   : > { %2941 = vmatprep.subr.mxu1 %v6881_v26  ;;  %v6911_v26 = vld [vmem:[#allocation12 + $0x70] sm:$0xff] }
 0xcd8   : > { %2942 = vmatpush2.msra.mxu1 %v6882_v41  ;;  %v6912_v41 = vld [vmem:[#allocation12 + $0x68] sm:$0xff] }
 0xcd9   : > { %2943 = vmatprep.subr.mxu1 %v6883_v43  ;;  %v6913_v43 = vld [vmem:[#allocation12 + $0x60] sm:$0xff] }
 0xcda   : > { %2944 = vmatpush2.msra.mxu1 %v6884_v40 }
 0xcdb   : > { %2945 = vmatprep.subr.mxu1 %v6885_v38  ;;  %v6914_v38 = vld [vmem:[#allocation12 + $0x58] sm:$0xff] }
 0xcdc   : > { %2946 = vmatpush2.msra.mxu1 %v6886_v28  ;;  %v6915_v28 = vld [vmem:[#allocation12 + $0x50] sm:$0xff] }
 0xcdd   : > { %2947 = vmatprep.subr.mxu1 %v6887_v30  ;;  %v6916_v30 = vld [vmem:[#allocation12 + $0x48] sm:$0xff] }
 0xcde   : > { %2948 = vmatpush2.msra.mxu1 %v6888_v44  ;;  %v6917_v44 = vld [vmem:[#allocation12 + $0x40] sm:$0xff] }
 0xcdf   : > { %2949 = vmatprep.subr.mxu1 %v6889_v39  ;;  %v6918_v39 = vld [vmem:[#allocation12 + $0x38] sm:$0xff] }
 0xce0   : > { %2950 = vmatpush2.msra.mxu1 %v6890_v45  ;;  %v6919_v45 = vld [vmem:[#allocation12 + $0x30] sm:$0xff] }
 0xce1   : > { %2951 = vmatprep.subr.mxu1 %v6891_v51  ;;  %v6920_v51 = vld [vmem:[#allocation12 + $0x28] sm:$0xff] }
 0xce2   : > { %2952 = vmatpush2.msra.mxu1 %v6892_v36  ;;  %v6921_v36 = vld [vmem:[#allocation12 + $0x20] sm:$0xff] }
 0xce3   : > { %2953 = vmatprep.subr.mxu1 %v6893_v32  ;;  %v6922_v32 = vld [vmem:[#allocation12 + $0x18] sm:$0xff] }
 0xce4   : > { %2954 = vmatpush2.msra.mxu1 %v6894_v4  ;;  %v6923_v4 = vld [vmem:[#allocation12 + $0x10] sm:$0xff] }
 0xce5   : > { %2955 = vmatprep.subr.mxu1 %v6895_v52  ;;  %v6924_v52 = vld [vmem:[#allocation12 + $0x8] sm:$0xff] }
 0xce6   : > { %2956 = vmatpush2.msra.mxu1 %v6896_v47  ;;  %v6925_v47 = vld [vmem:[#allocation12] sm:$0xff] }
 0xce7   : > { %2957 = vmatprep.subr.mxu1 %v6897_v25 }
 0xce8   : > { %2958 = vmatpush2.msra.mxu1 %v6898_v48 }
 0xce9   : > { %2959 = vmatprep.subr.mxu1 %v6899_v8 }
 0xcea   : > { %2960 = vmatpush2.msra.mxu1 %v6900_v24 }
 0xceb   : > { %2961 = vmatprep.subr.mxu1 %v6901_v50 }
 0xcec   : > { %2962 = vmatpush2.msra.mxu1 %v6902_v17 }
 0xced   : > { %2963 = vmatprep.subr.mxu1 %v6903_v27 }
 0xcee   : > { %2964 = vmatpush2.msra.mxu1 %v6904_v16 }
 0xcef   : > { %2965 = vmatprep.subr.mxu1 %v6905_v29 }
 0xcf0   : > { %2966 = vmatpush2.msra.mxu1 %v6906_v49 }
 0xcf1   : > { %2967 = vmatprep.subr.mxu1 %v6907_v46 }
 0xcf2   : > { %2968 = vmatpush2.msra.mxu1 %v6908_v42 }
 0xcf3   : > { %2969 = vmatprep.subr.mxu1 %v6909_v3 }
 0xcf4   : > { %2970 = vmatpush2.msra.mxu1 %v6910_v37 }
 0xd6d   : > { %v2830_v33 = vpop.f32.mrf.mxu1 }
 0xd6e   : > { %2972 = vmatmul.mubr.f32.vlgmr.msra.gmra.mxu1 %v2830_v33  ;;  %3049 = vmatmul.mubr.f32.vlgmr.msra.gmra.mxu0 %v2830_v33 }
 0xd6f   : > { %6234 = vmatpush3.msra.mxu0 %v8496_v34  ;;  %v6225_v35 = vpop.f32.mrf.mxu1  ;;  %2977 = vmatprep.mubr.f32.mxu1 %v8490_v18 }
 0xd70   : > { %3053 = vmatprep.mubr.f32.mxu0 %v8490_v18  ;;  %6235 = vmatprep.subr.mxu0 %v6911_v26 }
 0xd71   : > { %6236 = vmatpush3.msra.mxu0 %v6911_v26 }
 0xd72   : > { %6237 = vmatprep.subr.mxu0 %v6912_v41 }
 0xd73   : > { %6238 = vmatpush3.msra.mxu0 %v6912_v41 }
 0xd74   : > { %6239 = vmatprep.subr.mxu0 %v6913_v43 }
 0xd75   : > { %v2903_v40 = vpop.f32.mrf.mxu1  ;;  %6240 = vmatpush3.msra.mxu0 %v6913_v43 }
 0xd76   : > { %2978 = vmatmul.mubr.f32.gmra.mxu1 %v2903_v40  ;;  %3054 = vmatmul.mubr.f32.gmra.mxu0 %v2903_v40 }
 0xd77   : > { %6241 = vmatprep.subr.mxu0 %v6914_v38  ;;  %v6232_v34 = vpop.f32.mrf.mxu1  ;;  %6265 = vmatprep.mubr.f32.mxu0 %v8486_v31 }
 0xd78   : > { %6242 = vmatpush3.msra.mxu0 %v6914_v38 }
 0xd79   : > { %6243 = vmatprep.subr.mxu0 %v6915_v28 }
 0xd7a   : > { %6244 = vmatpush3.msra.mxu0 %v6915_v28 }
 0xd7b   : > { %6245 = vmatprep.subr.mxu0 %v6916_v30 }
 0xd7c   : > { %6246 = vmatpush3.msra.mxu0 %v6916_v30 }
 0xd7d   : > { %6247 = vmatprep.subr.mxu0 %v6917_v44 }
 0xd7e   : > { %6248 = vmatpush3.msra.mxu0 %v6917_v44 }
 0xd7f   : > { %6249 = vmatprep.subr.mxu0 %v6918_v39 }
 0xd80   : > { %6250 = vmatpush3.msra.mxu0 %v6918_v39 }
 0xd81   : > { %6251 = vmatprep.subr.mxu0 %v6919_v45 }
 0xd82   : > { %6252 = vmatpush3.msra.mxu0 %v6919_v45 }
 0xd83   : > { %6253 = vmatprep.subr.mxu0 %v6920_v51 }
 0xd84   : > { %6254 = vmatpush3.msra.mxu0 %v6920_v51 }
 0xd85   : > { %6255 = vmatprep.subr.mxu0 %v6921_v36 }
 0xd86   : > { %6256 = vmatpush3.msra.mxu0 %v6921_v36 }
 0xd87   : > { %6257 = vmatprep.subr.mxu0 %v6922_v32 }
 0xd88   : > { %6258 = vmatpush3.msra.mxu0 %v6922_v32 }
 0xd89   : > { %6259 = vmatprep.subr.mxu0 %v6923_v4 }
 0xd8a   : > { %6260 = vmatpush3.msra.mxu0 %v6923_v4 }
 0xd8b   : > { %6261 = vmatprep.subr.mxu0 %v6924_v52 }
 0xd8c   : > { %6262 = vmatpush3.msra.mxu0 %v6924_v52 }
 0xd8d   : > { %6263 = vmatprep.subr.mxu0 %v6925_v47 }
 0xd8e   : > { %6264 = vmatpush3.msra.mxu0 %v6925_v47 }
 0xd8f   : > { %6266 = vmatmul.mubr.f32.vlgmr.msra.gmra.mxu0 %v8490_v18 }
 0xe2e   : > { %v2973_v25 = vpop.f32.mrf.mxu1  ;;  %v5868_v46 = vpop.f32.mrf.mxu0 }
 0xe2f   : > { %v5608_v48 = vmul.f32 -1.442695, %v2973_v25 }
 0xe30   : > { %v2975_v8 = vpop.f32.mrf.mxu1  ;;  %v5869_v3 = vpop.f32.mrf.mxu0 }
 0xe31   : > { %6776 = vpow2.f32 %v5608_v48  ;;  %v5610_v17 = vmul.f32 -1.442695, %v2975_v8  ;;  %v5870_v28 = vadd.f32 %v5869_v3, %v5868_v46 }
 0xe36   : > { %v2979_v24 = vpop.f32.mrf.mxu1  ;;  %v5871_v33 = vpop.f32.mrf.mxu0 }
 0xe37   : > { %v5609_v50 = vmul.f32 -1.442695, %v2979_v24 }
 0xe38   : > { %v2981_v27 = vpop.f32.mrf.mxu1  ;;  %v5872_v26 = vpop.f32.mrf.mxu0 }
 0xe39   : > { %6778 = vpow2.f32 %v5609_v50  ;;  %v5611_v49 = vmul.f32 -1.442695, %v2981_v27  ;;  %v5873_v51 = vadd.f32 %v5872_v26, %v5871_v33 }
 0xe3a   : > { %6780 = vpow2.f32 %v5610_v17 }
 0xe3e   : > { %v6777_v16 = vpop.eup %6776 }
 0xe3f   : > { %v3140_v29 = vadd.f32 1.0, %v6777_v16 }
 0xe41   : > { %6782 = vrcp.f32 %v3140_v29 }
 0xe42   : > { %6784 = vpow2.f32 %v5611_v49 }
 0xe46   : > { %v6779_v42 = vpop.eup %6778 }
 0xe47   : > { %v3141_v37 = vadd.f32 1.0, %v6779_v42  ;;  %v6781_v35 = vpop.eup %6780 }
 0xe48   : > { %v3152_v41 = vadd.f32 1.0, %v6781_v35 }
 0xe49   : > { %6786 = vrcp.f32 %v3141_v37 }
 0xe4a   : > { %6788 = vrcp.f32 %v3152_v41 }
 0xe4e   : > { %v6783_v43 = vpop.eup %6782 }
 0xe4f   : > { %v6267_v40 = vpop.f32.mrf.mxu0  ;;  %v6785_v38 = vpop.eup %6784 }
 0xe50   : > { %v3153_v44 = vadd.f32 1.0, %v6785_v38 }
 0xe51   : > { %v3125_v34 = vpop.f32.mrf.mxu0 }
 0xe52   : > { %v3158_v30 = vmul.f32 %v6783_v43, %v3125_v34 }
 0xe54   : > { %v3160_v39 = vadd.f32 %v5870_v28, %v3158_v30 }
 0xe56   : > { %v6787_v45 = vpop.eup %6786  ;;  %6790 = vtanh.f32 %v3160_v39 }
 0xe57   : > { %6792 = vrcp.f32 %v3153_v44  ;;  %v3159_v36 = vmul.f32 %v6787_v45, %v6267_v40  ;;  %v6789_v4 = vpop.eup %6788 }
 0xe58   : > { %v3164_v52 = vsub.f32 1.0, %v6789_v4  ;;  %v3168_v48 = vmul.f32 %v6789_v4, %v8486_v31 }
 0xe59   : > { %v3161_v32 = vadd.f32 %v5873_v51, %v3159_v36 }
 0xe5b   : > { %6794 = vtanh.f32 %v3161_v32 }
 0xe63   : > { %v6791_v47 = vpop.eup %6790 }
 0xe64   : > { %v6793_v25 = vpop.eup %6792  ;;  %v3166_v8 = vmul.f32 %v6791_v47, %v3164_v52 }
 0xe65   : > { %v3165_v50 = vsub.f32 1.0, %v6793_v25  ;;  %v3169_v27 = vmul.f32 %v6793_v25, %v8490_v18 }
 0xe66   : > { %v8532_v24 = vadd.f32 %v3168_v48, %v3166_v8 }
 0xe68   : > { %v6795_v17 = vpop.eup %6794  ;;  %3172 = vst [vmem:[%s7871_s30] sm:$0xff] %v8532_v24 }
 0xe69   : > { %v3167_v16 = vmul.f32 %v6795_v17, %v3165_v50  ;;  %3178 = sbr.rel (%p5612_p0) target bundleno = 6480 (0x1950), region = 140 }
 0xe6b   : > { %v8537_v29 = vadd.f32 %v3169_v27, %v3167_v16 }
 0xe6d   : > { %3173 = vst [vmem:[%s7871_s30 + $0x8] sm:$0xff] %v8537_v29 }
 0xe6e   : > { %6268 = vmatprep.subr.mxu0 %v7954_v2  ;;  %6300 = vmatprep.mubr.f32.mxu0 %v7881_v7  ;;  %v9404_v7 = vld [vmem:[#allocation52_spill] sm:$0xff]  ;;  %v9433_v31 = vld [vmem:[#allocation67_spill] sm:$0xff]  ;;  %v9434_v18 = vld [vmem:[#allocation65_spill] sm:$0xff]  ;;  %s3332_s29 = scalar_select %p3179_p2, 1, 0  ;;  %vm7489_vm4 = vmmov 0  }
 0xe6f   : > { %6269 = vmatpush3.msra.mxu0 %v7954_v2  ;;  %6303 = vmatprep.subr.mxu1 %v7987_v23  ;;  %v9418_v2 = vld [vmem:[#allocation89_spill] sm:$0xff]  ;;  %v9435_v49 = vld [vmem:[#allocation64_spill] sm:$0xff]  ;;  %v9436_v46 = vld [vmem:[#allocation62_spill] sm:$0xff]  ;;  %vm3559_vm5 = vcmask 261120   ;;  %vm4152_vm6 = vcmask 64512   ;;  %vm4853_vm7 = vcmask 785408  }
 0xe70   : > { %6270 = vmatprep.subr.mxu0 %v7952_v1  ;;  %6304 = vmatpush3.msra.mxu1 %v7987_v23  ;;  %v9432_v23 = vld [vmem:[#allocation68_spill] sm:$0xff]  ;;  %v9437_v42 = vld [vmem:[#allocation61_spill] sm:$0xff]  ;;  %v9438_v3 = vld [vmem:[#allocation59_spill] sm:$0xff]  ;;  %v3333_v8 = vstv %s3332_s29 }
 0xe71   : > { %6271 = vmatpush3.msra.mxu0 %v7952_v1  ;;  %6305 = vmatprep.subr.mxu1 %v7985_v22  ;;  %v9417_v1 = vld [vmem:[#allocation91_spill] sm:$0xff]  ;;  %v9439_v37 = vld [vmem:[#allocation58_spill] sm:$0xff]  ;;  %v9440_v33 = vld [vmem:[#allocation56_spill] sm:$0xff]  ;;  %vm3334_vm3 = vcmp.eq.s32.totalorder %v3333_v8, 1 }
 0xe72   : > { %6272 = vmatprep.subr.mxu0 %v7950_v0  ;;  %6306 = vmatpush3.msra.mxu1 %v7985_v22  ;;  %v9431_v22 = vld [vmem:[#allocation70_spill] sm:$0xff]  ;;  %v9441_v35 = vld [vmem:[#allocation55_spill] sm:$0xff]  ;;  %v9443_v34 = vld [vmem:[#allocation96_spill] sm:$0xff] }
 0xe73   : > { %6273 = vmatpush3.msra.mxu0 %v7950_v0  ;;  %6307 = vmatprep.subr.mxu1 %v7983_v21  ;;  %v9416_v0 = vld [vmem:[#allocation92_spill] sm:$0xff]  ;;  %v9442_v38 = vld [vmem:[#allocation99_spill] sm:$0xff]  ;;  %v9444_v28 = vld [vmem:[#allocation93_spill] sm:$0xff] }
 0xe74   : > { %6274 = vmatprep.subr.mxu0 %v7948_v63  ;;  %6308 = vmatpush3.msra.mxu1 %v7983_v21  ;;  %v9430_v21 = vld [vmem:[#allocation71_spill] sm:$0xff]  ;;  %v9445_v30 = vld [vmem:[#allocation90_spill] sm:$0xff]  ;;  %v9447_v39 = vld [vmem:[#allocation84_spill] sm:$0xff] }
 0xe75   : > { %6275 = vmatpush3.msra.mxu0 %v7948_v63  ;;  %6309 = vmatprep.subr.mxu1 %v7981_v20  ;;  %v9415_v63 = vld [vmem:[#allocation94_spill] sm:$0xff]  ;;  %v9446_v44 = vld [vmem:[#allocation87_spill] sm:$0xff]  ;;  %v9448_v45 = vld [vmem:[#allocation81_spill] sm:$0xff] }
 0xe76   : > { %6276 = vmatprep.subr.mxu0 %v7946_v62  ;;  %6310 = vmatpush3.msra.mxu1 %v7981_v20  ;;  %v9429_v20 = vld [vmem:[#allocation73_spill] sm:$0xff]  ;;  %v9449_v51 = vld [vmem:[#allocation78_spill] sm:$0xff]  ;;  %v9451_v36 = vld [vmem:[#allocation75_spill] sm:$0xff] }
 0xe77   : > { %6277 = vmatpush3.msra.mxu0 %v7946_v62  ;;  %6311 = vmatprep.subr.mxu1 %v7979_v19  ;;  %v9414_v62 = vld [vmem:[#allocation95_spill] sm:$0xff]  ;;  %v9452_v32 = vld [vmem:[#allocation72_spill] sm:$0xff]  ;;  %v9453_v4 = vld [vmem:[#allocation69_spill] sm:$0xff] }
 0xe78   : > { %6278 = vmatprep.subr.mxu0 %v7944_v61  ;;  %6312 = vmatpush3.msra.mxu1 %v7979_v19  ;;  %v9428_v19 = vld [vmem:[#allocation74_spill] sm:$0xff]  ;;  %v9455_v47 = vld [vmem:[#allocation63_spill] sm:$0xff]  ;;  %v9456_v25 = vld [vmem:[#allocation60_spill] sm:$0xff] }
 0xe79   : > { %6279 = vmatpush3.msra.mxu0 %v7944_v61  ;;  %6313 = vmatprep.subr.mxu1 %v7976_v15  ;;  %v9413_v61 = vld [vmem:[#allocation97_spill] sm:$0xff]  ;;  %v9454_v52 = vld [vmem:[#allocation66_spill] sm:$0xff] }
 0xe7a   : > { %6280 = vmatprep.subr.mxu0 %v7942_v60  ;;  %6314 = vmatpush3.msra.mxu1 %v7976_v15  ;;  %v9427_v15 = vld [vmem:[#allocation76_spill] sm:$0xff]  ;;  %v9457_v48 = vld [vmem:[#allocation57_spill] sm:$0xff] }
 0xe7b   : > { %6281 = vmatpush3.msra.mxu0 %v7942_v60  ;;  %6315 = vmatprep.subr.mxu1 %v7974_v14  ;;  %v9412_v60 = vld [vmem:[#allocation98_spill] sm:$0xff] }
 0xe7c   : > { %6282 = vmatprep.subr.mxu0 %v7940_v59  ;;  %6316 = vmatpush3.msra.mxu1 %v7974_v14  ;;  %v9426_v14 = vld [vmem:[#allocation77_spill] sm:$0xff] }
 0xe7d   : > { %6283 = vmatpush3.msra.mxu0 %v7940_v59  ;;  %6317 = vmatprep.subr.mxu1 %v7972_v13  ;;  %v9411_v59 = vld [vmem:[#allocation100_spill] sm:$0xff] }
 0xe7e   : > { %6284 = vmatprep.subr.mxu0 %v7938_v58  ;;  %6318 = vmatpush3.msra.mxu1 %v7972_v13  ;;  %v9425_v13 = vld [vmem:[#allocation79_spill] sm:$0xff] }
 0xe7f   : > { %6285 = vmatpush3.msra.mxu0 %v7938_v58  ;;  %6319 = vmatprep.subr.mxu1 %v7970_v12  ;;  %v9410_v58 = vld [vmem:[#allocation102_spill] sm:$0xff] }
 0xe80   : > { %6286 = vmatprep.subr.mxu0 %v7936_v57  ;;  %6320 = vmatpush3.msra.mxu1 %v7970_v12  ;;  %v9424_v12 = vld [vmem:[#allocation80_spill] sm:$0xff] }
 0xe81   : > { %6287 = vmatpush3.msra.mxu0 %v7936_v57  ;;  %6321 = vmatprep.subr.mxu1 %v7968_v11  ;;  %v9408_v57 = vld [vmem:[#allocation50_spill] sm:$0xff] }
 0xe82   : > { %6288 = vmatprep.subr.mxu0 %v7934_v56  ;;  %6322 = vmatpush3.msra.mxu1 %v7968_v11  ;;  %v9423_v11 = vld [vmem:[#allocation82_spill] sm:$0xff] }
 0xe83   : > { %6289 = vmatpush3.msra.mxu0 %v7934_v56  ;;  %6323 = vmatprep.subr.mxu1 %v7966_v10  ;;  %v9406_v56 = vld [vmem:[#allocation51_spill] sm:$0xff] }
 0xe84   : > { %6290 = vmatprep.subr.mxu0 %v7932_v55  ;;  %6324 = vmatpush3.msra.mxu1 %v7966_v10  ;;  %v9422_v10 = vld [vmem:[#allocation83_spill] sm:$0xff] }
 0xe85   : > { %6291 = vmatpush3.msra.mxu0 %v7932_v55  ;;  %6325 = vmatprep.subr.mxu1 %v7964_v9  ;;  %v9405_v55 = vld [vmem:[#allocation54_spill] sm:$0xff] }
 0xe86   : > { %6292 = vmatprep.subr.mxu0 %v7930_v54  ;;  %6326 = vmatpush3.msra.mxu1 %v7964_v9  ;;  %v9421_v9 = vld [vmem:[#allocation85_spill] sm:$0xff] }
 0xe87   : > { %6293 = vmatpush3.msra.mxu0 %v7930_v54  ;;  %6327 = vmatprep.subr.mxu1 %v7962_v6  ;;  %v9407_v54 = vld [vmem:[#allocation53_spill] sm:$0xff] }
 0xe88   : > { %6294 = vmatprep.subr.mxu0 %v7928_v53  ;;  %6328 = vmatpush3.msra.mxu1 %v7962_v6  ;;  %v9420_v6 = vld [vmem:[#allocation86_spill] sm:$0xff] }
 0xe89   : > { %6295 = vmatpush3.msra.mxu0 %v7928_v53  ;;  %6329 = vmatprep.subr.mxu1 %v7960_v5  ;;  %v9409_v53 = vld [vmem:[#allocation101_spill] sm:$0xff] }
 0xe8a   : > { %6296 = vmatprep.subr.mxu0 %v9404_v7  ;;  %6330 = vmatpush3.msra.mxu1 %v7960_v5  ;;  %v9419_v5 = vld [vmem:[#allocation88_spill] sm:$0xff] }
 0xe8b   : > { %6297 = vmatpush3.msra.mxu0 %v9404_v7  ;;  %6331 = vmatprep.subr.mxu1 %v9405_v55 }
 0xe8c   : > { %6298 = vmatprep.subr.mxu0 %v9406_v56  ;;  %6332 = vmatpush3.msra.mxu1 %v9405_v55 }
 0xe8d   : > { %6299 = vmatpush3.msra.mxu0 %v9406_v56  ;;  %6333 = vmatprep.subr.mxu1 %v9407_v54 }
 0xe8e   : > { %6301 = vmatmul.mubr.f32.vlgmr.msra.gmra.mxu0 %v9408_v57  ;;  %6334 = vmatpush3.msra.mxu1 %v9407_v54 }
 0xe8f   : > { %3359 = vmatprep.subr.mxu0 %v9409_v53  ;;  %6338 = vmatprep.subr.mxu1 %v9410_v58 }
 0xe90   : > { %3360 = vmatpush1.msra.mxu0 %v9411_v59 }
 0xe91   : > { %3361 = vmatprep.subr.mxu0 %v9412_v60 }
 0xe92   : > { %3362 = vmatpush1.msra.mxu0 %v9413_v61 }
 0xe93   : > { %3363 = vmatprep.subr.mxu0 %v9414_v62 }
 0xe94   : > { %3364 = vmatpush1.msra.mxu0 %v9415_v63 }
 0xe95   : > { %3365 = vmatprep.subr.mxu0 %v9416_v0 }
 0xe96   : > { %3366 = vmatpush1.msra.mxu0 %v9417_v1 }
 0xe97   : > { %3367 = vmatprep.subr.mxu0 %v9418_v2 }
 0xe98   : > { %3368 = vmatpush1.msra.mxu0 %v9419_v5 }
 0xe99   : > { %3369 = vmatprep.subr.mxu0 %v9420_v6 }
 0xe9a   : > { %3370 = vmatpush1.msra.mxu0 %v9421_v9 }
 0xe9b   : > { %3371 = vmatprep.subr.mxu0 %v9422_v10 }
 0xe9c   : > { %3372 = vmatpush1.msra.mxu0 %v9423_v11 }
 0xe9d   : > { %3373 = vmatprep.subr.mxu0 %v9424_v12 }
 0xe9e   : > { %3374 = vmatpush1.msra.mxu0 %v9425_v13 }
 0xe9f   : > { %3375 = vmatprep.subr.mxu0 %v9426_v14 }
 0xea0   : > { %3376 = vmatpush1.msra.mxu0 %v9427_v15 }
 0xea1   : > { %3377 = vmatprep.subr.mxu0 %v9428_v19 }
 0xea2   : > { %3378 = vmatpush1.msra.mxu0 %v9429_v20 }
 0xea3   : > { %3379 = vmatprep.subr.mxu0 %v9430_v21 }
 0xea4   : > { %3380 = vmatpush1.msra.mxu0 %v9431_v22 }
 0xea5   : > { %3381 = vmatprep.subr.mxu0 %v9432_v23 }
 0xea6   : > { %3382 = vmatpush1.msra.mxu0 %v9433_v31 }
 0xea7   : > { %3383 = vmatprep.subr.mxu0 %v9434_v18 }
 0xea8   : > { %3384 = vmatpush1.msra.mxu0 %v9435_v49 }
 0xea9   : > { %3385 = vmatprep.subr.mxu0 %v9436_v46 }
 0xeaa   : > { %3386 = vmatpush1.msra.mxu0 %v9437_v42 }
 0xeab   : > { %3387 = vmatprep.subr.mxu0 %v9438_v3 }
 0xeac   : > { %3388 = vmatpush1.msra.mxu0 %v9439_v37 }
 0xead   : > { %3389 = vmatprep.subr.mxu0 %v9440_v33 }
 0xeae   : > { %3390 = vmatpush1.msra.mxu0 %v9441_v35 }
 0xf4e   : > { %v6302_v26 = vpop.f32.mrf.mxu0 }
 0xf4f   : > { %v3256_v40 = vmax.f32 %v6302_v26, 0.0 }
 0xf50   : > { %v3246_v41 = vpop.f32.mrf.mxu0 }
 0xf51   : > { %v3255_v43 = vmax.f32 %v3246_v41, 0.0 }
 0xf53   : > { %6335 = vmatprep.mubr.f32.mxu1 %v3255_v43 }
 0xf54   : > { %6336 = vmatmul.mubr.f32.vlgmr.msra.gmra.mxu1 %v3256_v40 }
 0xf55   : > { %6339 = vmatpush3.msra.mxu1 %v9410_v58 }
 0xf56   : > { %6340 = vmatprep.subr.mxu1 %v9442_v38 }
 0xf57   : > { %6341 = vmatpush3.msra.mxu1 %v9442_v38 }
 0xf58   : > { %6342 = vmatprep.subr.mxu1 %v9443_v34 }
 0xf59   : > { %6343 = vmatpush3.msra.mxu1 %v9443_v34 }
 0xf5a   : > { %6344 = vmatprep.subr.mxu1 %v9444_v28 }
 0xf5b   : > { %6345 = vmatpush3.msra.mxu1 %v9444_v28 }
 0xf5c   : > { %6346 = vmatprep.subr.mxu1 %v9445_v30 }
 0xf5d   : > { %6347 = vmatpush3.msra.mxu1 %v9445_v30 }
 0xf5e   : > { %6348 = vmatprep.subr.mxu1 %v9446_v44 }
 0xf5f   : > { %6349 = vmatpush3.msra.mxu1 %v9446_v44 }
 0xf60   : > { %6350 = vmatprep.subr.mxu1 %v9447_v39 }
 0xf61   : > { %6351 = vmatpush3.msra.mxu1 %v9447_v39 }
 0xf62   : > { %6352 = vmatprep.subr.mxu1 %v9448_v45 }
 0xf63   : > { %6353 = vmatpush3.msra.mxu1 %v9448_v45 }
 0xf64   : > { %6354 = vmatprep.subr.mxu1 %v9449_v51 }
 0xf65   : > { %6355 = vmatpush3.msra.mxu1 %v9449_v51 }
 0xf66   : > { %6356 = vmatprep.subr.mxu1 %v9451_v36 }
 0xf67   : > { %6357 = vmatpush3.msra.mxu1 %v9451_v36 }
 0xf68   : > { %6358 = vmatprep.subr.mxu1 %v9452_v32 }
 0xf69   : > { %6359 = vmatpush3.msra.mxu1 %v9452_v32 }
 0xf6a   : > { %6360 = vmatprep.subr.mxu1 %v9453_v4 }
 0xf6b   : > { %6361 = vmatpush3.msra.mxu1 %v9453_v4 }
 0xf6c   : > { %6362 = vmatprep.subr.mxu1 %v9454_v52 }
 0xf6d   : > { %6363 = vmatpush3.msra.mxu1 %v9454_v52 }
 0xf6e   : > { %6364 = vmatprep.subr.mxu1 %v9455_v47 }
 0xf6f   : > { %6365 = vmatpush3.msra.mxu1 %v9455_v47 }
 0xf70   : > { %6366 = vmatprep.subr.mxu1 %v9456_v25 }
 0xf71   : > { %6367 = vmatpush3.msra.mxu1 %v9456_v25 }
 0xf72   : > { %6368 = vmatprep.subr.mxu1 %v9457_v48 }
 0xf73   : > { %6369 = vmatpush3.msra.mxu1 %v9457_v48 }
0x1014   : > { %v6337_v50 = vpop.f32.mrf.mxu1 }
0x1015   : > { %v8679_v16 = vsel %vm3334_vm3, %v6337_v50, %v8537_v29 }
0x1016   : > { %v3323_v17 = vpop.f32.mrf.mxu1 }
0x1017   : > { %v8675_v27 = vsel %vm3334_vm3, %v3323_v17, %v8532_v24  ;;  %v7488_v24 = vmov 0.0  }
0x1018   : > { %3337 = vadd.xlane.f32.xlu0 %v8675_v27  ;;  %3423 = vmatprep.mubr.f32.mxu0 %v7488_v24 }
0x1019   : > { %6373 = vmatprep.subr.mxu0 %v7488_v24  ;;  %6403 = vmatprep.subr.mxu1 %v7488_v24 }
0x101c   : > { %3339 = vadd.xlane.f32.xlu0 %v8679_v16 }
0x10a1   : > { %v3338_v7 = vpop.xlane.xlu0 %3337 }
0x10a2   : > { %v3341_v55 = vmul.f32 0.0078125, %v3338_v7 }
0x10a4   : > { %v3343_v56 = vsub.f32 %v8675_v27, %v3341_v55 }
0x10a5   : > { %v3340_v54 = vpop.xlane.xlu0 %3339 }
0x10a6   : > { %v3342_v57 = vmul.f32 0.0078125, %v3340_v54  ;;  %v3345_v53 = vmul.f32 %v3343_v56, %v3343_v56 }
0x10a8   : > { %v3344_v58 = vsub.f32 %v8679_v16, %v3342_v57  ;;  %3347 = vadd.xlane.f32.xlu1 %v3345_v53 }
0x10aa   : > { %v3346_v59 = vmul.f32 %v3344_v58, %v3344_v58 }
0x10ac   : > { %3349 = vadd.xlane.f32.xlu1 %v3346_v59 }
0x1131   : > { %v3348_v29 = vpop.xlane.xlu1 %3347 }
0x1132   : > { %v3351_v60 = vmul.f32 0.0078125, %v3348_v29 }
0x1134   : > { %v3353_v61 = vadd.f32 1e-05, %v3351_v60 }
0x1135   : > { %v3350_v62 = vpop.xlane.xlu1 %3349 }
0x1136   : > { %6941 = vrsqrt.f32 %v3353_v61  ;;  %v3352_v63 = vmul.f32 0.0078125, %v3350_v62 }
0x1138   : > { %v3354_v0 = vadd.f32 1e-05, %v3352_v63 }
0x113a   : > { %6943 = vrsqrt.f32 %v3354_v0 }
0x1143   : > { %v6942_v1 = vpop.eup %6941 }
0x1144   : > { %v3357_v2 = vmul.f32 %v6942_v1, %v3343_v56 }
0x1146   : > { %3424 = vmatmul.mubr.f32.vlgmr.msra.gmra.mxu0 %v3357_v2  ;;  %6370 = vmatprep.mubr.f32.mxu1 %v3357_v2 }
0x1147   : > { %v6944_v5 = vpop.eup %6943  ;;  %3429 = vmatprep.mubr.f32.mxu0 %v7488_v24 }
0x1148   : > { %v3358_v6 = vmul.f32 %v6944_v5, %v3344_v58 }
0x114a   : > { %3430 = vmatmul.mubr.f32.gmra.mxu0 %v3358_v6  ;;  %6371 = vmatmul.mubr.f32.vlgmr.msra.gmra.mxu1 %v3358_v6 }
0x114b   : > { %6375 = vmatprep.mubr.msk.f32.mxu0 %vm7489_vm4, %v7488_v24  ;;  %6405 = vmatprep.mubr.msk.f32.mxu1 %vm7489_vm4, %v7488_v24 }
0x1206   : > { %v3425_v9 = vpop.f32.mrf.mxu0 }
0x1207   : > { %3513 = vrot.lane.b32.xlu1 %v3425_v9, %s7490_s26 }
0x1208   : > { %v3427_v10 = vpop.f32.mrf.mxu0 }
0x1209   : > { %3527 = vrot.lane.b32.xlu0 %v3427_v10, %s7490_s26  ;;  %6374 = vmatpush3.xpose.msk.msra.mxu0 %vm3559_vm5, %v3427_v10 }
0x120a   : > { %v3431_v11 = vpop.f32.mrf.mxu0  ;;  %6378 = vmatprep.subr.mxu0 %v7488_v24  ;;  %v8726_v31 = vpop.f32.mrf.mxu1 }
0x120b   : > { %3515 = vrot.lane.b32.xlu1 %v3431_v11, %s7490_s26 }
0x120c   : > { %v3433_v12 = vpop.f32.mrf.mxu0  ;;  %6376 = vmatmul.mubr.msk.f32.vlgmr.msra.gmra.mxu0 %vm3559_vm5, %v3425_v9  ;;  %v8735_v46 = vpop.f32.mrf.mxu1 }
0x120d   : > { %3531 = vrot.lane.b32.xlu0 %v3427_v10, %s7491_s16  ;;  %6379 = vmatpush3.xpose.msk.msra.mxu0 %vm3559_vm5, %v3433_v12 }
0x120e   : > { %6380 = vmatprep.mubr.msk.f32.mxu0 %vm7489_vm4, %v7488_v24  ;;  %6383 = vmatprep.subr.mxu0 %v7488_v24 }
0x120f   : > { %3529 = vrot.lane.b32.xlu1 %v3433_v12, %s7490_s26 }
0x1210   : > { %6381 = vmatmul.mubr.msk.f32.vlgmr.msra.gmra.mxu0 %vm3559_vm5, %v3431_v11 }
0x1211   : > { %3533 = vrot.lane.b32.xlu0 %v3433_v12, %s7491_s16  ;;  %6385 = vmatprep.mubr.msk.f32.mxu0 %vm7489_vm4, %v7488_v24 }
0x1213   : > { %3517 = vrot.lane.b32.xlu1 %v3425_v9, %s7491_s16 }
0x1215   : > { %3535 = vrot.lane.b32.xlu0 %v3427_v10, %s7492_s1 }
0x1217   : > { %3519 = vrot.lane.b32.xlu1 %v3431_v11, %s7491_s16 }
0x1219   : > { %3521 = vrot.lane.b32.xlu0 %v3425_v9, %s7492_s1 }
0x121b   : > { %3537 = vrot.lane.b32.xlu1 %v3433_v12, %s7492_s1 }
0x121f   : > { %3523 = vrot.lane.b32.xlu1 %v3431_v11, %s7492_s1 }
0x1279   : > { %v3514_v13 = vpop.permute.xlu1 %3513 }
0x127b   : > { %v3528_v14 = vpop.permute.xlu0 %3527 }
0x127c   : > { %6384 = vmatpush3.xpose.msk.msra.mxu0 %vm3559_vm5, %v3528_v14 }
0x127d   : > { %v3516_v15 = vpop.permute.xlu1 %3515  ;;  %6388 = vmatprep.subr.mxu0 %v7488_v24 }
0x127f   : > { %6386 = vmatmul.mubr.msk.f32.vlgmr.msra.gmra.mxu0 %vm3559_vm5, %v3514_v13  ;;  %v3532_v19 = vpop.permute.xlu0 %3531 }
0x1280   : > { %6390 = vmatprep.mubr.msk.f32.mxu0 %vm7489_vm4, %v7488_v24 }
0x1281   : > { %v3530_v20 = vpop.permute.xlu1 %3529 }
0x1282   : > { %6389 = vmatpush3.xpose.msk.msra.mxu0 %vm3559_vm5, %v3530_v20 }
0x1283   : > { %v3534_v21 = vpop.permute.xlu0 %3533  ;;  %6393 = vmatprep.subr.mxu0 %v7488_v24 }
0x1285   : > { %v3518_v22 = vpop.permute.xlu1 %3517  ;;  %6391 = vmatmul.mubr.msk.f32.vlgmr.msra.gmra.mxu0 %vm3559_vm5, %v3516_v15 }
0x1286   : > { %6394 = vmatpush3.xpose.msk.msra.mxu0 %vm3559_vm5, %v3532_v19  ;;  %6395 = vmatprep.mubr.msk.f32.mxu0 %vm7489_vm4, %v7488_v24 }
0x1287   : > { %v3536_v23 = vpop.permute.xlu0 %3535  ;;  %6398 = vmatprep.subr.mxu0 %v7488_v24 }
0x1288   : > { %6404 = vmatpush3.xpose.msk.msra.mxu1 %vm3559_vm5, %v3536_v23 }
0x1289   : > { %v3520_v18 = vpop.permute.xlu1 %3519  ;;  %6396 = vmatmul.mubr.msk.f32.vlgmr.msra.gmra.mxu0 %vm3559_vm5, %v3518_v22  ;;  %6413 = vmatprep.subr.mxu1 %v7488_v24 }
0x128a   : > { %6399 = vmatpush3.xpose.msk.msra.mxu0 %vm3559_vm5, %v3534_v21  ;;  %6400 = vmatprep.mubr.msk.f32.mxu0 %vm7489_vm4, %v7488_v24 }
0x128b   : > { %v3522_v49 = vpop.permute.xlu0 %3521  ;;  %6408 = vmatprep.subr.mxu0 %v7488_v24 }
0x128c   : > { %6406 = vmatmul.mubr.msk.f32.vlgmr.msra.gmra.mxu1 %vm3559_vm5, %v3522_v49 }
0x128d   : > { %6414 = vmatpush3.msra.mxu1 %v8735_v46  ;;  %v3538_v42 = vpop.permute.xlu1 %3537  ;;  %6401 = vmatmul.mubr.msk.f32.vlgmr.msra.gmra.mxu0 %vm3559_vm5, %v3520_v18 }
0x128e   : > { %6409 = vmatpush3.xpose.msk.msra.mxu0 %vm3559_vm5, %v3538_v42  ;;  %6410 = vmatprep.mubr.msk.f32.mxu0 %vm7489_vm4, %v7488_v24 }
0x128f   : > { %6418 = vmatprep.subr.mxu0 %v7488_v24  ;;  %6415 = vmatprep.mubr.msk.f32.mxu1 %vm7489_vm4, %v7488_v24 }
0x1290   : > { %6423 = vmatprep.subr.mxu1 %v7488_v24 }
0x1291   : > { %v3524_v3 = vpop.permute.xlu1 %3523 }
0x1292   : > { %6411 = vmatmul.mubr.msk.f32.vlgmr.msra.gmra.mxu0 %vm3559_vm5, %v3524_v3 }
0x1293   : > { %6419 = vmatpush3.msra.mxu0 %v8726_v31  ;;  %6420 = vmatprep.mubr.msk.f32.mxu0 %vm7489_vm4, %v7488_v24 }
0x1294   : > { %6428 = vmatprep.subr.mxu0 %v7488_v24 }
0x12cc   : > { %v3630_v37 = vpop.f32.mrf.mxu0 }
0x12cd   : > { %v4153_v33 = vsel %vm4152_vm6, %v3630_v37, -inf }
0x12ce   : > { %4154 = vmax.xlane.f32.xlu0 %v4153_v33  ;;  %v6377_v35 = vpop.f32.mrf.mxu0 }
0x12d0   : > { %v3704_v26 = vpop.f32.mrf.mxu0 }
0x12d1   : > { %v4156_v41 = vsel %vm4152_vm6, %v3704_v26, -inf }
0x12d2   : > { %4157 = vmax.xlane.f32.xlu1 %v4156_v41  ;;  %v6382_v43 = vpop.f32.mrf.mxu0 }
0x133f   : > { %v3778_v40 = vpop.f32.mrf.mxu0 }
0x1340   : > { %v4159_v38 = vsel %vm4152_vm6, %v3778_v40, -inf }
0x1341   : > { %4160 = vmax.xlane.f32.xlu0 %v4159_v38  ;;  %v6387_v34 = vpop.f32.mrf.mxu0 }
0x1345   : > { %v3852_v28 = vpop.f32.mrf.mxu0 }
0x1346   : > { %v4162_v30 = vsel %vm4152_vm6, %v3852_v28, -inf }
0x1347   : > { %4163 = vmax.xlane.f32.xlu0 %v4162_v30  ;;  %v6392_v44 = vpop.f32.mrf.mxu0 }
0x1349   : > { %v3926_v39 = vpop.f32.mrf.mxu0 }
0x134a   : > { %v4165_v45 = vsel %vm4152_vm6, %v3926_v39, -inf }
0x134b   : > { %4166 = vmax.xlane.f32.xlu0 %v4165_v45  ;;  %v6397_v51 = vpop.f32.mrf.mxu0 }
0x134c   : > { %v4074_v36 = vpop.f32.mrf.mxu1 }
0x134d   : > { %v4000_v32 = vpop.f32.mrf.mxu0  ;;  %v4171_v4 = vsel %vm4152_vm6, %v4074_v36, -inf }
0x134e   : > { %v6407_v52 = vpop.f32.mrf.mxu1  ;;  %v4168_v47 = vsel %vm4152_vm6, %v4000_v32, -inf }
0x134f   : > { %4169 = vmax.xlane.f32.xlu1 %v4168_v47  ;;  %v6402_v25 = vpop.f32.mrf.mxu0  ;;  %4172 = vmax.xlane.f32.xlu0 %v4171_v4 }
0x1352   : > { %v4148_v48 = vpop.f32.mrf.mxu0 }
0x1353   : > { %v4174_v8 = vsel %vm4152_vm6, %v4148_v48, -inf }
0x1354   : > { %4175 = vmax.xlane.f32.xlu1 %v4174_v8  ;;  %v6412_v50 = vpop.f32.mrf.mxu0 }
0x1357   : > { %v4155_v17 = vpop.xlane.xlu0 %4154 }
0x1358   : > { %v4177_v7 = vsub.f32 %v3630_v37, %v4155_v17 }
0x135a   : > { %v4185_v55 = vmul.f32 1.442695, %v4177_v7 }
0x135b   : > { %v4158_v56 = vpop.xlane.xlu1 %4157 }
0x135c   : > { %6945 = vpow2.f32 %v4185_v55  ;;  %v4178_v54 = vsub.f32 %v3704_v26, %v4158_v56  ;;  %v9458_v56 = vld [vmem:[#allocation180_spill] sm:$0xff] }
0x135e   : > { %v4187_v57 = vmul.f32 1.442695, %v4178_v54 }
0x1360   : > { %6947 = vpow2.f32 %v4187_v57 }
0x1365   : > { %3543 = vrot.lane.b32.xlu1 %v8726_v31, %s7490_s26  ;;  %3541 = vrot.lane.b32.xlu0 %v8735_v46, %s7490_s26 }
0x1369   : > { %3547 = vrot.lane.b32.xlu1 %v8735_v46, %s7491_s16  ;;  %v6946_v53 = vpop.eup %6945 }
0x136a   : > { %v4201_v58 = vsel %vm4152_vm6, %v6946_v53, 0.0 }
0x136d   : > { %3549 = vrot.lane.b32.xlu1 %v8726_v31, %s7491_s16  ;;  %v6948_v59 = vpop.eup %6947 }
0x136e   : > { %v4204_v29 = vsel %vm4152_vm6, %v6948_v59, 0.0 }
0x1384   : > { %4202 = vadd.xlane.f32.xlu0 %v4201_v58 }
0x1391   : > { %4205 = vadd.xlane.f32.xlu1 %v4204_v29 }
0x13ca   : > { %v4161_v60 = vpop.xlane.xlu0 %4160 }
0x13cb   : > { %v4179_v61 = vsub.f32 %v3778_v40, %v4161_v60  ;;  %v9459_v60 = vld [vmem:[#allocation118_spill] sm:$0xff] }
0x13cd   : > { %v4189_v62 = vmul.f32 1.442695, %v4179_v61  ;;  %v9460_v61 = vld [vmem:[#allocation179_spill] sm:$0xff] }
0x13cf   : > { %6949 = vpow2.f32 %v4189_v62  ;;  %v9461_v62 = vld [vmem:[#allocation176_spill] sm:$0xff] }
0x13d0   : > { %v4164_v63 = vpop.xlane.xlu0 %4163 }
0x13d1   : > { %v4180_v0 = vsub.f32 %v3852_v28, %v4164_v63  ;;  %v9462_v63 = vld [vmem:[#allocation175_spill] sm:$0xff] }
0x13d3   : > { %v4191_v1 = vmul.f32 1.442695, %v4180_v0  ;;  %v9463_v0 = vld [vmem:[#allocation117_spill] sm:$0xff] }
0x13d4   : > { %v4167_v2 = vpop.xlane.xlu0 %4166 }
0x13d5   : > { %6951 = vpow2.f32 %v4191_v1  ;;  %v4181_v5 = vsub.f32 %v3926_v39, %v4167_v2  ;;  %v9464_v1 = vld [vmem:[#allocation172_spill] sm:$0xff]  ;;  %v9465_v2 = vld [vmem:[#allocation171_spill] sm:$0xff] }
0x13d7   : > { %v4193_v15 = vmul.f32 1.442695, %v4181_v5  ;;  %v9466_v5 = vld [vmem:[#allocation116_spill] sm:$0xff] }
0x13d8   : > { %v4170_v6 = vpop.xlane.xlu1 %4169  ;;  %v4173_v9 = vpop.xlane.xlu0 %4172 }
0x13d9   : > { %v4182_v10 = vsub.f32 %v4000_v32, %v4170_v6  ;;  %v4183_v11 = vsub.f32 %v4074_v36, %v4173_v9  ;;  %v9467_v6 = vld [vmem:[#allocation168_spill] sm:$0xff]  ;;  %v9468_v9 = vld [vmem:[#allocation167_spill] sm:$0xff] }
0x13db   : > { %v4195_v12 = vmul.f32 1.442695, %v4182_v10  ;;  %v4197_v13 = vmul.f32 1.442695, %v4183_v11  ;;  %v9469_v10 = vld [vmem:[#allocation115_spill] sm:$0xff]  ;;  %v9470_v11 = vld [vmem:[#allocation164_spill] sm:$0xff] }
0x13dc   : > { %v6950_v14 = vpop.eup %6949  ;;  %v3542_v43 = vpop.permute.xlu0 %3541 }
0x13dd   : > { %6953 = vpow2.f32 %v4195_v12  ;;  %v4176_v19 = vpop.xlane.xlu1 %4175  ;;  %v4207_v20 = vsel %vm4152_vm6, %v6950_v14, 0.0  ;;  %v9471_v12 = vld [vmem:[#allocation163_spill] sm:$0xff] }
0x13de   : > { %6955 = vpow2.f32 %v4197_v13  ;;  %v4184_v21 = vsub.f32 %v4148_v48, %v4176_v19  ;;  %4208 = vadd.xlane.f32.xlu0 %v4207_v20  ;;  %v9472_v13 = vld [vmem:[#allocation114_spill] sm:$0xff]  ;;  %v9475_v19 = vld [vmem:[#allocation113_spill] sm:$0xff]  ;;  %v9476_v20 = vld [vmem:[#allocation156_spill] sm:$0xff] }
0x13df   : > { %6957 = vpow2.f32 %v4193_v15  ;;  %v9474_v15 = vld [vmem:[#allocation159_spill] sm:$0xff] }
0x13e0   : > { %v4199_v22 = vmul.f32 1.442695, %v4184_v21  ;;  %v9477_v21 = vld [vmem:[#allocation155_spill] sm:$0xff] }
0x13e1   : > { %v3544_v40 = vpop.permute.xlu1 %3543 }
0x13e2   : > { %v6952_v23 = vpop.eup %6951  ;;  %6959 = vpow2.f32 %v4199_v22  ;;  %v9478_v22 = vld [vmem:[#allocation112_spill] sm:$0xff] }
0x13e3   : > { %v4210_v18 = vsel %vm4152_vm6, %v6952_v23, 0.0 }
0x13e4   : > { %4211 = vadd.xlane.f32.xlu1 %v4210_v18  ;;  %v9480_v18 = vld [vmem:[#allocation151_spill] sm:$0xff] }
0x13e5   : > { %v3548_v34 = vpop.permute.xlu1 %3547 }
0x13e9   : > { %v3550_v28 = vpop.permute.xlu1 %3549 }
0x13ea   : > { %v6954_v49 = vpop.eup %6953 }
0x13eb   : > { %v8772_v42 = vpop.eup %6955  ;;  %v4216_v3 = vsel %vm4152_vm6, %v6954_v49, 0.0 }
0x13ec   : > { %4217 = vadd.xlane.f32.xlu1 %v4216_v3  ;;  %v4219_v37 = vsel %vm4152_vm6, %v8772_v42, 0.0  ;;  %v6958_v33 = vpop.eup %6957  ;;  %v9483_v3 = vld [vmem:[#allocation147_spill] sm:$0xff] }
0x13ed   : > { %4220 = vadd.xlane.f32.xlu0 %v4219_v37  ;;  %v4213_v26 = vsel %vm4152_vm6, %v6958_v33, 0.0  ;;  %v9484_v37 = vld [vmem:[#allocation110_spill] sm:$0xff] }
0x13ef   : > { %v6960_v35 = vpop.eup %6959 }
0x13f0   : > { %v4222_v41 = vsel %vm4152_vm6, %v6960_v35, 0.0 }
0x13f1   : > { %4214 = vadd.xlane.f32.xlu0 %v4213_v26  ;;  %4223 = vadd.xlane.f32.xlu1 %v4222_v41  ;;  %v9487_v26 = vld [vmem:[#allocation109_spill] sm:$0xff]  ;;  %v9488_v41 = vld [vmem:[#allocation140_spill] sm:$0xff] }
0x1402   : > { %3555 = vrot.lane.b32.xlu1 %v8726_v31, %s7492_s1 }
0x1407   : > { %3553 = vrot.lane.b32.xlu0 %v8735_v46, %s7492_s1 }
0x140d   : > { %v4203_v38 = vpop.xlane.xlu0 %4202 }
0x140e   : > { %6961 = vrcp.f32 %v4203_v38  ;;  %v9491_v38 = vld [vmem:[#allocation136_spill] sm:$0xff] }
0x141a   : > { %v4206_v30 = vpop.xlane.xlu1 %4205 }
0x141b   : > { %v6962_v44 = vpop.eup %6961  ;;  %6963 = vrcp.f32 %v4206_v30  ;;  %v9494_v30 = vld [vmem:[#allocation132_spill] sm:$0xff] }
0x141c   : > { %v4233_v39 = vmul.f32 %v6962_v44, %v6946_v53  ;;  %v9495_v44 = vld [vmem:[#allocation131_spill] sm:$0xff] }
0x141e   : > { %6416 = vmatmul.mubr.msk.f32.vlgmr.msra.gmra.mxu1 %vm4152_vm6, %v4233_v39  ;;  %v9496_v39 = vld [vmem:[#allocation106_spill] sm:$0xff] }
0x141f   : > { %6424 = vmatpush3.msra.mxu1 %v3542_v43  ;;  %6425 = vmatprep.mubr.msk.f32.mxu1 %vm7489_vm4, %v7488_v24  ;;  %v9489_v43 = vld [vmem:[#allocation139_spill] sm:$0xff] }
0x1420   : > { %6433 = vmatprep.subr.mxu1 %v7488_v24 }
0x1428   : > { %v6964_v31 = vpop.eup %6963 }
0x1429   : > { %v4234_v46 = vmul.f32 %v6964_v31, %v6948_v59  ;;  %v9497_v31 = vld [vmem:[#allocation128_spill] sm:$0xff] }
0x142b   : > { %6421 = vmatmul.mubr.msk.f32.vlgmr.msra.gmra.mxu0 %vm4152_vm6, %v4234_v46  ;;  %v9498_v46 = vld [vmem:[#allocation127_spill] sm:$0xff] }
0x142c   : > { %6429 = vmatpush3.msra.mxu0 %v3544_v40  ;;  %6430 = vmatprep.mubr.msk.f32.mxu0 %vm7489_vm4, %v7488_v24  ;;  %v9490_v40 = vld [vmem:[#allocation108_spill] sm:$0xff] }
0x142d   : > { %6438 = vmatprep.subr.mxu0 %v7488_v24 }
0x1467   : > { %v4209_v45 = vpop.xlane.xlu0 %4208 }
0x1468   : > { %6965 = vrcp.f32 %v4209_v45  ;;  %v9499_v45 = vld [vmem:[#allocation105_spill] sm:$0xff] }
0x146d   : > { %v4212_v51 = vpop.xlane.xlu1 %4211 }
0x146e   : > { %6967 = vrcp.f32 %v4212_v51  ;;  %v9500_v51 = vld [vmem:[#allocation124_spill] sm:$0xff] }
0x1475   : > { %v6966_v36 = vpop.eup %6965  ;;  %v4218_v32 = vpop.xlane.xlu1 %4217 }
0x1476   : > { %6969 = vrcp.f32 %v4218_v32  ;;  %v4221_v4 = vpop.xlane.xlu0 %4220  ;;  %v4235_v52 = vmul.f32 %v6966_v36, %v6950_v14  ;;  %v9473_v14 = vld [vmem:[#allocation160_spill] sm:$0xff]  ;;  %v9501_v36 = vld [vmem:[#allocation123_spill] sm:$0xff] }
0x1477   : > { %v9502_v32 = vld [vmem:[#allocation104_spill] sm:$0xff] }
0x1478   : > { %6426 = vmatmul.mubr.msk.f32.vlgmr.msra.gmra.mxu1 %vm4152_vm6, %v4235_v52  ;;  %v9504_v52 = vld [vmem:[#allocation119_spill] sm:$0xff] }
0x1479   : > { %6434 = vmatpush3.msra.mxu1 %v3548_v34  ;;  %6435 = vmatprep.mubr.msk.f32.mxu1 %vm7489_vm4, %v7488_v24  ;;  %v9492_v34 = vld [vmem:[#allocation135_spill] sm:$0xff] }
0x147a   : > { %v4215_v47 = vpop.xlane.xlu0 %4214  ;;  %v4224_v25 = vpop.xlane.xlu1 %4223  ;;  %6443 = vmatprep.subr.mxu1 %v7488_v24 }
0x147b   : > { %v6968_v48 = vpop.eup %6967  ;;  %6971 = vrcp.f32 %v4215_v47  ;;  %v9505_v47 = vld [vmem:[#allocation103_spill] sm:$0xff] }
0x147c   : > { %6973 = vrcp.f32 %v4224_v25  ;;  %v4236_v8 = vmul.f32 %v6968_v48, %v6952_v23  ;;  %v9479_v23 = vld [vmem:[#allocation152_spill] sm:$0xff]  ;;  %v9506_v25 = vld [vmem:[#allocation214_spill] sm:$0xff] }
0x147d   : > { %6975 = vrcp.f32 %v4221_v4  ;;  %v9503_v4 = vld [vmem:[#allocation120_spill] sm:$0xff]  ;;  %v9507_v48 = vld [vmem:[#allocation182_spill] sm:$0xff] }
0x147e   : > { %6431 = vmatmul.mubr.msk.f32.vlgmr.msra.gmra.mxu0 %vm4152_vm6, %v4236_v8  ;;  %v3556_v7 = vpop.permute.xlu1 %3555  ;;  %v3554_v59 = vpop.permute.xlu0 %3553 }
0x147f   : > { %6439 = vmatpush3.msra.mxu0 %v3550_v28  ;;  %6440 = vmatprep.mubr.msk.f32.mxu0 %vm7489_vm4, %v7488_v24  ;;  %v9493_v28 = vld [vmem:[#allocation107_spill] sm:$0xff] }
0x1480   : > { %6448 = vmatprep.subr.mxu0 %v7488_v24 }
0x1483   : > { %v6970_v50 = vpop.eup %6969 }
0x1484   : > { %v4238_v17 = vmul.f32 %v6970_v50, %v6954_v49  ;;  %v9481_v49 = vld [vmem:[#allocation111_spill] sm:$0xff] }
0x1486   : > { %6441 = vmatmul.mubr.msk.f32.vlgmr.msra.gmra.mxu0 %vm4152_vm6, %v4238_v17 }
0x1487   : > { %6449 = vmatpush3.msra.mxu0 %v3556_v7  ;;  %6450 = vmatprep.mubr.msk.f32.mxu0 %vm7489_vm4, %v7488_v24 }
0x1488   : > { %v6972_v55 = vpop.eup %6971  ;;  %4955 = vmatprep.subr.mxu0 %v9458_v56 }
0x1489   : > { %v6974_v54 = vpop.eup %6973  ;;  %v4237_v57 = vmul.f32 %v6972_v55, %v6958_v33  ;;  %v9485_v33 = vld [vmem:[#allocation144_spill] sm:$0xff] }
0x148a   : > { %v6976_v53 = vpop.eup %6975  ;;  %v4240_v58 = vmul.f32 %v6974_v54, %v6960_v35  ;;  %v9486_v35 = vld [vmem:[#allocation143_spill] sm:$0xff] }
0x148b   : > { %6436 = vmatmul.mubr.msk.f32.vlgmr.msra.gmra.mxu1 %vm4152_vm6, %v4237_v57  ;;  %v4239_v29 = vmul.f32 %v6976_v53, %v8772_v42  ;;  %v9482_v42 = vld [vmem:[#allocation148_spill] sm:$0xff] }
0x148c   : > { %6444 = vmatpush3.msra.mxu1 %v3554_v59  ;;  %6451 = vmatmul.mubr.msk.f32.vlgmr.msra.gmra.mxu0 %vm4152_vm6, %v4240_v58 }
0x148d   : > { %6445 = vmatprep.mubr.msk.f32.mxu1 %vm7489_vm4, %v7488_v24  ;;  %6453 = vmatprep.subr.mxu1 %v9459_v60 }
0x148e   : > { %4956 = vmatpush1.msra.mxu0 %v9460_v61  ;;  %5019 = vmatprep.mubr.f32.mxu0 %v7488_v24 }
0x148f   : > { %6446 = vmatmul.mubr.msk.f32.vlgmr.msra.gmra.mxu1 %vm4152_vm6, %v4239_v29  ;;  %4957 = vmatprep.subr.mxu0 %v9461_v62 }
0x1490   : > { %6454 = vmatpush3.msra.mxu1 %v9459_v60  ;;  %4958 = vmatpush1.msra.mxu0 %v9462_v63 }
0x1491   : > { %6455 = vmatprep.subr.mxu1 %v9463_v0  ;;  %4959 = vmatprep.subr.mxu0 %v9464_v1 }
0x1492   : > { %6456 = vmatpush3.msra.mxu1 %v9463_v0  ;;  %4960 = vmatpush1.msra.mxu0 %v9465_v2 }
0x1493   : > { %6457 = vmatprep.subr.mxu1 %v9466_v5  ;;  %4961 = vmatprep.subr.mxu0 %v9467_v6 }
0x1494   : > { %6458 = vmatpush3.msra.mxu1 %v9466_v5  ;;  %4962 = vmatpush1.msra.mxu0 %v9468_v9 }
0x1495   : > { %6459 = vmatprep.subr.mxu1 %v9469_v10  ;;  %4963 = vmatprep.subr.mxu0 %v9470_v11 }
0x1496   : > { %6460 = vmatpush3.msra.mxu1 %v9469_v10  ;;  %4964 = vmatpush1.msra.mxu0 %v9471_v12 }
0x1497   : > { %6461 = vmatprep.subr.mxu1 %v9472_v13  ;;  %4965 = vmatprep.subr.mxu0 %v9473_v14 }
0x1498   : > { %6462 = vmatpush3.msra.mxu1 %v9472_v13  ;;  %4966 = vmatpush1.msra.mxu0 %v9474_v15 }
0x1499   : > { %6463 = vmatprep.subr.mxu1 %v9475_v19  ;;  %4967 = vmatprep.subr.mxu0 %v9476_v20 }
0x149a   : > { %6464 = vmatpush3.msra.mxu1 %v9475_v19  ;;  %4968 = vmatpush1.msra.mxu0 %v9477_v21 }
0x149b   : > { %6465 = vmatprep.subr.mxu1 %v9478_v22  ;;  %4969 = vmatprep.subr.mxu0 %v9479_v23 }
0x149c   : > { %6466 = vmatpush3.msra.mxu1 %v9478_v22  ;;  %4970 = vmatpush1.msra.mxu0 %v9480_v18 }
0x149d   : > { %6467 = vmatprep.subr.mxu1 %v9481_v49  ;;  %4971 = vmatprep.subr.mxu0 %v9482_v42  ;;  %v9509_v42 = vld [vmem:[#allocation178_spill] sm:$0xff] }
0x149e   : > { %6468 = vmatpush3.msra.mxu1 %v9481_v49  ;;  %4972 = vmatpush1.msra.mxu0 %v9483_v3  ;;  %v9508_v49 = vld [vmem:[#allocation181_spill] sm:$0xff] }
0x149f   : > { %6469 = vmatprep.subr.mxu1 %v9484_v37  ;;  %4973 = vmatprep.subr.mxu0 %v9485_v33  ;;  %v9510_v3 = vld [vmem:[#allocation177_spill] sm:$0xff] }
0x14a0   : > { %6470 = vmatpush3.msra.mxu1 %v9484_v37  ;;  %4974 = vmatpush1.msra.mxu0 %v9486_v35  ;;  %v9511_v37 = vld [vmem:[#allocation174_spill] sm:$0xff]  ;;  %v9512_v33 = vld [vmem:[#allocation173_spill] sm:$0xff] }
0x14a1   : > { %6471 = vmatprep.subr.mxu1 %v9487_v26  ;;  %4975 = vmatprep.subr.mxu0 %v9488_v41  ;;  %v9513_v35 = vld [vmem:[#allocation170_spill] sm:$0xff] }
0x14a2   : > { %6472 = vmatpush3.msra.mxu1 %v9487_v26  ;;  %4976 = vmatpush1.msra.mxu0 %v9489_v43  ;;  %v9514_v26 = vld [vmem:[#allocation169_spill] sm:$0xff]  ;;  %v9515_v41 = vld [vmem:[#allocation166_spill] sm:$0xff] }
0x14a3   : > { %6473 = vmatprep.subr.mxu1 %v9490_v40  ;;  %4977 = vmatprep.subr.mxu0 %v9491_v38  ;;  %v9516_v43 = vld [vmem:[#allocation165_spill] sm:$0xff] }
0x14a4   : > { %6474 = vmatpush3.msra.mxu1 %v9490_v40  ;;  %4978 = vmatpush1.msra.mxu0 %v9492_v34  ;;  %v9517_v40 = vld [vmem:[#allocation162_spill] sm:$0xff]  ;;  %v9518_v38 = vld [vmem:[#allocation161_spill] sm:$0xff] }
0x14a5   : > { %6475 = vmatprep.subr.mxu1 %v9493_v28  ;;  %4979 = vmatprep.subr.mxu0 %v9494_v30  ;;  %v9519_v34 = vld [vmem:[#allocation158_spill] sm:$0xff] }
0x14a6   : > { %6476 = vmatpush3.msra.mxu1 %v9493_v28  ;;  %4980 = vmatpush1.msra.mxu0 %v9495_v44  ;;  %v9520_v28 = vld [vmem:[#allocation157_spill] sm:$0xff]  ;;  %v9521_v30 = vld [vmem:[#allocation154_spill] sm:$0xff] }
0x14a7   : > { %6477 = vmatprep.subr.mxu1 %v9496_v39  ;;  %4981 = vmatprep.subr.mxu0 %v9497_v31  ;;  %v9522_v44 = vld [vmem:[#allocation153_spill] sm:$0xff] }
0x14a8   : > { %6478 = vmatpush3.msra.mxu1 %v9496_v39  ;;  %4982 = vmatpush1.msra.mxu0 %v9498_v46  ;;  %v9523_v39 = vld [vmem:[#allocation150_spill] sm:$0xff]  ;;  %v9524_v31 = vld [vmem:[#allocation149_spill] sm:$0xff] }
0x14a9   : > { %6479 = vmatprep.subr.mxu1 %v9499_v45  ;;  %4983 = vmatprep.subr.mxu0 %v9500_v51  ;;  %v9525_v46 = vld [vmem:[#allocation146_spill] sm:$0xff] }
0x14aa   : > { %6480 = vmatpush3.msra.mxu1 %v9499_v45  ;;  %4984 = vmatpush1.msra.mxu0 %v9501_v36  ;;  %v9526_v45 = vld [vmem:[#allocation145_spill] sm:$0xff]  ;;  %v9527_v51 = vld [vmem:[#allocation142_spill] sm:$0xff] }
0x14ab   : > { %6481 = vmatprep.subr.mxu1 %v9502_v32  ;;  %4985 = vmatprep.subr.mxu0 %v9503_v4  ;;  %v9528_v36 = vld [vmem:[#allocation141_spill] sm:$0xff] }
0x14ac   : > { %6482 = vmatpush3.msra.mxu1 %v9502_v32  ;;  %4986 = vmatpush1.msra.mxu0 %v9504_v52  ;;  %v9529_v32 = vld [vmem:[#allocation138_spill] sm:$0xff]  ;;  %v9530_v4 = vld [vmem:[#allocation137_spill] sm:$0xff] }
0x14ad   : > { %6483 = vmatprep.subr.mxu1 %v9505_v47  ;;  %5996 = vmatprep.subr.mxu0 %v9506_v25  ;;  %v9531_v52 = vld [vmem:[#allocation134_spill] sm:$0xff] }
0x14ae   : > { %6484 = vmatpush3.msra.mxu1 %v9505_v47  ;;  %v9532_v47 = vld [vmem:[#allocation133_spill] sm:$0xff]  ;;  %v9533_v25 = vld [vmem:[#allocation130_spill] sm:$0xff] }
0x14af   : > { %5032 = vmatprep.subr.mxu1 %v9507_v48  ;;  %v9534_v48 = vld [vmem:[#allocation129_spill] sm:$0xff] }
0x14de   : > { %v4310_v8 = vpop.f32.mrf.mxu1 }
0x14e0   : > { %v6417_v50 = vpop.f32.mrf.mxu1 }
0x14e1   : > { %v9536_v50 = vld [vmem:[#allocation125_spill] sm:$0xff] }
0x14eb   : > { %v4383_v17 = vpop.f32.mrf.mxu0 }
0x14ed   : > { %v6422_v7 = vpop.f32.mrf.mxu0 }
0x14ee   : > { %v9538_v7 = vld [vmem:[#allocation121_spill] sm:$0xff] }
0x1538   : > { %v4456_v55 = vpop.f32.mrf.mxu1 }
0x153a   : > { %v6427_v56 = vpop.f32.mrf.mxu1 }
0x153e   : > { %v4529_v54 = vpop.f32.mrf.mxu0 }
0x153f   : > { %v6926_v57 = vpack.i.bf16 %v4529_v54, %v4456_v55  ;;  %v9539_v55 = vld [vmem:[#allocation246_spill] sm:$0xff] }
0x1540   : > { %v6432_v53 = vpop.f32.mrf.mxu0 }
0x1541   : > { %6927 = vrot.lane.b32.xlu0 %v6926_v57, %s7492_s1 }
0x1546   : > { %v4675_v58 = vpop.f32.mrf.mxu0 }
0x1548   : > { %v6442_v59 = vpop.f32.mrf.mxu0 }
0x154b   : > { %v4602_v29 = vpop.f32.mrf.mxu1 }
0x154c   : > { %v6931_v60 = vpack.i.bf16 %v4675_v58, %v4602_v29  ;;  %v4821_v61 = vpop.f32.mrf.mxu0 }
0x154d   : > { %v6437_v62 = vpop.f32.mrf.mxu1 }
0x154e   : > { %v6452_v63 = vpop.f32.mrf.mxu0  ;;  %6932 = vrot.lane.b32.xlu1 %v6931_v60, %s7491_s16 }
0x154f   : > { %v4748_v0 = vpop.f32.mrf.mxu1 }
0x1550   : > { %v6936_v1 = vpack.i.bf16 %v4821_v61, %v4748_v0 }
0x1551   : > { %v6447_v2 = vpop.f32.mrf.mxu1 }
0x1552   : > { %6937 = vrot.lane.b32.xlu0 %v6936_v1, %s7490_s26 }
0x15b3   : > { %v6928_v5 = vpop.permute.xlu0 %6927 }
0x15b4   : > { %v6930_v9 = vunpack.i.h.bf16 %v6928_v5  ;;  %v6929_v10 = vunpack.i.l.bf16 %v6928_v5 }
0x15b6   : > { %v4849_v14 = vsel %vm3559_vm5, %v4310_v8, %v6929_v10  ;;  %v4850_v15 = vsel %vm3559_vm5, %v4383_v17, %v6930_v9  ;;  %v9535_v8 = vld [vmem:[#allocation126_spill] sm:$0xff] }
0x15b7   : > { %v9537_v17 = vld [vmem:[#allocation122_spill] sm:$0xff] }
0x15c0   : > { %v6933_v6 = vpop.permute.xlu1 %6932 }
0x15c1   : > { %v6935_v11 = vunpack.i.h.bf16 %v6933_v6  ;;  %v6934_v12 = vunpack.i.l.bf16 %v6933_v6 }
0x15c3   : > { %v4851_v21 = vsel %vm1283_vm0, %v4849_v14, %v6934_v12  ;;  %v4852_v22 = vsel %vm1283_vm0, %v4850_v15, %v6935_v11  ;;  %v9541_v14 = vld [vmem:[#allocation230_spill] sm:$0xff]  ;;  %v9542_v15 = vld [vmem:[#allocation213_spill] sm:$0xff] }
0x15c4   : > { %v6938_v13 = vpop.permute.xlu0 %6937 }
0x15c5   : > { %v6940_v19 = vunpack.i.h.bf16 %v6938_v13  ;;  %v6939_v20 = vunpack.i.l.bf16 %v6938_v13  ;;  %v9540_v13 = vld [vmem:[#allocation198_spill] sm:$0xff] }
0x15c7   : > { %v4854_v23 = vsel %vm4853_vm7, %v4851_v21, %v6939_v20  ;;  %v4855_v18 = vsel %vm4853_vm7, %v4852_v22, %v6940_v19  ;;  %v9543_v19 = vld [vmem:[#allocation245_spill] sm:$0xff]  ;;  %v9546_v22 = vld [vmem:[#allocation212_spill] sm:$0xff] }
0x15c8   : > { %6485 = vmatprep.mubr.f32.mxu1 %v4854_v23  ;;  %v9544_v20 = vld [vmem:[#allocation197_spill] sm:$0xff]  ;;  %v9547_v23 = vld [vmem:[#allocation244_spill] sm:$0xff] }
0x15c9   : > { %6486 = vmatmul.mubr.f32.vlgmr.msra.gmra.mxu1 %v4855_v18  ;;  %v9545_v21 = vld [vmem:[#allocation229_spill] sm:$0xff]  ;;  %v9549_v18 = vld [vmem:[#allocation228_spill] sm:$0xff] }
0x15ca   : > { %5033 = vmatpush1.msra.mxu1 %v9508_v49  ;;  %5096 = vmatprep.mubr.f32.mxu1 %v7488_v24  ;;  %v9550_v49 = vld [vmem:[#allocation211_spill] sm:$0xff] }
0x15cb   : > { %5034 = vmatprep.subr.mxu1 %v9509_v42  ;;  %v9551_v42 = vld [vmem:[#allocation243_spill] sm:$0xff] }
0x15cc   : > { %5035 = vmatpush1.msra.mxu1 %v9510_v3  ;;  %v9552_v3 = vld [vmem:[#allocation195_spill] sm:$0xff] }
0x15cd   : > { %5036 = vmatprep.subr.mxu1 %v9511_v37  ;;  %v9553_v37 = vld [vmem:[#allocation227_spill] sm:$0xff] }
0x15ce   : > { %5037 = vmatpush1.msra.mxu1 %v9512_v33  ;;  %v9554_v33 = vld [vmem:[#allocation210_spill] sm:$0xff] }
0x15cf   : > { %5038 = vmatprep.subr.mxu1 %v9513_v35  ;;  %v9555_v35 = vld [vmem:[#allocation242_spill] sm:$0xff] }
0x15d0   : > { %5039 = vmatpush1.msra.mxu1 %v9514_v26  ;;  %v9556_v26 = vld [vmem:[#allocation194_spill] sm:$0xff] }
0x15d1   : > { %5040 = vmatprep.subr.mxu1 %v9515_v41  ;;  %v9557_v41 = vld [vmem:[#allocation226_spill] sm:$0xff] }
0x15d2   : > { %5041 = vmatpush1.msra.mxu1 %v9516_v43  ;;  %v9558_v43 = vld [vmem:[#allocation209_spill] sm:$0xff] }
0x15d3   : > { %5042 = vmatprep.subr.mxu1 %v9517_v40  ;;  %v9559_v40 = vld [vmem:[#allocation241_spill] sm:$0xff] }
0x15d4   : > { %5043 = vmatpush1.msra.mxu1 %v9518_v38  ;;  %v9560_v38 = vld [vmem:[#allocation193_spill] sm:$0xff] }
0x15d5   : > { %5044 = vmatprep.subr.mxu1 %v9519_v34  ;;  %v9561_v34 = vld [vmem:[#allocation225_spill] sm:$0xff] }
0x15d6   : > { %5045 = vmatpush1.msra.mxu1 %v9520_v28  ;;  %v9562_v28 = vld [vmem:[#allocation208_spill] sm:$0xff] }
0x15d7   : > { %5046 = vmatprep.subr.mxu1 %v9521_v30  ;;  %v9563_v30 = vld [vmem:[#allocation240_spill] sm:$0xff] }
0x15d8   : > { %5047 = vmatpush1.msra.mxu1 %v9522_v44  ;;  %v9564_v44 = vld [vmem:[#allocation192_spill] sm:$0xff] }
0x15d9   : > { %5048 = vmatprep.subr.mxu1 %v9523_v39  ;;  %v9565_v39 = vld [vmem:[#allocation224_spill] sm:$0xff] }
0x15da   : > { %5049 = vmatpush1.msra.mxu1 %v9524_v31  ;;  %v9566_v31 = vld [vmem:[#allocation207_spill] sm:$0xff] }
0x15db   : > { %5050 = vmatprep.subr.mxu1 %v9525_v46  ;;  %v9567_v46 = vld [vmem:[#allocation239_spill] sm:$0xff] }
0x15dc   : > { %5051 = vmatpush1.msra.mxu1 %v9526_v45  ;;  %v9568_v45 = vld [vmem:[#allocation191_spill] sm:$0xff] }
0x15dd   : > { %5052 = vmatprep.subr.mxu1 %v9527_v51  ;;  %v9569_v51 = vld [vmem:[#allocation223_spill] sm:$0xff] }
0x15de   : > { %5053 = vmatpush1.msra.mxu1 %v9528_v36  ;;  %v9570_v36 = vld [vmem:[#allocation206_spill] sm:$0xff] }
0x15df   : > { %5054 = vmatprep.subr.mxu1 %v9529_v32  ;;  %v9571_v32 = vld [vmem:[#allocation238_spill] sm:$0xff] }
0x15e0   : > { %5055 = vmatpush1.msra.mxu1 %v9530_v4  ;;  %v9572_v4 = vld [vmem:[#allocation190_spill] sm:$0xff] }
0x15e1   : > { %5056 = vmatprep.subr.mxu1 %v9531_v52  ;;  %v9573_v52 = vld [vmem:[#allocation222_spill] sm:$0xff] }
0x15e2   : > { %5057 = vmatpush1.msra.mxu1 %v9532_v47  ;;  %v9574_v47 = vld [vmem:[#allocation205_spill] sm:$0xff] }
0x15e3   : > { %5058 = vmatprep.subr.mxu1 %v9533_v25  ;;  %v9575_v25 = vld [vmem:[#allocation237_spill] sm:$0xff] }
0x15e4   : > { %5059 = vmatpush1.msra.mxu1 %v9534_v48  ;;  %v9576_v48 = vld [vmem:[#allocation189_spill] sm:$0xff] }
0x15e5   : > { %5060 = vmatprep.subr.mxu1 %v9535_v8  ;;  %v9577_v8 = vld [vmem:[#allocation221_spill] sm:$0xff] }
0x15e6   : > { %5061 = vmatpush1.msra.mxu1 %v9536_v50  ;;  %v9578_v50 = vld [vmem:[#allocation204_spill] sm:$0xff] }
0x15e7   : > { %5062 = vmatprep.subr.mxu1 %v9537_v17  ;;  %v9579_v17 = vld [vmem:[#allocation236_spill] sm:$0xff] }
0x15e8   : > { %5063 = vmatpush1.msra.mxu1 %v9538_v7  ;;  %v9580_v7 = vld [vmem:[#allocation188_spill] sm:$0xff] }
0x15e9   : > { %6034 = vmatprep.subr.mxu1 %v9539_v55  ;;  %v9581_v55 = vld [vmem:[#allocation220_spill] sm:$0xff] }
0x1689   : > { %v6487_v56 = vpop.f32.mrf.mxu1 }
0x168a   : > { %v8916_v54 = vadd.f32 %v6487_v56, %v8679_v16  ;;  %v9582_v56 = vld [vmem:[#allocation203_spill] sm:$0xff] }
0x168b   : > { %v4922_v57 = vpop.f32.mrf.mxu1 }
0x168c   : > { %v8919_v53 = vadd.f32 %v4922_v57, %v8675_v27  ;;  %4935 = vadd.xlane.f32.xlu0 %v8916_v54  ;;  %v9583_v57 = vld [vmem:[#allocation235_spill] sm:$0xff] }
0x168e   : > { %4933 = vadd.xlane.f32.xlu1 %v8919_v53 }
0x1715   : > { %v4936_v58 = vpop.xlane.xlu0 %4935 }
0x1716   : > { %v4938_v29 = vmul.f32 0.0078125, %v4936_v58  ;;  %v9584_v58 = vld [vmem:[#allocation187_spill] sm:$0xff] }
0x1717   : > { %v4934_v59 = vpop.xlane.xlu1 %4933 }
0x1718   : > { %v4937_v60 = vmul.f32 0.0078125, %v4934_v59  ;;  %v4940_v62 = vsub.f32 %v8916_v54, %v4938_v29  ;;  %v9585_v59 = vld [vmem:[#allocation219_spill] sm:$0xff]  ;;  %v9586_v29 = vld [vmem:[#allocation202_spill] sm:$0xff] }
0x171a   : > { %v4939_v61 = vsub.f32 %v8919_v53, %v4937_v60  ;;  %v4942_v16 = vmul.f32 %v4940_v62, %v4940_v62  ;;  %v9587_v60 = vld [vmem:[#allocation234_spill] sm:$0xff] }
0x171c   : > { %v4941_v63 = vmul.f32 %v4939_v61, %v4939_v61 }
0x171e   : > { %4943 = vadd.xlane.f32.xlu0 %v4941_v63  ;;  %v9590_v63 = vld [vmem:[#allocation201_spill] sm:$0xff] }
0x1722   : > { %4945 = vadd.xlane.f32.xlu0 %v4942_v16  ;;  %v9591_v16 = vld [vmem:[#allocation233_spill] sm:$0xff] }
0x17a7   : > { %v4944_v0 = vpop.xlane.xlu0 %4943 }
0x17a8   : > { %v4947_v1 = vmul.f32 0.0078125, %v4944_v0  ;;  %v9592_v0 = vld [vmem:[#allocation185_spill] sm:$0xff] }
0x17aa   : > { %v4949_v27 = vadd.f32 1e-05, %v4947_v1  ;;  %v9593_v1 = vld [vmem:[#allocation217_spill] sm:$0xff] }
0x17ab   : > { %v4946_v2 = vpop.xlane.xlu0 %4945 }
0x17ac   : > { %6977 = vrsqrt.f32 %v4949_v27  ;;  %v4948_v5 = vmul.f32 0.0078125, %v4946_v2  ;;  %v9594_v27 = vld [vmem:[#allocation200_spill] sm:$0xff] }
0x17ad   : > { %v9595_v2 = vld [vmem:[#allocation232_spill] sm:$0xff] }
0x17ae   : > { %v4950_v6 = vadd.f32 1e-05, %v4948_v5  ;;  %v9596_v5 = vld [vmem:[#allocation184_spill] sm:$0xff] }
0x17b0   : > { %6979 = vrsqrt.f32 %v4950_v6  ;;  %v9597_v6 = vld [vmem:[#allocation216_spill] sm:$0xff] }
0x17b9   : > { %v6978_v9 = vpop.eup %6977 }
0x17ba   : > { %v4953_v10 = vmul.f32 %v6978_v9, %v4939_v61  ;;  %v9588_v61 = vld [vmem:[#allocation186_spill] sm:$0xff]  ;;  %v9598_v9 = vld [vmem:[#allocation199_spill] sm:$0xff] }
0x17bc   : > { %5020 = vmatmul.mubr.f32.vlgmr.msra.gmra.mxu0 %v4953_v10  ;;  %5097 = vmatmul.mubr.f32.vlgmr.msra.gmra.mxu1 %v4953_v10  ;;  %v9599_v10 = vld [vmem:[#allocation231_spill] sm:$0xff] }
0x17bd   : > { %v6980_v11 = vpop.eup %6979  ;;  %5025 = vmatprep.mubr.f32.mxu0 %v7488_v24  ;;  %5102 = vmatprep.mubr.f32.mxu1 %v7488_v24  ;;  %v9548_v24 = vld [vmem:[#allocation196_spill] sm:$0xff] }
0x17be   : > { %v4954_v12 = vmul.f32 %v6980_v11, %v4940_v62  ;;  %5997 = vmatpush3.msra.mxu0 %v9540_v13  ;;  %6035 = vmatpush3.msra.mxu1 %v9541_v14  ;;  %v9589_v62 = vld [vmem:[#allocation218_spill] sm:$0xff]  ;;  %v9600_v11 = vld [vmem:[#allocation183_spill] sm:$0xff] }
0x17bf   : > { %5998 = vmatprep.subr.mxu0 %v9542_v15  ;;  %6036 = vmatprep.subr.mxu1 %v9543_v19 }
0x17c0   : > { %5026 = vmatmul.mubr.f32.gmra.mxu0 %v4954_v12  ;;  %5103 = vmatmul.mubr.f32.gmra.mxu1 %v4954_v12  ;;  %v9601_v12 = vld [vmem:[#allocation215_spill] sm:$0xff] }
0x17c1   : > { %5999 = vmatpush3.msra.mxu0 %v9544_v20  ;;  %6037 = vmatpush3.msra.mxu1 %v9545_v21 }
0x17c2   : > { %6000 = vmatprep.subr.mxu0 %v9546_v22  ;;  %6038 = vmatprep.subr.mxu1 %v9547_v23 }
0x17c3   : > { %6001 = vmatpush3.msra.mxu0 %v9548_v24  ;;  %6039 = vmatpush3.msra.mxu1 %v9549_v18 }
0x17c4   : > { %6002 = vmatprep.subr.mxu0 %v9550_v49  ;;  %6040 = vmatprep.subr.mxu1 %v9551_v42 }
0x17c5   : > { %6003 = vmatpush3.msra.mxu0 %v9552_v3  ;;  %6041 = vmatpush3.msra.mxu1 %v9553_v37 }
0x17c6   : > { %6004 = vmatprep.subr.mxu0 %v9554_v33  ;;  %6042 = vmatprep.subr.mxu1 %v9555_v35 }
0x17c7   : > { %6005 = vmatpush3.msra.mxu0 %v9556_v26  ;;  %6043 = vmatpush3.msra.mxu1 %v9557_v41 }
0x17c8   : > { %6006 = vmatprep.subr.mxu0 %v9558_v43  ;;  %6044 = vmatprep.subr.mxu1 %v9559_v40 }
0x17c9   : > { %6007 = vmatpush3.msra.mxu0 %v9560_v38  ;;  %6045 = vmatpush3.msra.mxu1 %v9561_v34 }
0x17ca   : > { %6008 = vmatprep.subr.mxu0 %v9562_v28  ;;  %6046 = vmatprep.subr.mxu1 %v9563_v30 }
0x17cb   : > { %6009 = vmatpush3.msra.mxu0 %v9564_v44  ;;  %6047 = vmatpush3.msra.mxu1 %v9565_v39 }
0x17cc   : > { %6010 = vmatprep.subr.mxu0 %v9566_v31  ;;  %6048 = vmatprep.subr.mxu1 %v9567_v46 }
0x17cd   : > { %6011 = vmatpush3.msra.mxu0 %v9568_v45  ;;  %6049 = vmatpush3.msra.mxu1 %v9569_v51 }
0x17ce   : > { %6012 = vmatprep.subr.mxu0 %v9570_v36  ;;  %6050 = vmatprep.subr.mxu1 %v9571_v32 }
0x17cf   : > { %6013 = vmatpush3.msra.mxu0 %v9572_v4  ;;  %6051 = vmatpush3.msra.mxu1 %v9573_v52 }
0x17d0   : > { %6014 = vmatprep.subr.mxu0 %v9574_v47  ;;  %6052 = vmatprep.subr.mxu1 %v9575_v25 }
0x17d1   : > { %6015 = vmatpush3.msra.mxu0 %v9576_v48  ;;  %6053 = vmatpush3.msra.mxu1 %v9577_v8 }
0x17d2   : > { %6016 = vmatprep.subr.mxu0 %v9578_v50  ;;  %6054 = vmatprep.subr.mxu1 %v9579_v17 }
0x17d3   : > { %6017 = vmatpush3.msra.mxu0 %v9580_v7  ;;  %6055 = vmatpush3.msra.mxu1 %v9581_v55 }
0x17d4   : > { %6018 = vmatprep.subr.mxu0 %v9582_v56  ;;  %6056 = vmatprep.subr.mxu1 %v9583_v57 }
0x17d5   : > { %6019 = vmatpush3.msra.mxu0 %v9584_v58  ;;  %6057 = vmatpush3.msra.mxu1 %v9585_v59 }
0x17d6   : > { %6020 = vmatprep.subr.mxu0 %v9586_v29  ;;  %6058 = vmatprep.subr.mxu1 %v9587_v60 }
0x17d7   : > { %6021 = vmatpush3.msra.mxu0 %v9588_v61  ;;  %6059 = vmatpush3.msra.mxu1 %v9589_v62 }
0x17d8   : > { %6022 = vmatprep.subr.mxu0 %v9590_v63  ;;  %6060 = vmatprep.subr.mxu1 %v9591_v16 }
0x17d9   : > { %6023 = vmatpush3.msra.mxu0 %v9592_v0  ;;  %6061 = vmatpush3.msra.mxu1 %v9593_v1 }
0x17da   : > { %6024 = vmatprep.subr.mxu0 %v9594_v27  ;;  %6062 = vmatprep.subr.mxu1 %v9595_v2 }
0x17db   : > { %6025 = vmatpush3.msra.mxu0 %v9596_v5  ;;  %6063 = vmatpush3.msra.mxu1 %v9597_v6 }
0x17dc   : > { %6026 = vmatprep.subr.mxu0 %v9598_v9  ;;  %6064 = vmatprep.subr.mxu1 %v9599_v10 }
0x17dd   : > { %6027 = vmatpush3.msra.mxu0 %v9600_v11  ;;  %6065 = vmatpush3.msra.mxu1 %v9601_v12 }
0x187c   : > { %v5021_v13 = vpop.f32.mrf.mxu0  ;;  %v5098_v14 = vpop.f32.mrf.mxu1 }
0x187d   : > { %v5109_v22 = vmax.f32 %v5021_v13, 0.0  ;;  %v5111_v23 = vmax.f32 %v5098_v14, 0.0 }
0x187e   : > { %v5023_v15 = vpop.f32.mrf.mxu0  ;;  %v5100_v19 = vpop.f32.mrf.mxu1 }
0x187f   : > { %v5110_v20 = vmax.f32 %v5023_v15, 0.0  ;;  %v5112_v21 = vmax.f32 %v5100_v19, 0.0 }
0x1880   : > { %v5027_v24 = vpop.f32.mrf.mxu0  ;;  %v5104_v18 = vpop.f32.mrf.mxu1 }
0x1881   : > { %5181 = vmatprep.mubr.f32.mxu0 %v5110_v20  ;;  %5256 = vmatprep.mubr.f32.mxu1 %v5112_v21  ;;  %v5113_v33 = vmax.f32 %v5027_v24, 0.0  ;;  %v5115_v35 = vmax.f32 %v5104_v18, 0.0 }
0x1882   : > { %v5029_v49 = vpop.f32.mrf.mxu0  ;;  %v5106_v42 = vpop.f32.mrf.mxu1  ;;  %5182 = vmatmul.mubr.f32.vlgmr.msra.gmra.mxu0 %v5109_v22  ;;  %5257 = vmatmul.mubr.f32.vlgmr.msra.gmra.mxu1 %v5111_v23 }
0x1883   : > { %v5114_v3 = vmax.f32 %v5029_v49, 0.0  ;;  %v5116_v37 = vmax.f32 %v5106_v42, 0.0 }
0x1885   : > { %5186 = vmatprep.mubr.f32.mxu0 %v5114_v3  ;;  %5261 = vmatprep.mubr.f32.mxu1 %v5116_v37 }
0x1886   : > { %5187 = vmatmul.mubr.f32.gmra.mxu0 %v5113_v33  ;;  %5262 = vmatmul.mubr.f32.gmra.mxu1 %v5115_v35 }
0x1942   : > { %v6028_v26 = vpop.f32.mrf.mxu0  ;;  %v6066_v41 = vpop.f32.mrf.mxu1 }
0x1944   : > { %v6029_v43 = vpop.f32.mrf.mxu0  ;;  %v6067_v40 = vpop.f32.mrf.mxu1 }
0x1945   : > { %v6030_v38 = vadd.f32 %v6029_v43, %v6028_v26  ;;  %v6068_v34 = vadd.f32 %v6067_v40, %v6066_v41 }
0x1946   : > { %v6031_v28 = vpop.f32.mrf.mxu0  ;;  %v6069_v30 = vpop.f32.mrf.mxu1 }
0x1947   : > { %v5259_v44 = vadd.f32 %v6068_v34, %v6030_v38 }
0x1948   : > { %v6032_v39 = vpop.f32.mrf.mxu0  ;;  %v6070_v31 = vpop.f32.mrf.mxu1 }
0x1949   : > { %v5267_v46 = vadd.f32 %v5259_v44, %v8919_v53  ;;  %v6033_v45 = vadd.f32 %v6032_v39, %v6031_v28  ;;  %v6071_v51 = vadd.f32 %v6070_v31, %v6069_v30 }
0x194b   : > { %5269 = vst [vmem:[#allocation2] sm:$0xff] %v5267_v46  ;;  %v5264_v36 = vadd.f32 %v6071_v51, %v6033_v45 }
0x194d   : > { %v5268_v32 = vadd.f32 %v5264_v36, %v8916_v54 }
0x194f   : > { %5270 = vst [vmem:[#allocation2 + $0x8] sm:$0xff] %v5268_v32 }
0x1950 PF: > { %s9602_s2 = sld [smem:[#allocation43_spill]]  ;;  %s5292_s21 = sshll.u32 %s7871_s30, 4  ;;  %s9000_s21 = int_to_ptr.vmem [resolvable:$true] %s5292_s21 }
0x1951   : > { %s9603_s14 = sld [smem:[#allocation47_spill]]  ;;  %s7319_s29 = scalar_lea.vmem %s9000_s21, 256 }
0x1952   : > { %s9604_s15 = sld [smem:[#allocation254_spill]]  ;;  %p7320_p3 = scmp.ne.s32.totalorder %s9000_s21, %s7319_s29 }
0x1953   : > { %s7493_s26 = smov [#allocation26]  }
0x1954   : > { %s7323_s16 = sshll.u32 %s7493_s26, 4  ;;  %s7324_s16 = int_to_ptr.vmem [resolvable:$false] %s7323_s16 }
0x1955   : > { %s7325_s1 = scalar_lea.vmem %s7324_s16, 512  ;;  %p7326_p10 = scmp.lt.s32.totalorder %s9000_s21, %s7324_s16 }
0x1956   : > { %s9162_s3 = sshll.u32 %s9602_s2, 7  ;;  %p7327_p11 = scmp.lt.s32.totalorder %s7325_s1, %s7319_s29 }
0x1957   : > { %p9605_p6 = scmp.ne.s32.totalorder %s9603_s14, 0 }
0x1958   : > { %s8997_s17 = scalar_lea.hbm %s9604_s15, %s9162_s3  ;;  %p7328_p9 = por %p7327_p11, %p7326_p10 }
0x1959   : > { %p7321_p13 = pnand %p7320_p3, %p9605_p6 }
0x195b   : > { %p7322_p7 = pneg %p7321_p13 }
0x195d   : > { %p7329_p12 = pnand %p7328_p9, %p7322_p7 }
0x195f   : > { %7332 = shalt.err (!%p7329_p12)
}
0x1960   : > { %s7333_s30 = scalar_lea.hbm %s8997_s17, 256  ;;  %s7337_s26 = scalar_lea.hbm %s9604_s15, 768 }
0x1961   : > { %p7334_p5 = scmp.ne.s32.totalorder %s8997_s17, %s7333_s30  ;;  %p7338_p8 = scmp.lt.s32.totalorder %s8997_s17, %s9604_s15 }
0x1962   : > { %p7339_p0 = scmp.lt.s32.totalorder %s7337_s26, %s7333_s30 }
0x1963   : > { %p7335_p1 = pnand %p7334_p5, %p9605_p6 }
0x1964   : > { %p7340_p2 = por %p7339_p0, %p7338_p8 }
0x1965   : > { %p7336_p4 = pneg %p7335_p1 }
0x1967   : > { %p7341_p3 = pnand %p7340_p2, %p7336_p4 }
0x1969   : > { %7344 = shalt.err (!%p7341_p3)
}
0x196a   : > { %s7494_s29 = smov 128   ;;  %s7495_s16 = smov 384  }
0x196b   : > { %s7496_s1 = smov 8   ;;  %s9606_s3 = scalar_lea.sflag [#allocation5], %s7832_s18 }
0x196c   : > { %6549 = dma.vmem_to_hbm [thread:$0]  (%p9605_p6), %s9000_s21, 256, %s8997_s17, %s9606_s3, %s7494_s29, %s7495_s16, %s7496_s1  }
0x196d   : > { %s9607_s27 = sshll.u32 %s9602_s2, 7  ;;  %s9608_s24 = sld [smem:[#allocation255_spill]] }
0x196e   : > { %s5310_s0 = sshll.u32 %s7873_s25, 4  ;;  %s5277_s4 = scalar_lea.sflag [#allocation28], %s7832_s18  ;;  %s9036_s0 = int_to_ptr.vmem [resolvable:$true] %s5310_s0 }
0x196f   : > { %s7345_s5 = scalar_lea.vmem %s9036_s0, 256  ;;  %s7497_s6 = smov [#allocation27]  }
0x1970   : > { %p7346_p13 = scmp.ne.s32.totalorder %s9036_s0, %s7345_s5  ;;  %s7349_s17 = sshll.u32 %s7497_s6, 4  ;;  %s7350_s17 = int_to_ptr.vmem [resolvable:$false] %s7349_s17 }
0x1971   : > { %s7351_s2 = scalar_lea.vmem %s7350_s17, 512  ;;  %p7352_p11 = scmp.lt.s32.totalorder %s9036_s0, %s7350_s17 }
0x1972   : > { %p7347_p7 = pnand %p7346_p13, %p9605_p6  ;;  %p7353_p9 = scmp.lt.s32.totalorder %s7351_s2, %s7345_s5 }
0x1973   : > { %s9033_s26 = scalar_lea.hbm %s9608_s24, %s9607_s27 }
0x1974   : > { %p7348_p10 = pneg %p7347_p7  ;;  %p7354_p12 = por %p7353_p9, %p7352_p11 }
0x1976   : > { %p7355_p5 = pnand %p7354_p12, %p7348_p10 }
0x1978   : > { %7358 = shalt.err (!%p7355_p5)
}
0x1979   : > { %s7359_s25 = scalar_lea.hbm %s9033_s26, 256  ;;  %s7363_s6 = scalar_lea.hbm %s9608_s24, 768 }
0x197a   : > { %p7360_p1 = scmp.ne.s32.totalorder %s9033_s26, %s7359_s25  ;;  %p7364_p0 = scmp.lt.s32.totalorder %s9033_s26, %s9608_s24 }
0x197b   : > { %p7365_p2 = scmp.lt.s32.totalorder %s7363_s6, %s7359_s25 }
0x197c   : > { %p7361_p4 = pnand %p7360_p1, %p9605_p6 }
0x197d   : > { %p7366_p3 = por %p7365_p2, %p7364_p0 }
0x197e   : > { %p7362_p8 = pneg %p7361_p4 }
0x1980   : > { %p7367_p13 = pnand %p7366_p3, %p7362_p8 }
0x1982   : > { %7370 = shalt.err (!%p7367_p13)
}
0x1983   : > { %6550 = dma.vmem_to_hbm [thread:$0]  (%p9605_p6), %s9036_s0, 256, %s9033_s26, %s5277_s4, %s7494_s29, %s7495_s16, %s7496_s1  }
0x1984 PF: > { %s9609_s5 = sld [smem:[#allocation42_spill]]  ;;  %p6626_p7 = scmp.ge.s32.totalorder %s7457_s23, 2 }
0x1985   : > { %s9610_s30 = sld [smem:[#allocation49_spill]] }
0x198a   : > { %s5325_s28 = sand.u32 1, %s9609_s5  }
0x198b   : > { %p9611_p10 = scmp.ne.s32.totalorder %s9610_s30, 0  ;;  %s5326_s17 = scalar_lea.sflag [#allocation5], %s5325_s28 }
0x198d   : > { %p6594_p11 = pnand %p6626_p7, %p9611_p10 }
0x198f   : > { %p6595_p9 = pneg %p6594_p11 }
0x1991   : > { %7428 = dma.done.wait (%p6595_p9), %s5326_s17, 256  }
0x1992   : > { %7430 = vsyncadd (%p6595_p9), %s5326_s17, 4294967040  ;;  %s5335_s2 = scalar_lea.sflag [#allocation28], %s5325_s28 }
0x1993   : > { %7432 = dma.done.wait (%p6595_p9), %s5335_s2, 256  }
0x1994   : > { %7434 = vsyncadd (%p6595_p9), %s5335_s2, 4294967040  ;;  %s42_s23 = sadd.s32 1, %s7457_s23   ;;  %s9612_s0 = sld [smem:[#allocation48_spill]] }
0x1995   : > { %p39_p12 = scmp.ge.s32.totalorder %s42_s23, 5   ;;  %s9613_s4 = sld [smem:[#allocation44_spill]] }
0x1996   : > { %s9614_s18 = smov %s7441_s19  ;;  %s9615_s19 = smov %s7445_s20 }
0x1997   : > { %s9617_s21 = smov %s7453_s22  ;;  %41 = sbr.rel (!%p39_p12) target bundleno = 25 (0x19), region = 204 }
0x199a   : > { %s9616_s20 = smov %s9612_s0 }
0x199b   : > { %s9618_s22 = smov %s9613_s4 }
0x199c   :  { %5340 = vsyncpa [#allocation4], 1 }
0x199d   :  { %5342 = vsyncpa [#allocation4 + $0x1], 1 }
0x199e   :  { %5343 = vsyncpa [#allocation7], 1 }
0x199f   :  { %5344 = vsyncpa [#allocation10], 1 }
0x19a0   :  { %5345 = vsyncpa [#allocation13], 1 }
0x19a1   :  { %5346 = vsyncpa [#allocation16], 1 }
0x19a2   :  { %5347 = vsyncpa [#allocation19], 1 }
0x19a3   :  { %5348 = vsyncpa [#allocation22], 1 }
0x19a4   :  { %5349 = vsyncpa [#allocation25], 1 }
0x19a5   :  { %5350 = vsyncpa [#allocation5], 1 }
0x19a6   :  { %5352 = vsyncpa [#allocation5 + $0x1], 1 }
0x19a7   :  { %5353 = vsyncpa [#allocation28], 1 }
0x19a8   :  { %5355 = vsyncpa [#allocation28 + $0x1], 1 }

</bundles_post_ra>
